<compile_context>
chip_gen: v6e
topology: v6e:2x2x1
jax: 0.10.0
libtpu: 0.0.40
codegen_flags: <defaults>
</compile_context>

<pallas_src>
import functools

import jax
import jax.numpy as jnp
from jax import lax
from jax.experimental import pallas as pl
from jax.experimental.pallas import tpu as pltpu


def _round_up(x, m):
    return ((x + m - 1) // m) * m


# ----------------------------- Pallas kernels -------------------------------

def _conv1x1_stats_kernel(x_ref, w_ref, y_ref, sum_ref, ssq_ref):
    """1x1 conv (pure channel matmul on the MXU) + per-channel sum / sumsq."""
    tb, h, cin = x_ref.shape
    cp = w_ref.shape[1]
    x = x_ref[...].reshape(tb * h, cin)                        # bf16
    y = jnp.dot(x, w_ref[...], preferred_element_type=jnp.float32)
    y_ref[...] = y.reshape(tb, h, cp).astype(y_ref.dtype)
    sum_ref[...] = jnp.broadcast_to(jnp.sum(y, axis=0, keepdims=True), (8, cp))
    ssq_ref[...] = jnp.broadcast_to(jnp.sum(y * y, axis=0, keepdims=True), (8, cp))


def _bn_relu_conv31_stats_kernel(y1p_ref, s1_ref, b1_ref, w2_ref,
                                 y2_ref, sum_ref, ssq_ref, *, nb):
    """BN1+ReLU fused with the (3,1) conv (3 shifted-tap matmuls) + BN2 stats.

    y1p_ref is the raw conv1 output with one zero row of H padding on each
    side: block shape (tb, h+2, cp).  Tap k reads rows [k, k+h).
    """
    tb, h, cp = y2_ref.shape
    hp = h + 2
    a = y1p_ref[...].astype(jnp.float32)
    a = jnp.maximum(a * s1_ref[...] + b1_ref[...], 0.0)        # BN1 + ReLU (f32)
    # Zero the H zero-padding rows and any strips beyond the true N*W count so
    # they feed neither conv2 nor the BN2 statistics.
    row = lax.broadcasted_iota(jnp.int32, (1, hp, 1), 1)
    strip = pl.program_id(0) * tb + lax.broadcasted_iota(jnp.int32, (tb, 1, 1), 0)
    valid = (row >= 1) & (row <= h) & (strip < nb)
    a = jnp.where(valid, a, 0.0)

    acc = jnp.zeros((tb * h, cp), jnp.float32)
    for k in range(3):                                         # static, unrolled
        xk = a[:, k:k + h, :].astype(jnp.bfloat16).reshape(tb * h, cp)
        acc = acc + jnp.dot(xk, w2_ref[k], preferred_element_type=jnp.float32)

    y2_ref[...] = acc.reshape(tb, h, cp).astype(y2_ref.dtype)
    sum_ref[...] = jnp.broadcast_to(jnp.sum(acc, axis=0, keepdims=True), (8, cp))
    ssq_ref[...] = jnp.broadcast_to(jnp.sum(acc * acc, axis=0, keepdims=True), (8, cp))


def _bn_relu_kernel(y_ref, s_ref, b_ref, o_ref):
    """Final BN2 + ReLU, elementwise, pipelined over strip tiles."""
    y = y_ref[...].astype(jnp.float32)
    o_ref[...] = jnp.maximum(y * s_ref[...] + b_ref[...], 0.0)


# ------------------------------ host wrapper --------------------------------

def _finalize_bn(part_sum, part_ssq, count, gamma_p, beta_p, eps):
    """Per-tile partial sums -> (scale, shift) for y*scale + shift normalize."""
    s = jnp.sum(part_sum[::8, :], axis=0, keepdims=True)       # rows are replicated x8
    q = jnp.sum(part_ssq[::8, :], axis=0, keepdims=True)
    mean = s / count
    var = jnp.maximum(q / count - mean * mean, 0.0)            # biased var (train mode)
    scale = gamma_p * lax.rsqrt(var + eps)
    shift = beta_p - mean * scale
    return scale, shift


def incept_block_b(x, w1, gamma1, beta1, w2, gamma2, beta2,
                   *, eps=1e-5, lane=128, target_rows=512):
    """x: [N, Cin, H, W] NCHW.  w1: [Cout, Cin, 1, 1].  w2: [Cout, Cout, 3, 1]."""
    n, cin, h, w = x.shape
    cout = w1.shape[0]
    cin_p = _round_up(cin, lane)
    cp = _round_up(cout, lane)

    nb = n * w                                   # independent (n, w) column strips
    tb = max(1, min(nb, max(1, target_rows // h)))
    grid_m = _round_up(nb, tb) // tb
    nb_pad = grid_m * tb
    m_true = n * h * w                           # rows entering BN statistics

    # NCHW -> [N, W, H, C] strips (H second-minor so the (3,1) taps stay local),
    # zero-pad strips and channels, cast activations to bf16.
    x_s = jnp.transpose(x, (0, 3, 2, 1)).reshape(nb, h, cin)
    x_s = jnp.pad(x_s, ((0, nb_pad - nb), (0, 0), (0, cin_p - cin))).astype(jnp.bfloat16)

    # Lane-dense, zero-padded matmul weights.
    w1_m = jnp.zeros((cin_p, cp), jnp.bfloat16).at[:cin, :cout].set(
        w1[:, :, 0, 0].T.astype(jnp.bfloat16))
    w2_m = jnp.zeros((3, cp, cp), jnp.bfloat16).at[:, :cout, :cout].set(
        jnp.transpose(w2[:, :, :, 0], (2, 1, 0)).astype(jnp.bfloat16))

    g1p = jnp.zeros((1, cp), jnp.float32).at[0, :cout].set(gamma1.astype(jnp.float32))
    b1p = jnp.zeros((1, cp), jnp.float32).at[0, :cout].set(beta1.astype(jnp.float32))
    g2p = jnp.zeros((1, cp), jnp.float32).at[0, :cout].set(gamma2.astype(jnp.float32))
    b2p = jnp.zeros((1, cp), jnp.float32).at[0, :cout].set(beta2.astype(jnp.float32))

    grid = (grid_m,)
    par = pltpu.CompilerParams(dimension_semantics=("parallel",))

    # ---- Stage A: 1x1 conv + BN1 batch statistics ----
    y1, s1p, q1p = pl.pallas_call(
        _conv1x1_stats_kernel,
        out_shape=(jax.ShapeDtypeStruct((nb_pad, h, cp), jnp.bfloat16),
                   jax.ShapeDtypeStruct((8 * grid_m, cp), jnp.float32),
                   jax.ShapeDtypeStruct((8 * grid_m, cp), jnp.float32)),
        grid=grid,
        in_specs=[pl.BlockSpec((tb, h, cin_p), lambda i: (i, 0, 0)),
                  pl.BlockSpec((cin_p, cp), lambda i: (0, 0))],
        out_specs=(pl.BlockSpec((tb, h, cp), lambda i: (i, 0, 0)),
                   pl.BlockSpec((8, cp), lambda i: (i, 0)),
                   pl.BlockSpec((8, cp), lambda i: (i, 0))),
        compiler_params=par,
    )(x_s, w1_m)
    scale1, shift1 = _finalize_bn(s1p, q1p, m_true, g1p, b1p, eps)

    # ---- Stage B: BN1+ReLU fused into the (3,1) conv + BN2 statistics ----
    y1p = jnp.pad(y1, ((0, 0), (1, 1), (0, 0)))   # zero rows = conv H padding
    y2, s2p, q2p = pl.pallas_call(
        functools.partial(_bn_relu_conv31_stats_kernel, nb=nb),
        out_shape=(jax.ShapeDtypeStruct((nb_pad, h, cp), jnp.bfloat16),
                   jax.ShapeDtypeStruct((8 * grid_m, cp), jnp.float32),
                   jax.ShapeDtypeStruct((8 * grid_m, cp), jnp.float32)),
        grid=grid,
        in_specs=[pl.BlockSpec((tb, h + 2, cp), lambda i: (i, 0, 0)),
                  pl.BlockSpec((1, cp), lambda i: (0, 0)),
                  pl.BlockSpec((1, cp), lambda i: (0, 0)),
                  pl.BlockSpec((3, cp, cp), lambda i: (0, 0, 0))],
        out_specs=(pl.BlockSpec((tb, h, cp), lambda i: (i, 0, 0)),
                   pl.BlockSpec((8, cp), lambda i: (i, 0)),
                   pl.BlockSpec((8, cp), lambda i: (i, 0))),
        compiler_params=par,
    )(y1p, scale1, shift1, w2_m)
    scale2, shift2 = _finalize_bn(s2p, q2p, m_true, g2p, b2p, eps)

    # ---- Stage C: final BN2 + ReLU ----
    out = pl.pallas_call(
        _bn_relu_kernel,
        out_shape=jax.ShapeDtypeStruct((nb_pad, h, cp), jnp.float32),
        grid=grid,
        in_specs=[pl.BlockSpec((tb, h, cp), lambda i: (i, 0, 0)),
                  pl.BlockSpec((1, cp), lambda i: (0, 0)),
                  pl.BlockSpec((1, cp), lambda i: (0, 0))],
        out_specs=pl.BlockSpec((tb, h, cp), lambda i: (i, 0, 0)),
        compiler_params=par,
    )(y2, scale2, shift2)

    out = out[:nb, :, :cout].reshape(n, w, h, cout)
    return jnp.transpose(out, (0, 3, 2, 1))                    # back to NCHW


# -------------------------------- reference ---------------------------------

def _reference(x, w1, g1, b1, w2, g2, b2, eps=1e-5):
    def block(x, w, g, b, padding):
        y = lax.conv_general_dilated(
            x, w, window_strides=(1, 1), padding=padding,
            dimension_numbers=("NCHW", "OIHW", "NCHW"))
        mean = y.mean(axis=(0, 2, 3), keepdims=True)
        var = ((y - mean) ** 2).mean(axis=(0, 2, 3), keepdims=True)
        c = w.shape[0]
        yh = (y - mean) * lax.rsqrt(var + eps) * g.reshape(1, c, 1, 1) + b.reshape(1, c, 1, 1)
        return jnp.maximum(yh, 0.0)
    y = block(x, w1, g1, b1, ((0, 0), (0, 0)))
    return block(y, w2, g2, b2, ((1, 1), (0, 0)))


# ----------------------------------- main ------------------------------------

if __name__ == "__main__":
    key = jax.random.PRNGKey(0)
    kx, k1, k2, kg1, kb1, kg2, kb2 = jax.random.split(key, 7)

    N, Cin, H, W = 2, 4, 16, 16
    Cout = 8

    x = jax.random.normal(kx, (N, Cin, H, W), jnp.float32)
    w1 = jax.random.normal(k1, (Cout, Cin, 1, 1), jnp.float32) * 0.1
    w2 = jax.random.normal(k2, (Cout, Cout, 3, 1), jnp.float32) * 0.1
    gamma1 = 1.0 + 0.1 * jax.random.normal(kg1, (Cout,), jnp.float32)
    beta1 = 0.1 * jax.random.normal(kb1, (Cout,), jnp.float32)
    gamma2 = 1.0 + 0.1 * jax.random.normal(kg2, (Cout,), jnp.float32)
    beta2 = 0.1 * jax.random.normal(kb2, (Cout,), jnp.float32)

    fwd = jax.jit(incept_block_b)
    out = jax.block_until_ready(fwd(x, w1, gamma1, beta1, w2, gamma2, beta2))

    ref = _reference(x, w1, gamma1, beta1, w2, gamma2, beta2)
    assert out.shape == (N, Cout, H, W), out.shape
    max_err = float(jnp.max(jnp.abs(out - ref)))
    # bf16 activations/weights with f32 accumulation -> loose tolerance.
    assert jnp.allclose(out, ref, atol=5e-2, rtol=5e-2), max_err

    print("KERNEL_OK")
</pallas_src>

<mosaic_0001>
module attributes {stable_mosaic.version = 11 : i64} {
  func.func @_conv1x1_stats_kernel(%arg0: i32, %arg1: memref<32x16x128xbf16, #tpu.memory_space<vmem>>, %arg2: memref<128x128xbf16, #tpu.memory_space<vmem>>, %arg3: memref<32x16x128xbf16, #tpu.memory_space<vmem>>, %arg4: memref<8x128xf32, #tpu.memory_space<vmem>>, %arg5: memref<8x128xf32, #tpu.memory_space<vmem>>) attributes {dimension_semantics = [#tpu.dimension_semantics<parallel>], iteration_bounds = array<i64: 1>, scalar_prefetch = 0 : i64, scratch_operands = 0 : i64, tpu.core_type = #tpu.core_type<tc>, window_params = [{transform_indices = @transform_0, window_bounds = array<i64: 32, 16, 128>}, {pipeline_mode = #tpu.pipeline_mode<synchronous>, transform_indices = @transform_1, window_bounds = array<i64: 128, 128>}, {transform_indices = @transform_2, window_bounds = array<i64: 32, 16, 128>}, {transform_indices = @transform_3, window_bounds = array<i64: 8, 128>}, {transform_indices = @transform_4, window_bounds = array<i64: 8, 128>}]} {
    %c0 = arith.constant 0 : index
    %c0_0 = arith.constant 0 : index
    %c0_1 = arith.constant 0 : index
    %0 = vector.load %arg1[%c0, %c0_0, %c0_1] : memref<32x16x128xbf16, #tpu.memory_space<vmem>>, vector<32x16x128xbf16>
    %1 = vector.shape_cast %0 : vector<32x16x128xbf16> to vector<512x128xbf16>
    %c0_2 = arith.constant 0 : index
    %c0_3 = arith.constant 0 : index
    %2 = vector.load %arg2[%c0_2, %c0_3] : memref<128x128xbf16, #tpu.memory_space<vmem>>, vector<128x128xbf16>
    %cst = arith.constant dense<0.000000e+00> : vector<512x128xf32>
    %3 = tpu.matmul %1, %2, %cst {dimension_numbers = #tpu.dot_dimension_numbers<[1], [0], [0], [1], [0, 0, 1, 1], [], []>} : vector<512x128xbf16>, vector<128x128xbf16>, vector<512x128xf32> -> vector<512x128xf32>
    %4 = vector.shape_cast %3 : vector<512x128xf32> to vector<32x16x128xf32>
    %5 = arith.truncf %4 : vector<32x16x128xf32> to vector<32x16x128xbf16>
    %c0_4 = arith.constant 0 : index
    %c0_5 = arith.constant 0 : index
    %c0_6 = arith.constant 0 : index
    %6 = vector.load %arg3[%c0_4, %c0_5, %c0_6] : memref<32x16x128xbf16, #tpu.memory_space<vmem>>, vector<32x16x128xbf16>
    tpu.vector_store %arg3[%c0_4, %c0_5, %c0_6], %5 {strides = array<i32>} : memref<32x16x128xbf16, #tpu.memory_space<vmem>>, vector<32x16x128xbf16>,
    %cst_7 = arith.constant dense<0.000000e+00> : vector<128xf32>
    %7 = vector.multi_reduction <add>, %3, %cst_7 [0] : vector<512x128xf32> to vector<128xf32>
    %8 = vector.shape_cast %7 : vector<128xf32> to vector<1x128xf32>
    %9 = vector.shape_cast %8 : vector<1x128xf32> to vector<1x128xf32>
    %10 = vector.broadcast %9 : vector<1x128xf32> to vector<8x128xf32>
    %c0_8 = arith.constant 0 : index
    %c0_9 = arith.constant 0 : index
    %11 = vector.load %arg4[%c0_8, %c0_9] : memref<8x128xf32, #tpu.memory_space<vmem>>, vector<8x128xf32>
    tpu.vector_store %arg4[%c0_8, %c0_9], %10 {strides = array<i32>} : memref<8x128xf32, #tpu.memory_space<vmem>>, vector<8x128xf32>,
    %12 = arith.mulf %3, %3 : vector<512x128xf32>
    %cst_10 = arith.constant dense<0.000000e+00> : vector<128xf32>
    %13 = vector.multi_reduction <add>, %12, %cst_10 [0] : vector<512x128xf32> to vector<128xf32>
    %14 = vector.shape_cast %13 : vector<128xf32> to vector<1x128xf32>
    %15 = vector.shape_cast %14 : vector<1x128xf32> to vector<1x128xf32>
    %16 = vector.broadcast %15 : vector<1x128xf32> to vector<8x128xf32>
    %c0_11 = arith.constant 0 : index
    %c0_12 = arith.constant 0 : index
    %17 = vector.load %arg5[%c0_11, %c0_12] : memref<8x128xf32, #tpu.memory_space<vmem>>, vector<8x128xf32>
    tpu.vector_store %arg5[%c0_11, %c0_12], %16 {strides = array<i32>} : memref<8x128xf32, #tpu.memory_space<vmem>>, vector<8x128xf32>,
    return
  }
  func.func @transform_0(%arg0: i32) -> (i32, i32, i32) {
    %c0_i32 = arith.constant 0 : i32
    %c0_i32_0 = arith.constant 0 : i32
    %c0_i32_1 = arith.constant 0 : i32
    return %arg0, %c0_i32, %c0_i32_0 : i32, i32, i32
  }
  func.func @transform_1(%arg0: i32) -> (i32, i32) {
    %c0_i32 = arith.constant 0 : i32
    %c0_i32_0 = arith.constant 0 : i32
    %c0_i32_1 = arith.constant 0 : i32
    return %c0_i32, %c0_i32_0 : i32, i32
  }
  func.func @transform_2(%arg0: i32) -> (i32, i32, i32) {
    %c0_i32 = arith.constant 0 : i32
    %c0_i32_0 = arith.constant 0 : i32
    %c0_i32_1 = arith.constant 0 : i32
    return %arg0, %c0_i32, %c0_i32_0 : i32, i32, i32
  }
  func.func @transform_3(%arg0: i32) -> (i32, i32) {
    %c0_i32 = arith.constant 0 : i32
    %c0_i32_0 = arith.constant 0 : i32
    return %arg0, %c0_i32 : i32, i32
  }
  func.func @transform_4(%arg0: i32) -> (i32, i32) {
    %c0_i32 = arith.constant 0 : i32
    %c0_i32_0 = arith.constant 0 : i32
    return %arg0, %c0_i32 : i32, i32
  }
}

module attributes {stable_mosaic.version = 11 : i64} {
  func.func @_bn_relu_conv31_stats_kernel(%arg0: i32, %arg1: memref<32x18x128xbf16, #tpu.memory_space<vmem>>, %arg2: memref<1x128xf32, #tpu.memory_space<vmem>>, %arg3: memref<1x128xf32, #tpu.memory_space<vmem>>, %arg4: memref<3x128x128xbf16, #tpu.memory_space<vmem>>, %arg5: memref<32x16x128xbf16, #tpu.memory_space<vmem>>, %arg6: memref<8x128xf32, #tpu.memory_space<vmem>>, %arg7: memref<8x128xf32, #tpu.memory_space<vmem>>) attributes {dimension_semantics = [#tpu.dimension_semantics<parallel>], iteration_bounds = array<i64: 1>, scalar_prefetch = 0 : i64, scratch_operands = 0 : i64, tpu.core_type = #tpu.core_type<tc>, window_params = [{transform_indices = @transform_0, window_bounds = array<i64: 32, 18, 128>}, {pipeline_mode = #tpu.pipeline_mode<synchronous>, transform_indices = @transform_1, window_bounds = array<i64: 1, 128>}, {pipeline_mode = #tpu.pipeline_mode<synchronous>, transform_indices = @transform_2, window_bounds = array<i64: 1, 128>}, {pipeline_mode = #tpu.pipeline_mode<synchronous>, transform_indices = @transform_3, window_bounds = array<i64: 3, 128, 128>}, {transform_indices = @transform_4, window_bounds = array<i64: 32, 16, 128>}, {transform_indices = @transform_5, window_bounds = array<i64: 8, 128>}, {transform_indices = @transform_6, window_bounds = array<i64: 8, 128>}]} {
    %c0 = arith.constant 0 : index
    %c0_0 = arith.constant 0 : index
    %c0_1 = arith.constant 0 : index
    %0 = vector.load %arg1[%c0, %c0_0, %c0_1] : memref<32x18x128xbf16, #tpu.memory_space<vmem>>, vector<32x18x128xbf16>
    %1 = arith.extf %0 : vector<32x18x128xbf16> to vector<32x18x128xf32>
    %c0_2 = arith.constant 0 : index
    %c0_3 = arith.constant 0 : index
    %2 = vector.load %arg2[%c0_2, %c0_3] : memref<1x128xf32, #tpu.memory_space<vmem>>, vector<1x128xf32>
    %3 = vector.shape_cast %2 : vector<1x128xf32> to vector<1x1x128xf32>
    %4 = vector.broadcast %3 : vector<1x1x128xf32> to vector<32x18x128xf32>
    %5 = arith.mulf %1, %4 : vector<32x18x128xf32>
    %c0_4 = arith.constant 0 : index
    %c0_5 = arith.constant 0 : index
    %6 = vector.load %arg3[%c0_4, %c0_5] : memref<1x128xf32, #tpu.memory_space<vmem>>, vector<1x128xf32>
    %7 = vector.shape_cast %6 : vector<1x128xf32> to vector<1x1x128xf32>
    %8 = vector.broadcast %7 : vector<1x1x128xf32> to vector<32x18x128xf32>
    %9 = arith.addf %5, %8 : vector<32x18x128xf32>
    %cst = arith.constant 0.000000e+00 : f32
    %10 = vector.broadcast %cst : f32 to vector<32x18x128xf32>
    %11 = arith.maximumf %9, %10 : vector<32x18x128xf32>
    %12 = tpu.iota {dimensions = array<i32: 1>} : vector<1x18x1xi32>
    %c32_i32 = arith.constant 32 : i32
    %13 = arith.muli %arg0, %c32_i32 : i32
    %14 = tpu.iota {dimensions = array<i32: 0>} : vector<32x1x1xi32>
    %15 = vector.broadcast %13 : i32 to vector<32x1x1xi32>
    %16 = arith.addi %15, %14 : vector<32x1x1xi32>
    %c1_i32 = arith.constant 1 : i32
    %17 = vector.broadcast %c1_i32 : i32 to vector<1x18x1xi32>
    %18 = arith.cmpi sge, %12, %17 : vector<1x18x1xi32>
    %c16_i32 = arith.constant 16 : i32
    %19 = vector.broadcast %c16_i32 : i32 to vector<1x18x1xi32>
    %20 = arith.cmpi sle, %12, %19 : vector<1x18x1xi32>
    %21 = arith.andi %18, %20 : vector<1x18x1xi1>
    %c32_i32_6 = arith.constant 32 : i32
    %22 = vector.broadcast %c32_i32_6 : i32 to vector<32x1x1xi32>
    %23 = arith.cmpi slt, %16, %22 : vector<32x1x1xi32>
    %24 = vector.broadcast %21 : vector<1x18x1xi1> to vector<32x18x1xi1>
    %25 = vector.broadcast %23 : vector<32x1x1xi1> to vector<32x18x1xi1>
    %26 = arith.andi %24, %25 : vector<32x18x1xi1>
    %cst_7 = arith.constant 0.000000e+00 : f32
    %27 = vector.shape_cast %26 : vector<32x18x1xi1> to vector<32x18x1xi1>
    %28 = vector.broadcast %27 : vector<32x18x1xi1> to vector<32x18x128xi1>
    %29 = vector.broadcast %cst_7 : f32 to vector<32x18x128xf32>
    %30 = arith.select %28, %11, %29 : vector<32x18x128xi1>, vector<32x18x128xf32>
    %cst_8 = arith.constant 0.000000e+00 : f32
    %31 = vector.broadcast %cst_8 : f32 to vector<512x128xf32>
    %32 = vector.extract_strided_slice %30 {offsets = [0, 0, 0], sizes = [32, 16, 128], strides = [1, 1, 1]} : vector<32x18x128xf32> to vector<32x16x128xf32>
    %33 = arith.truncf %32 : vector<32x16x128xf32> to vector<32x16x128xbf16>
    %34 = vector.shape_cast %33 : vector<32x16x128xbf16> to vector<512x128xbf16>
    %c0_9 = arith.constant 0 : index
    %c0_10 = arith.constant 0 : index
    %c0_11 = arith.constant 0 : index
    %35 = vector.load %arg4[%c0_9, %c0_10, %c0_11] : memref<3x128x128xbf16, #tpu.memory_space<vmem>>, vector<1x128x128xbf16>
    %36 = vector.shape_cast %35 : vector<1x128x128xbf16> to vector<128x128xbf16>
    %cst_12 = arith.constant dense<0.000000e+00> : vector<512x128xf32>
    %37 = tpu.matmul %34, %36, %cst_12 {dimension_numbers = #tpu.dot_dimension_numbers<[1], [0], [0], [1], [0, 0, 1, 1], [], []>} : vector<512x128xbf16>, vector<128x128xbf16>, vector<512x128xf32> -> vector<512x128xf32>
    %38 = arith.addf %31, %37 : vector<512x128xf32>
    %39 = vector.extract_strided_slice %30 {offsets = [0, 1, 0], sizes = [32, 16, 128], strides = [1, 1, 1]} : vector<32x18x128xf32> to vector<32x16x128xf32>
    %40 = arith.truncf %39 : vector<32x16x128xf32> to vector<32x16x128xbf16>
    %41 = vector.shape_cast %40 : vector<32x16x128xbf16> to vector<512x128xbf16>
    %c1 = arith.constant 1 : index
    %c0_13 = arith.constant 0 : index
    %c0_14 = arith.constant 0 : index
    %42 = vector.load %arg4[%c1, %c0_13, %c0_14] : memref<3x128x128xbf16, #tpu.memory_space<vmem>>, vector<1x128x128xbf16>
    %43 = vector.shape_cast %42 : vector<1x128x128xbf16> to vector<128x128xbf16>
    %cst_15 = arith.constant dense<0.000000e+00> : vector<512x128xf32>
    %44 = tpu.matmul %41, %43, %cst_15 {dimension_numbers = #tpu.dot_dimension_numbers<[1], [0], [0], [1], [0, 0, 1, 1], [], []>} : vector<512x128xbf16>, vector<128x128xbf16>, vector<512x128xf32> -> vector<512x128xf32>
    %45 = arith.addf %38, %44 : vector<512x128xf32>
    %46 = vector.extract_strided_slice %30 {offsets = [0, 2, 0], sizes = [32, 16, 128], strides = [1, 1, 1]} : vector<32x18x128xf32> to vector<32x16x128xf32>
    %47 = arith.truncf %46 : vector<32x16x128xf32> to vector<32x16x128xbf16>
    %48 = vector.shape_cast %47 : vector<32x16x128xbf16> to vector<512x128xbf16>
    %c2 = arith.constant 2 : index
    %c0_16 = arith.constant 0 : index
    %c0_17 = arith.constant 0 : index
    %49 = vector.load %arg4[%c2, %c0_16, %c0_17] : memref<3x128x128xbf16, #tpu.memory_space<vmem>>, vector<1x128x128xbf16>
    %50 = vector.shape_cast %49 : vector<1x128x128xbf16> to vector<128x128xbf16>
    %cst_18 = arith.constant dense<0.000000e+00> : vector<512x128xf32>
    %51 = tpu.matmul %48, %50, %cst_18 {dimension_numbers = #tpu.dot_dimension_numbers<[1], [0], [0], [1], [0, 0, 1, 1], [], []>} : vector<512x128xbf16>, vector<128x128xbf16>, vector<512x128xf32> -> vector<512x128xf32>
    %52 = arith.addf %45, %51 : vector<512x128xf32>
    %53 = vector.shape_cast %52 : vector<512x128xf32> to vector<32x16x128xf32>
    %54 = arith.truncf %53 : vector<32x16x128xf32> to vector<32x16x128xbf16>
    %c0_19 = arith.constant 0 : index
    %c0_20 = arith.constant 0 : index
    %c0_21 = arith.constant 0 : index
    %55 = vector.load %arg5[%c0_19, %c0_20, %c0_21] : memref<32x16x128xbf16, #tpu.memory_space<vmem>>, vector<32x16x128xbf16>
    tpu.vector_store %arg5[%c0_19, %c0_20, %c0_21], %54 {strides = array<i32>} : memref<32x16x128xbf16, #tpu.memory_space<vmem>>, vector<32x16x128xbf16>,
    %cst_22 = arith.constant dense<0.000000e+00> : vector<128xf32>
    %56 = vector.multi_reduction <add>, %52, %cst_22 [0] : vector<512x128xf32> to vector<128xf32>
    %57 = vector.shape_cast %56 : vector<128xf32> to vector<1x128xf32>
    %58 = vector.shape_cast %57 : vector<1x128xf32> to vector<1x128xf32>
    %59 = vector.broadcast %58 : vector<1x128xf32> to vector<8x128xf32>
    %c0_23 = arith.constant 0 : index
    %c0_24 = arith.constant 0 : index
    %60 = vector.load %arg6[%c0_23, %c0_24] : memref<8x128xf32, #tpu.memory_space<vmem>>, vector<8x128xf32>
    tpu.vector_store %arg6[%c0_23, %c0_24], %59 {strides = array<i32>} : memref<8x128xf32, #tpu.memory_space<vmem>>, vector<8x128xf32>,
    %61 = arith.mulf %52, %52 : vector<512x128xf32>
    %cst_25 = arith.constant dense<0.000000e+00> : vector<128xf32>
    %62 = vector.multi_reduction <add>, %61, %cst_25 [0] : vector<512x128xf32> to vector<128xf32>
    %63 = vector.shape_cast %62 : vector<128xf32> to vector<1x128xf32>
    %64 = vector.shape_cast %63 : vector<1x128xf32> to vector<1x128xf32>
    %65 = vector.broadcast %64 : vector<1x128xf32> to vector<8x128xf32>
    %c0_26 = arith.constant 0 : index
    %c0_27 = arith.constant 0 : index
    %66 = vector.load %arg7[%c0_26, %c0_27] : memref<8x128xf32, #tpu.memory_space<vmem>>, vector<8x128xf32>
    tpu.vector_store %arg7[%c0_26, %c0_27], %65 {strides = array<i32>} : memref<8x128xf32, #tpu.memory_space<vmem>>, vector<8x128xf32>,
    return
  }
  func.func @transform_0(%arg0: i32) -> (i32, i32, i32) {
    %c0_i32 = arith.constant 0 : i32
    %c0_i32_0 = arith.constant 0 : i32
    %c0_i32_1 = arith.constant 0 : i32
    return %arg0, %c0_i32, %c0_i32_0 : i32, i32, i32
  }
  func.func @transform_1(%arg0: i32) -> (i32, i32) {
    %c0_i32 = arith.constant 0 : i32
    %c0_i32_0 = arith.constant 0 : i32
    %c0_i32_1 = arith.constant 0 : i32
    return %c0_i32, %c0_i32_0 : i32, i32
  }
  func.func @transform_2(%arg0: i32) -> (i32, i32) {
    %c0_i32 = arith.constant 0 : i32
    %c0_i32_0 = arith.constant 0 : i32
    %c0_i32_1 = arith.constant 0 : i32
    return %c0_i32, %c0_i32_0 : i32, i32
  }
  func.func @transform_3(%arg0: i32) -> (i32, i32, i32) {
    %c0_i32 = arith.constant 0 : i32
    %c0_i32_0 = arith.constant 0 : i32
    %c0_i32_1 = arith.constant 0 : i32
    %c0_i32_2 = arith.constant 0 : i32
    return %c0_i32, %c0_i32_0, %c0_i32_1 : i32, i32, i32
  }
  func.func @transform_4(%arg0: i32) -> (i32, i32, i32) {
    %c0_i32 = arith.constant 0 : i32
    %c0_i32_0 = arith.constant 0 : i32
    %c0_i32_1 = arith.constant 0 : i32
    return %arg0, %c0_i32, %c0_i32_0 : i32, i32, i32
  }
  func.func @transform_5(%arg0: i32) -> (i32, i32) {
    %c0_i32 = arith.constant 0 : i32
    %c0_i32_0 = arith.constant 0 : i32
    return %arg0, %c0_i32 : i32, i32
  }
  func.func @transform_6(%arg0: i32) -> (i32, i32) {
    %c0_i32 = arith.constant 0 : i32
    %c0_i32_0 = arith.constant 0 : i32
    return %arg0, %c0_i32 : i32, i32
  }
}

module attributes {stable_mosaic.version = 11 : i64} {
  func.func @_bn_relu_kernel(%arg0: i32, %arg1: memref<32x16x128xbf16, #tpu.memory_space<vmem>>, %arg2: memref<1x128xf32, #tpu.memory_space<vmem>>, %arg3: memref<1x128xf32, #tpu.memory_space<vmem>>, %arg4: memref<32x16x128xf32, #tpu.memory_space<vmem>>) attributes {dimension_semantics = [#tpu.dimension_semantics<parallel>], iteration_bounds = array<i64: 1>, scalar_prefetch = 0 : i64, scratch_operands = 0 : i64, tpu.core_type = #tpu.core_type<tc>, window_params = [{transform_indices = @transform_0, window_bounds = array<i64: 32, 16, 128>}, {pipeline_mode = #tpu.pipeline_mode<synchronous>, transform_indices = @transform_1, window_bounds = array<i64: 1, 128>}, {pipeline_mode = #tpu.pipeline_mode<synchronous>, transform_indices = @transform_2, window_bounds = array<i64: 1, 128>}, {transform_indices = @transform_3, window_bounds = array<i64: 32, 16, 128>}]} {
    %c0 = arith.constant 0 : index
    %c0_0 = arith.constant 0 : index
    %c0_1 = arith.constant 0 : index
    %0 = vector.load %arg1[%c0, %c0_0, %c0_1] : memref<32x16x128xbf16, #tpu.memory_space<vmem>>, vector<32x16x128xbf16>
    %1 = arith.extf %0 : vector<32x16x128xbf16> to vector<32x16x128xf32>
    %c0_2 = arith.constant 0 : index
    %c0_3 = arith.constant 0 : index
    %2 = vector.load %arg2[%c0_2, %c0_3] : memref<1x128xf32, #tpu.memory_space<vmem>>, vector<1x128xf32>
    %3 = vector.shape_cast %2 : vector<1x128xf32> to vector<1x1x128xf32>
    %4 = vector.broadcast %3 : vector<1x1x128xf32> to vector<32x16x128xf32>
    %5 = arith.mulf %1, %4 : vector<32x16x128xf32>
    %c0_4 = arith.constant 0 : index
    %c0_5 = arith.constant 0 : index
    %6 = vector.load %arg3[%c0_4, %c0_5] : memref<1x128xf32, #tpu.memory_space<vmem>>, vector<1x128xf32>
    %7 = vector.shape_cast %6 : vector<1x128xf32> to vector<1x1x128xf32>
    %8 = vector.broadcast %7 : vector<1x1x128xf32> to vector<32x16x128xf32>
    %9 = arith.addf %5, %8 : vector<32x16x128xf32>
    %cst = arith.constant 0.000000e+00 : f32
    %10 = vector.broadcast %cst : f32 to vector<32x16x128xf32>
    %11 = arith.maximumf %9, %10 : vector<32x16x128xf32>
    %c0_6 = arith.constant 0 : index
    %c0_7 = arith.constant 0 : index
    %c0_8 = arith.constant 0 : index
    %12 = vector.load %arg4[%c0_6, %c0_7, %c0_8] : memref<32x16x128xf32, #tpu.memory_space<vmem>>, vector<32x16x128xf32>
    tpu.vector_store %arg4[%c0_6, %c0_7, %c0_8], %11 {strides = array<i32>} : memref<32x16x128xf32, #tpu.memory_space<vmem>>, vector<32x16x128xf32>,
    return
  }
  func.func @transform_0(%arg0: i32) -> (i32, i32, i32) {
    %c0_i32 = arith.constant 0 : i32
    %c0_i32_0 = arith.constant 0 : i32
    %c0_i32_1 = arith.constant 0 : i32
    return %arg0, %c0_i32, %c0_i32_0 : i32, i32, i32
  }
  func.func @transform_1(%arg0: i32) -> (i32, i32) {
    %c0_i32 = arith.constant 0 : i32
    %c0_i32_0 = arith.constant 0 : i32
    %c0_i32_1 = arith.constant 0 : i32
    return %c0_i32, %c0_i32_0 : i32, i32
  }
  func.func @transform_2(%arg0: i32) -> (i32, i32) {
    %c0_i32 = arith.constant 0 : i32
    %c0_i32_0 = arith.constant 0 : i32
    %c0_i32_1 = arith.constant 0 : i32
    return %c0_i32, %c0_i32_0 : i32, i32
  }
  func.func @transform_3(%arg0: i32) -> (i32, i32, i32) {
    %c0_i32 = arith.constant 0 : i32
    %c0_i32_0 = arith.constant 0 : i32
    %c0_i32_1 = arith.constant 0 : i32
    return %arg0, %c0_i32, %c0_i32_0 : i32, i32, i32
  }
}

</mosaic_0001>

<bundles_post_ra>
// kernel: incept_block_b.5
= control target key start
LH: loop header
LB: loop body
LE: loop exit
PB: predicated region body
PF: predicated region fallthrough
CT: control target
= control target key end

     0   :  { %s1023_s0 = inlined_call_operand.vmem [shape: bf16[32,16,128], index: 0, kind: input, shape index: {}]   ;;  %s1024_s1 = inlined_call_operand.vmem [shape: f32[1,128], index: 1, kind: input, shape index: {}]   ;;  %s1025_s2 = inlined_call_operand.vmem [shape: f32[1,128], index: 2, kind: input, shape index: {}]   ;;  %s1026_s3 = inlined_call_operand.vmem [shape: f32[32,16,128], index: 3, kind: output, shape index: {}]  }
   0x1   :  { %v419_v0 = vld [vmem:[%s1023_s0] sm:$0xff]   ;;  %v546_v4 = vld [vmem:[%s1023_s0 + $0x8] sm:$0xff]   ;;  %v547_v5 = vld [vmem:[%s1023_s0 + $0x10] sm:$0xff]  }
   0x2   :  { %v603_v1 = vld [vmem:[%s1024_s1] ss:$0 sm:$0xff]  ;;  %v420_v2 = vunpack.c.l.bf16 %v419_v0  ;;  %v421_v3 = vunpack.c.h.bf16 %v419_v0  ;;  %v548_v6 = vld [vmem:[%s1023_s0 + $0x18] sm:$0xff]   ;;  %v424_v8 = vunpack.c.l.bf16 %v546_v4  ;;  %v425_v9 = vunpack.c.h.bf16 %v546_v4  ;;  %v550_v33 = vld [vmem:[%s1023_s0 + $0x28] sm:$0xff]  }
   0x3   :  { %v617_v7 = vld [vmem:[%s1025_s2] ss:$0 sm:$0xff]  ;;  %v428_v10 = vunpack.c.l.bf16 %v547_v5  ;;  %v429_v11 = vunpack.c.h.bf16 %v547_v5  ;;  %v432_v14 = vunpack.c.l.bf16 %v548_v6  ;;  %v433_v15 = vunpack.c.h.bf16 %v548_v6  ;;  %v551_v34 = vld [vmem:[%s1023_s0 + $0x30] sm:$0xff]   ;;  %v552_v39 = vld [vmem:[%s1023_s0 + $0x38] sm:$0xff]  }
   0x4   :  { %v149_v12 = vmul.f32 %v420_v2, %v603_v1  ;;  %v150_v13 = vmul.f32 %v421_v3, %v603_v1  ;;  %v151_v16 = vmul.f32 %v424_v8, %v603_v1  ;;  %v152_v17 = vmul.f32 %v425_v9, %v603_v1  ;;  %v549_v28 = vld [vmem:[%s1023_s0 + $0x20] sm:$0xff]   ;;  %v554_v6 = vld [vmem:[%s1023_s0 + $0x48] sm:$0xff]   ;;  %v555_v8 = vld [vmem:[%s1023_s0 + $0x50] sm:$0xff]  }
   0x5   :  { %v153_v18 = vmul.f32 %v428_v10, %v603_v1  ;;  %v154_v19 = vmul.f32 %v429_v11, %v603_v1  ;;  %v155_v22 = vmul.f32 %v432_v14, %v603_v1  ;;  %v156_v23 = vmul.f32 %v433_v15, %v603_v1  ;;  %v553_v0 = vld [vmem:[%s1023_s0 + $0x40] sm:$0xff]  }
   0x6   :  { %v220_v20 = vadd.f32 %v617_v7, %v149_v12  ;;  %v221_v21 = vadd.f32 %v617_v7, %v150_v13  ;;  %v222_v24 = vadd.f32 %v617_v7, %v151_v16  ;;  %v223_v25 = vadd.f32 %v617_v7, %v152_v17  ;;  %v556_v13 = vld [vmem:[%s1023_s0 + $0x58] sm:$0xff]  }
   0x7   :  { %v224_v26 = vadd.f32 %v617_v7, %v153_v18  ;;  %v225_v27 = vadd.f32 %v617_v7, %v154_v19  ;;  %v226_v31 = vadd.f32 %v617_v7, %v155_v22  ;;  %v227_v32 = vadd.f32 %v617_v7, %v156_v23 }
   0x8   :  { %v284_v29 = vmax.f32 %v220_v20, 0.0  ;;  %v285_v30 = vmax.f32 %v221_v21, 0.0  ;;  %v286_v35 = vmax.f32 %v222_v24, 0.0  ;;  %v287_v36 = vmax.f32 %v223_v25, 0.0 }
   0x9   :  { %v288_v37 = vmax.f32 %v224_v26, 0.0  ;;  %v289_v38 = vmax.f32 %v225_v27, 0.0  ;;  %v290_v40 = vmax.f32 %v226_v31, 0.0  ;;  %v291_v41 = vmax.f32 %v227_v32, 0.0 }
   0xa   :  { %348 = vst [vmem:[%s1026_s3] sm:$0xff] %v284_v29  ;;  %349 = vst [vmem:[%s1026_s3 + $0x8] sm:$0xff] %v285_v30  ;;  %v436_v42 = vunpack.c.l.bf16 %v549_v28  ;;  %v437_v43 = vunpack.c.h.bf16 %v549_v28  ;;  %v440_v44 = vunpack.c.l.bf16 %v550_v33  ;;  %v441_v45 = vunpack.c.h.bf16 %v550_v33 }
   0xb   :  { %350 = vst [vmem:[%s1026_s3 + $0x10] sm:$0xff] %v286_v35  ;;  %351 = vst [vmem:[%s1026_s3 + $0x18] sm:$0xff] %v287_v36  ;;  %v444_v46 = vunpack.c.l.bf16 %v551_v34  ;;  %v445_v47 = vunpack.c.h.bf16 %v551_v34  ;;  %v448_v50 = vunpack.c.l.bf16 %v552_v39  ;;  %v449_v51 = vunpack.c.h.bf16 %v552_v39 }
   0xc   :  { %352 = vst [vmem:[%s1026_s3 + $0x20] sm:$0xff] %v288_v37  ;;  %353 = vst [vmem:[%s1026_s3 + $0x28] sm:$0xff] %v289_v38  ;;  %v157_v48 = vmul.f32 %v436_v42, %v603_v1  ;;  %v158_v49 = vmul.f32 %v437_v43, %v603_v1  ;;  %v159_v52 = vmul.f32 %v440_v44, %v603_v1  ;;  %v452_v16 = vunpack.c.l.bf16 %v553_v0  ;;  %v557_v38 = vld [vmem:[%s1023_s0 + $0x60] sm:$0xff]   ;;  %v558_v43 = vld [vmem:[%s1023_s0 + $0x68] sm:$0xff]  }
   0xd   :  { %354 = vst [vmem:[%s1026_s3 + $0x30] sm:$0xff] %v290_v40  ;;  %355 = vst [vmem:[%s1026_s3 + $0x38] sm:$0xff] %v291_v41  ;;  %v160_v53 = vmul.f32 %v441_v45, %v603_v1  ;;  %v161_v54 = vmul.f32 %v444_v46, %v603_v1  ;;  %v162_v55 = vmul.f32 %v445_v47, %v603_v1  ;;  %v453_v17 = vunpack.c.h.bf16 %v553_v0  ;;  %v559_v44 = vld [vmem:[%s1023_s0 + $0x70] sm:$0xff]  }
   0xe   :  { %v228_v56 = vadd.f32 %v617_v7, %v157_v48  ;;  %v229_v57 = vadd.f32 %v617_v7, %v158_v49  ;;  %v163_v58 = vmul.f32 %v448_v50, %v603_v1  ;;  %v164_v59 = vmul.f32 %v449_v51, %v603_v1  ;;  %v560_v49 = vld [vmem:[%s1023_s0 + $0x78] sm:$0xff]  }
   0xf   :  { %v230_v60 = vadd.f32 %v617_v7, %v159_v52  ;;  %v231_v61 = vadd.f32 %v617_v7, %v160_v53  ;;  %v232_v62 = vadd.f32 %v617_v7, %v161_v54  ;;  %v233_v63 = vadd.f32 %v617_v7, %v162_v55 }
  0x10   :  { %v292_v2 = vmax.f32 %v228_v56, 0.0  ;;  %v293_v3 = vmax.f32 %v229_v57, 0.0  ;;  %v234_v4 = vadd.f32 %v617_v7, %v163_v58  ;;  %v235_v5 = vadd.f32 %v617_v7, %v164_v59 }
  0x11   :  { %v294_v9 = vmax.f32 %v230_v60, 0.0  ;;  %v295_v10 = vmax.f32 %v231_v61, 0.0  ;;  %v296_v11 = vmax.f32 %v232_v62, 0.0  ;;  %v297_v12 = vmax.f32 %v233_v63, 0.0 }
  0x12   :  { %356 = vst [vmem:[%s1026_s3 + $0x40] sm:$0xff] %v292_v2  ;;  %357 = vst [vmem:[%s1026_s3 + $0x48] sm:$0xff] %v293_v3  ;;  %v298_v14 = vmax.f32 %v234_v4, 0.0  ;;  %v299_v15 = vmax.f32 %v235_v5, 0.0  ;;  %v456_v18 = vunpack.c.l.bf16 %v554_v6  ;;  %v457_v19 = vunpack.c.h.bf16 %v554_v6 }
  0x13   :  { %358 = vst [vmem:[%s1026_s3 + $0x50] sm:$0xff] %v294_v9  ;;  %359 = vst [vmem:[%s1026_s3 + $0x58] sm:$0xff] %v295_v10  ;;  %v460_v20 = vunpack.c.l.bf16 %v555_v8  ;;  %v461_v21 = vunpack.c.h.bf16 %v555_v8  ;;  %v165_v22 = vmul.f32 %v452_v16, %v603_v1  ;;  %v166_v23 = vmul.f32 %v453_v17, %v603_v1  ;;  %v562_v17 = vld [vmem:[%s1023_s0 + $0x88] sm:$0xff]  }
  0x14   :  { %360 = vst [vmem:[%s1026_s3 + $0x60] sm:$0xff] %v296_v11  ;;  %361 = vst [vmem:[%s1026_s3 + $0x68] sm:$0xff] %v297_v12  ;;  %v464_v24 = vunpack.c.l.bf16 %v556_v13  ;;  %v465_v25 = vunpack.c.h.bf16 %v556_v13  ;;  %v167_v26 = vmul.f32 %v456_v18, %v603_v1  ;;  %v168_v27 = vmul.f32 %v457_v19, %v603_v1  ;;  %v561_v12 = vld [vmem:[%s1023_s0 + $0x80] sm:$0xff]   ;;  %v563_v18 = vld [vmem:[%s1023_s0 + $0x90] sm:$0xff]  }
  0x15   :  { %362 = vst [vmem:[%s1026_s3 + $0x70] sm:$0xff] %v298_v14  ;;  %363 = vst [vmem:[%s1026_s3 + $0x78] sm:$0xff] %v299_v15  ;;  %v169_v28 = vmul.f32 %v460_v20, %v603_v1  ;;  %v170_v29 = vmul.f32 %v461_v21, %v603_v1  ;;  %v236_v30 = vadd.f32 %v617_v7, %v165_v22  ;;  %v468_v52 = vunpack.c.l.bf16 %v557_v38 }
  0x16   :  { %v237_v31 = vadd.f32 %v617_v7, %v166_v23  ;;  %v171_v32 = vmul.f32 %v464_v24, %v603_v1  ;;  %v172_v33 = vmul.f32 %v465_v25, %v603_v1  ;;  %v238_v34 = vadd.f32 %v617_v7, %v167_v26  ;;  %v564_v23 = vld [vmem:[%s1023_s0 + $0x98] sm:$0xff]  }
  0x17   :  { %v239_v35 = vadd.f32 %v617_v7, %v168_v27  ;;  %v240_v36 = vadd.f32 %v617_v7, %v169_v28  ;;  %v241_v37 = vadd.f32 %v617_v7, %v170_v29  ;;  %v300_v39 = vmax.f32 %v236_v30, 0.0 }
  0x18   :  { %v301_v40 = vmax.f32 %v237_v31, 0.0  ;;  %v242_v41 = vadd.f32 %v617_v7, %v171_v32  ;;  %v243_v42 = vadd.f32 %v617_v7, %v172_v33  ;;  %v302_v45 = vmax.f32 %v238_v34, 0.0 }
  0x19   :  { %v303_v46 = vmax.f32 %v239_v35, 0.0  ;;  %v304_v47 = vmax.f32 %v240_v36, 0.0  ;;  %v305_v48 = vmax.f32 %v241_v37, 0.0  ;;  %364 = vst [vmem:[%s1026_s3 + $0x80] sm:$0xff] %v300_v39  ;;  %v469_v53 = vunpack.c.h.bf16 %v557_v38 }
  0x1a   :  { %365 = vst [vmem:[%s1026_s3 + $0x88] sm:$0xff] %v301_v40  ;;  %v306_v50 = vmax.f32 %v242_v41, 0.0  ;;  %v307_v51 = vmax.f32 %v243_v42, 0.0  ;;  %366 = vst [vmem:[%s1026_s3 + $0x90] sm:$0xff] %v302_v45  ;;  %v472_v54 = vunpack.c.l.bf16 %v558_v43  ;;  %v473_v55 = vunpack.c.h.bf16 %v558_v43 }
  0x1b   :  { %367 = vst [vmem:[%s1026_s3 + $0x98] sm:$0xff] %v303_v46  ;;  %368 = vst [vmem:[%s1026_s3 + $0xa0] sm:$0xff] %v304_v47  ;;  %v476_v56 = vunpack.c.l.bf16 %v559_v44  ;;  %v477_v57 = vunpack.c.h.bf16 %v559_v44  ;;  %v173_v58 = vmul.f32 %v468_v52, %v603_v1  ;;  %v174_v59 = vmul.f32 %v469_v53, %v603_v1  ;;  %v566_v53 = vld [vmem:[%s1023_s0 + $0xa8] sm:$0xff]  }
  0x1c   :  { %369 = vst [vmem:[%s1026_s3 + $0xa8] sm:$0xff] %v305_v48  ;;  %370 = vst [vmem:[%s1026_s3 + $0xb0] sm:$0xff] %v306_v50  ;;  %v480_v60 = vunpack.c.l.bf16 %v560_v49  ;;  %v481_v61 = vunpack.c.h.bf16 %v560_v49  ;;  %v175_v62 = vmul.f32 %v472_v54, %v603_v1  ;;  %v176_v63 = vmul.f32 %v473_v55, %v603_v1  ;;  %v565_v48 = vld [vmem:[%s1023_s0 + $0xa0] sm:$0xff]   ;;  %v567_v54 = vld [vmem:[%s1023_s0 + $0xb0] sm:$0xff]  }
  0x1d   :  { %371 = vst [vmem:[%s1026_s3 + $0xb8] sm:$0xff] %v307_v51  ;;  %v177_v0 = vmul.f32 %v476_v56, %v603_v1  ;;  %v178_v2 = vmul.f32 %v477_v57, %v603_v1  ;;  %v244_v3 = vadd.f32 %v617_v7, %v173_v58  ;;  %v245_v4 = vadd.f32 %v617_v7, %v174_v59  ;;  %v568_v59 = vld [vmem:[%s1023_s0 + $0xb8] sm:$0xff]  }
  0x1e   :  { %v179_v5 = vmul.f32 %v480_v60, %v603_v1  ;;  %v180_v6 = vmul.f32 %v481_v61, %v603_v1  ;;  %v246_v8 = vadd.f32 %v617_v7, %v175_v62  ;;  %v247_v9 = vadd.f32 %v617_v7, %v176_v63 }
  0x1f   :  { %v248_v10 = vadd.f32 %v617_v7, %v177_v0  ;;  %v249_v11 = vadd.f32 %v617_v7, %v178_v2  ;;  %v308_v13 = vmax.f32 %v244_v3, 0.0  ;;  %v309_v14 = vmax.f32 %v245_v4, 0.0 }
  0x20   :  { %v250_v15 = vadd.f32 %v617_v7, %v179_v5  ;;  %v251_v16 = vadd.f32 %v617_v7, %v180_v6  ;;  %v310_v19 = vmax.f32 %v246_v8, 0.0  ;;  %v311_v20 = vmax.f32 %v247_v9, 0.0 }
  0x21   :  { %v312_v21 = vmax.f32 %v248_v10, 0.0  ;;  %v313_v22 = vmax.f32 %v249_v11, 0.0  ;;  %372 = vst [vmem:[%s1026_s3 + $0xc0] sm:$0xff] %v308_v13  ;;  %373 = vst [vmem:[%s1026_s3 + $0xc8] sm:$0xff] %v309_v14  ;;  %v484_v26 = vunpack.c.l.bf16 %v561_v12  ;;  %v485_v27 = vunpack.c.h.bf16 %v561_v12 }
  0x22   :  { %v314_v24 = vmax.f32 %v250_v15, 0.0  ;;  %v315_v25 = vmax.f32 %v251_v16, 0.0  ;;  %374 = vst [vmem:[%s1026_s3 + $0xd0] sm:$0xff] %v310_v19  ;;  %375 = vst [vmem:[%s1026_s3 + $0xd8] sm:$0xff] %v311_v20  ;;  %v488_v28 = vunpack.c.l.bf16 %v562_v17  ;;  %v489_v29 = vunpack.c.h.bf16 %v562_v17 }
  0x23   :  { %376 = vst [vmem:[%s1026_s3 + $0xe0] sm:$0xff] %v312_v21  ;;  %377 = vst [vmem:[%s1026_s3 + $0xe8] sm:$0xff] %v313_v22  ;;  %v492_v30 = vunpack.c.l.bf16 %v563_v18  ;;  %v493_v31 = vunpack.c.h.bf16 %v563_v18  ;;  %v181_v32 = vmul.f32 %v484_v26, %v603_v1  ;;  %v182_v33 = vmul.f32 %v485_v27, %v603_v1  ;;  %v569_v22 = vld [vmem:[%s1023_s0 + $0xc0] sm:$0xff]   ;;  %v570_v27 = vld [vmem:[%s1023_s0 + $0xc8] sm:$0xff]  }
  0x24   :  { %378 = vst [vmem:[%s1026_s3 + $0xf0] sm:$0xff] %v314_v24  ;;  %379 = vst [vmem:[%s1026_s3 + $0xf8] sm:$0xff] %v315_v25  ;;  %v496_v34 = vunpack.c.l.bf16 %v564_v23  ;;  %v497_v35 = vunpack.c.h.bf16 %v564_v23  ;;  %v183_v36 = vmul.f32 %v488_v28, %v603_v1  ;;  %v184_v37 = vmul.f32 %v489_v29, %v603_v1  ;;  %v571_v28 = vld [vmem:[%s1023_s0 + $0xd0] sm:$0xff]  }
  0x25   :  { %v185_v38 = vmul.f32 %v492_v30, %v603_v1  ;;  %v186_v39 = vmul.f32 %v493_v31, %v603_v1  ;;  %v252_v40 = vadd.f32 %v617_v7, %v181_v32  ;;  %v253_v41 = vadd.f32 %v617_v7, %v182_v33  ;;  %v572_v33 = vld [vmem:[%s1023_s0 + $0xd8] sm:$0xff]  }
  0x26   :  { %v187_v42 = vmul.f32 %v496_v34, %v603_v1  ;;  %v188_v43 = vmul.f32 %v497_v35, %v603_v1  ;;  %v254_v44 = vadd.f32 %v617_v7, %v183_v36  ;;  %v255_v45 = vadd.f32 %v617_v7, %v184_v37 }
  0x27   :  { %v256_v46 = vadd.f32 %v617_v7, %v185_v38  ;;  %v257_v47 = vadd.f32 %v617_v7, %v186_v39  ;;  %v316_v49 = vmax.f32 %v252_v40, 0.0  ;;  %v317_v50 = vmax.f32 %v253_v41, 0.0 }
  0x28   :  { %v258_v51 = vadd.f32 %v617_v7, %v187_v42  ;;  %v259_v52 = vadd.f32 %v617_v7, %v188_v43  ;;  %v318_v55 = vmax.f32 %v254_v44, 0.0  ;;  %v319_v56 = vmax.f32 %v255_v45, 0.0 }
  0x29   :  { %v320_v57 = vmax.f32 %v256_v46, 0.0  ;;  %v321_v58 = vmax.f32 %v257_v47, 0.0  ;;  %380 = vst [vmem:[%s1026_s3 + $0x100] sm:$0xff] %v316_v49  ;;  %381 = vst [vmem:[%s1026_s3 + $0x108] sm:$0xff] %v317_v50  ;;  %v500_v62 = vunpack.c.l.bf16 %v565_v48  ;;  %v501_v63 = vunpack.c.h.bf16 %v565_v48 }
  0x2a   :  { %v322_v60 = vmax.f32 %v258_v51, 0.0  ;;  %v323_v61 = vmax.f32 %v259_v52, 0.0  ;;  %382 = vst [vmem:[%s1026_s3 + $0x110] sm:$0xff] %v318_v55  ;;  %383 = vst [vmem:[%s1026_s3 + $0x118] sm:$0xff] %v319_v56  ;;  %v504_v0 = vunpack.c.l.bf16 %v566_v53  ;;  %v505_v2 = vunpack.c.h.bf16 %v566_v53 }
  0x2b   :  { %384 = vst [vmem:[%s1026_s3 + $0x120] sm:$0xff] %v320_v57  ;;  %385 = vst [vmem:[%s1026_s3 + $0x128] sm:$0xff] %v321_v58  ;;  %v508_v3 = vunpack.c.l.bf16 %v567_v54  ;;  %v509_v4 = vunpack.c.h.bf16 %v567_v54  ;;  %v189_v5 = vmul.f32 %v500_v62, %v603_v1  ;;  %v190_v6 = vmul.f32 %v501_v63, %v603_v1  ;;  %v573_v58 = vld [vmem:[%s1023_s0 + $0xe0] sm:$0xff]   ;;  %v574_v63 = vld [vmem:[%s1023_s0 + $0xe8] sm:$0xff]  }
  0x2c   :  { %386 = vst [vmem:[%s1026_s3 + $0x130] sm:$0xff] %v322_v60  ;;  %387 = vst [vmem:[%s1026_s3 + $0x138] sm:$0xff] %v323_v61  ;;  %v512_v8 = vunpack.c.l.bf16 %v568_v59  ;;  %v513_v9 = vunpack.c.h.bf16 %v568_v59  ;;  %v191_v10 = vmul.f32 %v504_v0, %v603_v1  ;;  %v192_v11 = vmul.f32 %v505_v2, %v603_v1  ;;  %v575_v0 = vld [vmem:[%s1023_s0 + $0xf0] sm:$0xff]  }
  0x2d   :  { %v193_v12 = vmul.f32 %v508_v3, %v603_v1  ;;  %v194_v13 = vmul.f32 %v509_v4, %v603_v1  ;;  %v260_v14 = vadd.f32 %v617_v7, %v189_v5  ;;  %v261_v15 = vadd.f32 %v617_v7, %v190_v6  ;;  %v576_v6 = vld [vmem:[%s1023_s0 + $0xf8] sm:$0xff]  }
  0x2e   :  { %v195_v16 = vmul.f32 %v512_v8, %v603_v1  ;;  %v196_v17 = vmul.f32 %v513_v9, %v603_v1  ;;  %v262_v18 = vadd.f32 %v617_v7, %v191_v10  ;;  %v263_v19 = vadd.f32 %v617_v7, %v192_v11 }
  0x2f   :  { %v264_v20 = vadd.f32 %v617_v7, %v193_v12  ;;  %v265_v21 = vadd.f32 %v617_v7, %v194_v13  ;;  %v324_v23 = vmax.f32 %v260_v14, 0.0  ;;  %v325_v24 = vmax.f32 %v261_v15, 0.0 }
  0x30   :  { %v266_v25 = vadd.f32 %v617_v7, %v195_v16  ;;  %v267_v26 = vadd.f32 %v617_v7, %v196_v17  ;;  %v326_v29 = vmax.f32 %v262_v18, 0.0  ;;  %v327_v30 = vmax.f32 %v263_v19, 0.0 }
  0x31   :  { %v328_v31 = vmax.f32 %v264_v20, 0.0  ;;  %v329_v32 = vmax.f32 %v265_v21, 0.0  ;;  %388 = vst [vmem:[%s1026_s3 + $0x140] sm:$0xff] %v324_v23  ;;  %389 = vst [vmem:[%s1026_s3 + $0x148] sm:$0xff] %v325_v24  ;;  %v516_v36 = vunpack.c.l.bf16 %v569_v22  ;;  %v517_v37 = vunpack.c.h.bf16 %v569_v22 }
  0x32   :  { %v330_v34 = vmax.f32 %v266_v25, 0.0  ;;  %v331_v35 = vmax.f32 %v267_v26, 0.0  ;;  %390 = vst [vmem:[%s1026_s3 + $0x150] sm:$0xff] %v326_v29  ;;  %391 = vst [vmem:[%s1026_s3 + $0x158] sm:$0xff] %v327_v30  ;;  %v520_v38 = vunpack.c.l.bf16 %v570_v27  ;;  %v521_v39 = vunpack.c.h.bf16 %v570_v27 }
  0x33   :  { %392 = vst [vmem:[%s1026_s3 + $0x160] sm:$0xff] %v328_v31  ;;  %393 = vst [vmem:[%s1026_s3 + $0x168] sm:$0xff] %v329_v32  ;;  %v524_v40 = vunpack.c.l.bf16 %v571_v28  ;;  %v525_v41 = vunpack.c.h.bf16 %v571_v28  ;;  %v197_v42 = vmul.f32 %v516_v36, %v603_v1  ;;  %v198_v43 = vmul.f32 %v517_v37, %v603_v1 }
  0x34   :  { %394 = vst [vmem:[%s1026_s3 + $0x170] sm:$0xff] %v330_v34  ;;  %395 = vst [vmem:[%s1026_s3 + $0x178] sm:$0xff] %v331_v35  ;;  %v528_v44 = vunpack.c.l.bf16 %v572_v33  ;;  %v529_v45 = vunpack.c.h.bf16 %v572_v33  ;;  %v199_v46 = vmul.f32 %v520_v38, %v603_v1  ;;  %v200_v47 = vmul.f32 %v521_v39, %v603_v1 }
  0x35   :  { %v201_v48 = vmul.f32 %v524_v40, %v603_v1  ;;  %v202_v49 = vmul.f32 %v525_v41, %v603_v1  ;;  %v268_v50 = vadd.f32 %v617_v7, %v197_v42  ;;  %v269_v51 = vadd.f32 %v617_v7, %v198_v43 }
  0x36   :  { %v203_v52 = vmul.f32 %v528_v44, %v603_v1  ;;  %v204_v53 = vmul.f32 %v529_v45, %v603_v1  ;;  %v270_v54 = vadd.f32 %v617_v7, %v199_v46  ;;  %v271_v55 = vadd.f32 %v617_v7, %v200_v47 }
  0x37   :  { %v272_v56 = vadd.f32 %v617_v7, %v201_v48  ;;  %v273_v57 = vadd.f32 %v617_v7, %v202_v49  ;;  %v332_v59 = vmax.f32 %v268_v50, 0.0  ;;  %v333_v60 = vmax.f32 %v269_v51, 0.0 }
  0x38   :  { %v274_v61 = vadd.f32 %v617_v7, %v203_v52  ;;  %v275_v62 = vadd.f32 %v617_v7, %v204_v53  ;;  %v334_v2 = vmax.f32 %v270_v54, 0.0  ;;  %v335_v3 = vmax.f32 %v271_v55, 0.0 }
  0x39   :  { %v336_v4 = vmax.f32 %v272_v56, 0.0  ;;  %v337_v5 = vmax.f32 %v273_v57, 0.0  ;;  %396 = vst [vmem:[%s1026_s3 + $0x180] sm:$0xff] %v332_v59  ;;  %397 = vst [vmem:[%s1026_s3 + $0x188] sm:$0xff] %v333_v60  ;;  %v532_v10 = vunpack.c.l.bf16 %v573_v58  ;;  %v533_v11 = vunpack.c.h.bf16 %v573_v58 }
  0x3a   :  { %v338_v8 = vmax.f32 %v274_v61, 0.0  ;;  %v339_v9 = vmax.f32 %v275_v62, 0.0  ;;  %398 = vst [vmem:[%s1026_s3 + $0x190] sm:$0xff] %v334_v2  ;;  %399 = vst [vmem:[%s1026_s3 + $0x198] sm:$0xff] %v335_v3  ;;  %v536_v12 = vunpack.c.l.bf16 %v574_v63  ;;  %v537_v13 = vunpack.c.h.bf16 %v574_v63 }
  0x3b   :  { %400 = vst [vmem:[%s1026_s3 + $0x1a0] sm:$0xff] %v336_v4  ;;  %401 = vst [vmem:[%s1026_s3 + $0x1a8] sm:$0xff] %v337_v5  ;;  %v540_v14 = vunpack.c.l.bf16 %v575_v0  ;;  %v541_v15 = vunpack.c.h.bf16 %v575_v0  ;;  %v205_v16 = vmul.f32 %v532_v10, %v603_v1  ;;  %v206_v17 = vmul.f32 %v533_v11, %v603_v1 }
  0x3c   :  { %402 = vst [vmem:[%s1026_s3 + $0x1b0] sm:$0xff] %v338_v8  ;;  %403 = vst [vmem:[%s1026_s3 + $0x1b8] sm:$0xff] %v339_v9  ;;  %v544_v18 = vunpack.c.l.bf16 %v576_v6  ;;  %v545_v19 = vunpack.c.h.bf16 %v576_v6  ;;  %v207_v20 = vmul.f32 %v536_v12, %v603_v1  ;;  %v208_v21 = vmul.f32 %v537_v13, %v603_v1 }
  0x3d   :  { %v209_v22 = vmul.f32 %v540_v14, %v603_v1  ;;  %v210_v23 = vmul.f32 %v541_v15, %v603_v1  ;;  %v276_v24 = vadd.f32 %v617_v7, %v205_v16  ;;  %v277_v25 = vadd.f32 %v617_v7, %v206_v17 }
  0x3e   :  { %v211_v26 = vmul.f32 %v544_v18, %v603_v1  ;;  %v212_v27 = vmul.f32 %v545_v19, %v603_v1  ;;  %v278_v28 = vadd.f32 %v617_v7, %v207_v20  ;;  %v279_v29 = vadd.f32 %v617_v7, %v208_v21 }
  0x3f   :  { %v280_v30 = vadd.f32 %v617_v7, %v209_v22  ;;  %v281_v31 = vadd.f32 %v617_v7, %v210_v23  ;;  %v340_v32 = vmax.f32 %v276_v24, 0.0  ;;  %v341_v33 = vmax.f32 %v277_v25, 0.0 }
  0x40   :  { %v282_v34 = vadd.f32 %v617_v7, %v211_v26  ;;  %v283_v35 = vadd.f32 %v617_v7, %v212_v27  ;;  %v342_v36 = vmax.f32 %v278_v28, 0.0  ;;  %v343_v37 = vmax.f32 %v279_v29, 0.0 }
  0x41   :  { %v344_v38 = vmax.f32 %v280_v30, 0.0  ;;  %v345_v39 = vmax.f32 %v281_v31, 0.0  ;;  %404 = vst [vmem:[%s1026_s3 + $0x1c0] sm:$0xff] %v340_v32  ;;  %405 = vst [vmem:[%s1026_s3 + $0x1c8] sm:$0xff] %v341_v33 }
  0x42   :  { %v346_v1 = vmax.f32 %v282_v34, 0.0  ;;  %v347_v40 = vmax.f32 %v283_v35, 0.0  ;;  %406 = vst [vmem:[%s1026_s3 + $0x1d0] sm:$0xff] %v342_v36  ;;  %407 = vst [vmem:[%s1026_s3 + $0x1d8] sm:$0xff] %v343_v37 }
  0x43   :  { %408 = vst [vmem:[%s1026_s3 + $0x1e0] sm:$0xff] %v344_v38  ;;  %409 = vst [vmem:[%s1026_s3 + $0x1e8] sm:$0xff] %v345_v39 }
  0x44   :  { %410 = vst [vmem:[%s1026_s3 + $0x1f0] sm:$0xff] %v346_v1  ;;  %411 = vst [vmem:[%s1026_s3 + $0x1f8] sm:$0xff] %v347_v40 }

// kernel: incept_block_b.3
= control target key start
LH: loop header
LB: loop body
LE: loop exit
PB: predicated region body
PF: predicated region fallthrough
CT: control target
= control target key end

     0   :  { %s2134_s1 = inlined_call_operand.vmem [shape: bf16[128,128], index: 1, kind: input, shape index: {}]   ;;  %s2135_s0 = inlined_call_operand.vmem [shape: bf16[32,16,128], index: 0, kind: input, shape index: {}]   ;;  %s2136_s2 = inlined_call_operand.vmem [shape: bf16[32,16,128], index: 2, kind: output, shape index: {0}]   ;;  %s2137_s3 = inlined_call_operand.vmem [shape: f32[8,128], index: 3, kind: output, shape index: {1}]   ;;  %s2138_s4 = inlined_call_operand.vmem [shape: f32[8,128], index: 4, kind: output, shape index: {2}]  }
   0x1   :  { %v1655_v0 = vld [vmem:[%s2134_s1 + $0x38] sm:$0xff]   ;;  %v1656_v1 = vld [vmem:[%s2134_s1 + $0x30] sm:$0xff]   ;;  %v1657_v2 = vld [vmem:[%s2134_s1 + $0x28] sm:$0xff]  }
   0x2   :  { %1559 = vmatprep.subr.bf16.mxu0 %v1655_v0  ;;  %1639 = vmatprep.subr.bf16.mxu1 %v1655_v0  ;;  %v1658_v3 = vld [vmem:[%s2134_s1 + $0x20] sm:$0xff]   ;;  %v1659_v5 = vld [vmem:[%s2134_s1 + $0x18] sm:$0xff]   ;;  %v1660_v6 = vld [vmem:[%s2134_s1 + $0x10] sm:$0xff]  }
   0x3   :  { %1560 = vmatpush3.bf16.msra.mxu0 %v1655_v0  ;;  %1647 = vmatpush3.bf16.msra.mxu1 %v1655_v0  ;;  %v1663_v4 = vld [vmem:[%s2135_s0] sm:$0xff]   ;;  %v1661_v7 = vld [vmem:[%s2134_s1 + $0x8] sm:$0xff]   ;;  %v1665_v11 = vld [vmem:[%s2135_s0 + $0x10] sm:$0xff]  }
   0x4   :  { %1561 = vmatprep.subr.bf16.mxu0 %v1656_v1  ;;  %1640 = vmatprep.subr.bf16.mxu1 %v1656_v1  ;;  %v1662_v8 = vld [vmem:[%s2134_s1] sm:$0xff]   ;;  %v1664_v10 = vld [vmem:[%s2135_s0 + $0x8] sm:$0xff]   ;;  %v1681_v13 = vld [vmem:[%s2135_s0 + $0x90] sm:$0xff]  }
   0x5   :  { %1575 = vmatprep.mubr.bf16.mxu0 %v1663_v4  ;;  %v1679_v9 = vld [vmem:[%s2135_s0 + $0x80] sm:$0xff]   ;;  %v1680_v12 = vld [vmem:[%s2135_s0 + $0x88] sm:$0xff]   ;;  %v1666_v14 = vld [vmem:[%s2135_s0 + $0x18] sm:$0xff]  }
   0x6   :  { %1607 = vmatprep.mubr.bf16.mxu1 %v1679_v9  ;;  %v1667_v15 = vld [vmem:[%s2135_s0 + $0x20] sm:$0xff]   ;;  %v1682_v16 = vld [vmem:[%s2135_s0 + $0x98] sm:$0xff]   ;;  %v1668_v18 = vld [vmem:[%s2135_s0 + $0x28] sm:$0xff]  }
   0x7   :  { %1562 = vmatpush3.bf16.msra.mxu0 %v1656_v1  ;;  %1648 = vmatpush3.bf16.msra.mxu1 %v1656_v1  ;;  %v1683_v17 = vld [vmem:[%s2135_s0 + $0xa0] sm:$0xff]   ;;  %v1684_v19 = vld [vmem:[%s2135_s0 + $0xa8] sm:$0xff]   ;;  %v1669_v20 = vld [vmem:[%s2135_s0 + $0x30] sm:$0xff]  }
   0x8   :  { %1563 = vmatprep.subr.bf16.mxu0 %v1657_v2  ;;  %1641 = vmatprep.subr.bf16.mxu1 %v1657_v2  ;;  %v1685_v21 = vld [vmem:[%s2135_s0 + $0xb0] sm:$0xff]   ;;  %v1670_v22 = vld [vmem:[%s2135_s0 + $0x38] sm:$0xff]   ;;  %v1671_v24 = vld [vmem:[%s2135_s0 + $0x40] sm:$0xff]  }
   0x9   :  { %v1686_v23 = vld [vmem:[%s2135_s0 + $0xb8] sm:$0xff]   ;;  %v1687_v25 = vld [vmem:[%s2135_s0 + $0xc0] sm:$0xff]   ;;  %v1672_v26 = vld [vmem:[%s2135_s0 + $0x48] sm:$0xff]  }
   0xa   :  { %v1688_v27 = vld [vmem:[%s2135_s0 + $0xc8] sm:$0xff]   ;;  %v1673_v28 = vld [vmem:[%s2135_s0 + $0x50] sm:$0xff]   ;;  %v1674_v30 = vld [vmem:[%s2135_s0 + $0x58] sm:$0xff]  }
   0xb   :  { %1564 = vmatpush3.bf16.msra.mxu0 %v1657_v2  ;;  %1649 = vmatpush3.bf16.msra.mxu1 %v1657_v2  ;;  %v1689_v29 = vld [vmem:[%s2135_s0 + $0xd0] sm:$0xff]   ;;  %v1690_v31 = vld [vmem:[%s2135_s0 + $0xd8] sm:$0xff]   ;;  %v1675_v32 = vld [vmem:[%s2135_s0 + $0x60] sm:$0xff]  }
   0xc   :  { %1565 = vmatprep.subr.bf16.mxu0 %v1658_v3  ;;  %1642 = vmatprep.subr.bf16.mxu1 %v1658_v3  ;;  %v1691_v33 = vld [vmem:[%s2135_s0 + $0xe0] sm:$0xff]   ;;  %v1676_v34 = vld [vmem:[%s2135_s0 + $0x68] sm:$0xff]   ;;  %v1677_v36 = vld [vmem:[%s2135_s0 + $0x70] sm:$0xff]  }
   0xd   :  { %v1692_v35 = vld [vmem:[%s2135_s0 + $0xe8] sm:$0xff]   ;;  %v1693_v37 = vld [vmem:[%s2135_s0 + $0xf0] sm:$0xff]   ;;  %v1678_v38 = vld [vmem:[%s2135_s0 + $0x78] sm:$0xff]  }
   0xe   :  { %v1694_v39 = vld [vmem:[%s2135_s0 + $0xf8] sm:$0xff]  }
   0xf   :  { %1566 = vmatpush3.bf16.msra.mxu0 %v1658_v3  ;;  %1650 = vmatpush3.bf16.msra.mxu1 %v1658_v3 }
  0x10   :  { %1567 = vmatprep.subr.bf16.mxu0 %v1659_v5  ;;  %1643 = vmatprep.subr.bf16.mxu1 %v1659_v5 }
  0x13   :  { %1568 = vmatpush3.bf16.msra.mxu0 %v1659_v5  ;;  %1651 = vmatpush3.bf16.msra.mxu1 %v1659_v5 }
  0x14   :  { %1569 = vmatprep.subr.bf16.mxu0 %v1660_v6  ;;  %1644 = vmatprep.subr.bf16.mxu1 %v1660_v6 }
  0x17   :  { %1570 = vmatpush3.bf16.msra.mxu0 %v1660_v6  ;;  %1652 = vmatpush3.bf16.msra.mxu1 %v1660_v6 }
  0x18   :  { %1571 = vmatprep.subr.bf16.mxu0 %v1661_v7  ;;  %1645 = vmatprep.subr.bf16.mxu1 %v1661_v7 }
  0x1b   :  { %1572 = vmatpush3.bf16.msra.mxu0 %v1661_v7  ;;  %1653 = vmatpush3.bf16.msra.mxu1 %v1661_v7 }
  0x1c   :  { %1573 = vmatprep.subr.bf16.mxu0 %v1662_v8  ;;  %1646 = vmatprep.subr.bf16.mxu1 %v1662_v8 }
  0x1f   :  { %1574 = vmatpush3.bf16.msra.mxu0 %v1662_v8  ;;  %1654 = vmatpush3.bf16.msra.mxu1 %v1662_v8 }
  0x22   :  { %1576 = vmatmul.mubr.bf16.vlgmr.msra.gmra.mxu0 %v1664_v10  ;;  %1608 = vmatmul.mubr.bf16.vlgmr.msra.gmra.mxu1 %v1680_v12 }
  0x23   :  { %1579 = vmatprep.mubr.bf16.mxu0 %v1665_v11  ;;  %1611 = vmatprep.mubr.bf16.mxu1 %v1681_v13 }
  0x2a   :  { %1580 = vmatmul.mubr.bf16.gmra.mxu0 %v1666_v14  ;;  %1612 = vmatmul.mubr.bf16.gmra.mxu1 %v1682_v16 }
  0x2b   :  { %1583 = vmatprep.mubr.bf16.mxu0 %v1667_v15  ;;  %1615 = vmatprep.mubr.bf16.mxu1 %v1683_v17 }
  0x32   :  { %1584 = vmatmul.mubr.bf16.gmra.mxu0 %v1668_v18  ;;  %1616 = vmatmul.mubr.bf16.gmra.mxu1 %v1684_v19 }
  0x33   :  { %1587 = vmatprep.mubr.bf16.mxu0 %v1669_v20  ;;  %1619 = vmatprep.mubr.bf16.mxu1 %v1685_v21 }
  0x3a   :  { %1588 = vmatmul.mubr.bf16.gmra.mxu0 %v1670_v22  ;;  %1620 = vmatmul.mubr.bf16.gmra.mxu1 %v1686_v23 }
  0x3b   :  { %1591 = vmatprep.mubr.bf16.mxu0 %v1671_v24  ;;  %1623 = vmatprep.mubr.bf16.mxu1 %v1687_v25 }
  0x42   :  { %1592 = vmatmul.mubr.bf16.gmra.mxu0 %v1672_v26  ;;  %1624 = vmatmul.mubr.bf16.gmra.mxu1 %v1688_v27 }
  0x43   :  { %1595 = vmatprep.mubr.bf16.mxu0 %v1673_v28  ;;  %1627 = vmatprep.mubr.bf16.mxu1 %v1689_v29 }
  0x4a   :  { %1596 = vmatmul.mubr.bf16.gmra.mxu0 %v1674_v30  ;;  %1628 = vmatmul.mubr.bf16.gmra.mxu1 %v1690_v31 }
  0x4b   :  { %1599 = vmatprep.mubr.bf16.mxu0 %v1675_v32  ;;  %1631 = vmatprep.mubr.bf16.mxu1 %v1691_v33 }
  0x52   :  { %1600 = vmatmul.mubr.bf16.gmra.mxu0 %v1676_v34  ;;  %1632 = vmatmul.mubr.bf16.gmra.mxu1 %v1692_v35 }
  0x53   :  { %1603 = vmatprep.mubr.bf16.mxu0 %v1677_v36  ;;  %1635 = vmatprep.mubr.bf16.mxu1 %v1693_v37 }
  0x5a   :  { %1604 = vmatmul.mubr.bf16.gmra.mxu0 %v1678_v38  ;;  %1636 = vmatmul.mubr.bf16.gmra.mxu1 %v1694_v39 }
  0xe2   :  { %v1577_v40 = vpop.f32.mrf.mxu0  ;;  %v1840_v41 = vpop.f32.mrf.mxu1 }
  0xe3   :  { %v1016_v57 = vmul.f32 %v1577_v40, %v1577_v40 }
  0xe4   :  { %v369_v42 = vpop.f32.mrf.mxu0  ;;  %v1842_v43 = vpop.f32.mrf.mxu1 }
  0xe5   :  { %v1014_v48 = vmul.f32 %v369_v42, %v369_v42 }
  0xe6   :  { %v1578_v44 = vpop.f32.mrf.mxu0  ;;  %v1844_v45 = vpop.f32.mrf.mxu1 }
  0xe7   :  { %v1336_v46 = vpack.c.bf16 %v1578_v44, %v1577_v40  ;;  %v1416_v47 = vpack.c.bf16 %v1844_v45, %v1840_v41  ;;  %v1017_v62 = vmul.f32 %v1578_v44, %v1578_v44 }
  0xe8   :  { %v372_v49 = vpop.f32.mrf.mxu0  ;;  %v1848_v50 = vpop.f32.mrf.mxu1 }
  0xe9   :  { %1488 = vst [vmem:[%s2136_s2 + $0x8] sm:$0xff] %v1336_v46   ;;  %v1331_v51 = vpack.c.bf16 %v372_v49, %v369_v42  ;;  %v944_v52 = vadd.f32 %v372_v49, %v369_v42  ;;  %v1015_v53 = vmul.f32 %v372_v49, %v372_v49  ;;  %1504 = vst [vmem:[%s2136_s2 + $0x88] sm:$0xff] %v1416_v47  }
  0xea   :  { %v1411_v54 = vpack.c.bf16 %v1848_v50, %v1842_v43  ;;  %v1581_v55 = vpop.f32.mrf.mxu0  ;;  %v1858_v56 = vpop.f32.mrf.mxu1 }
  0xeb   :  { %1332 = vst [vmem:[%s2136_s2] sm:$0xff] %v1331_v51   ;;  %v945_v58 = vadd.f32 %v1577_v40, %v944_v52  ;;  %v1078_v59 = vadd.f32 %v1015_v53, %v1014_v48  ;;  %v1020_v17 = vmul.f32 %v1581_v55, %v1581_v55 }
  0xec   :  { %1503 = vst [vmem:[%s2136_s2 + $0x80] sm:$0xff] %v1411_v54   ;;  %v385_v60 = vpop.f32.mrf.mxu0  ;;  %v1866_v61 = vpop.f32.mrf.mxu1 }
  0xed   :  { %v1079_v63 = vadd.f32 %v1078_v59, %v1016_v57  ;;  %v946_v0 = vadd.f32 %v1578_v44, %v945_v58  ;;  %v1018_v4 = vmul.f32 %v385_v60, %v385_v60 }
  0xee   :  { %v1582_v1 = vpop.f32.mrf.mxu0  ;;  %v1868_v2 = vpop.f32.mrf.mxu1 }
  0xef   :  { %v947_v3 = vadd.f32 %v946_v0, %v385_v60  ;;  %v1080_v5 = vadd.f32 %v1079_v63, %v1017_v62  ;;  %v1346_v6 = vpack.c.bf16 %v1582_v1, %v1581_v55  ;;  %v1426_v8 = vpack.c.bf16 %v1868_v2, %v1858_v56 }
  0xf0   :  { %v388_v7 = vpop.f32.mrf.mxu0  ;;  %v1872_v9 = vpop.f32.mrf.mxu1  ;;  %v1021_v22 = vmul.f32 %v1582_v1, %v1582_v1 }
  0xf1   :  { %v1081_v10 = vadd.f32 %v1080_v5, %v1018_v4  ;;  %1490 = vst [vmem:[%s2136_s2 + $0x18] sm:$0xff] %v1346_v6   ;;  %v1341_v11 = vpack.c.bf16 %v388_v7, %v385_v60  ;;  %v948_v12 = vadd.f32 %v947_v3, %v388_v7  ;;  %v1019_v13 = vmul.f32 %v388_v7, %v388_v7 }
  0xf2   :  { %v1585_v14 = vpop.f32.mrf.mxu0  ;;  %1506 = vst [vmem:[%s2136_s2 + $0x98] sm:$0xff] %v1426_v8   ;;  %v1421_v15 = vpack.c.bf16 %v1872_v9, %v1866_v61  ;;  %v1882_v16 = vpop.f32.mrf.mxu1 }
  0xf3   :  { %1489 = vst [vmem:[%s2136_s2 + $0x10] sm:$0xff] %v1341_v11   ;;  %v949_v18 = vadd.f32 %v1581_v55, %v948_v12  ;;  %v1082_v19 = vadd.f32 %v1081_v10, %v1019_v13  ;;  %v1024_v42 = vmul.f32 %v1585_v14, %v1585_v14 }
  0xf4   :  { %v401_v20 = vpop.f32.mrf.mxu0  ;;  %1505 = vst [vmem:[%s2136_s2 + $0x90] sm:$0xff] %v1421_v15   ;;  %v1890_v21 = vpop.f32.mrf.mxu1 }
  0xf5   :  { %v1083_v23 = vadd.f32 %v1082_v19, %v1020_v17  ;;  %v950_v24 = vadd.f32 %v1582_v1, %v949_v18  ;;  %v1022_v28 = vmul.f32 %v401_v20, %v401_v20 }
  0xf6   :  { %v1586_v25 = vpop.f32.mrf.mxu0  ;;  %v1892_v26 = vpop.f32.mrf.mxu1 }
  0xf7   :  { %v951_v27 = vadd.f32 %v950_v24, %v401_v20  ;;  %v1084_v29 = vadd.f32 %v1083_v23, %v1021_v22  ;;  %v1356_v30 = vpack.c.bf16 %v1586_v25, %v1585_v14  ;;  %v1436_v32 = vpack.c.bf16 %v1892_v26, %v1882_v16 }
  0xf8   :  { %v404_v31 = vpop.f32.mrf.mxu0  ;;  %v1896_v33 = vpop.f32.mrf.mxu1  ;;  %v1025_v49 = vmul.f32 %v1586_v25, %v1586_v25 }
  0xf9   :  { %v1085_v34 = vadd.f32 %v1084_v29, %v1022_v28  ;;  %1492 = vst [vmem:[%s2136_s2 + $0x28] sm:$0xff] %v1356_v30   ;;  %v1351_v35 = vpack.c.bf16 %v404_v31, %v401_v20  ;;  %v952_v36 = vadd.f32 %v951_v27, %v404_v31  ;;  %v1023_v37 = vmul.f32 %v404_v31, %v404_v31 }
  0xfa   :  { %v1589_v38 = vpop.f32.mrf.mxu0  ;;  %1508 = vst [vmem:[%s2136_s2 + $0xa8] sm:$0xff] %v1436_v32   ;;  %v1431_v39 = vpack.c.bf16 %v1896_v33, %v1890_v21  ;;  %v1906_v40 = vpop.f32.mrf.mxu1 }
  0xfb   :  { %1491 = vst [vmem:[%s2136_s2 + $0x20] sm:$0xff] %v1351_v35   ;;  %v953_v44 = vadd.f32 %v1585_v14, %v952_v36  ;;  %v1086_v46 = vadd.f32 %v1085_v34, %v1023_v37  ;;  %v1028_v8 = vmul.f32 %v1589_v38, %v1589_v38 }
  0xfc   :  { %v417_v47 = vpop.f32.mrf.mxu0  ;;  %1507 = vst [vmem:[%s2136_s2 + $0xa0] sm:$0xff] %v1431_v39   ;;  %v1914_v48 = vpop.f32.mrf.mxu1 }
  0xfd   :  { %v1087_v51 = vadd.f32 %v1086_v46, %v1024_v42  ;;  %v954_v52 = vadd.f32 %v1586_v25, %v953_v44  ;;  %v1026_v57 = vmul.f32 %v417_v47, %v417_v47 }
  0xfe   :  { %v1590_v53 = vpop.f32.mrf.mxu0  ;;  %v1916_v54 = vpop.f32.mrf.mxu1 }
  0xff   :  { %v955_v55 = vadd.f32 %v954_v52, %v417_v47  ;;  %v1088_v58 = vadd.f32 %v1087_v51, %v1025_v49  ;;  %v1366_v59 = vpack.c.bf16 %v1590_v53, %v1589_v38  ;;  %v1446_v62 = vpack.c.bf16 %v1916_v54, %v1906_v40 }
 0x100   :  { %v420_v60 = vpop.f32.mrf.mxu0  ;;  %v1920_v63 = vpop.f32.mrf.mxu1  ;;  %v1029_v14 = vmul.f32 %v1590_v53, %v1590_v53 }
 0x101   :  { %v1089_v0 = vadd.f32 %v1088_v58, %v1026_v57  ;;  %1494 = vst [vmem:[%s2136_s2 + $0x38] sm:$0xff] %v1366_v59   ;;  %v1361_v1 = vpack.c.bf16 %v420_v60, %v417_v47  ;;  %v956_v3 = vadd.f32 %v955_v55, %v420_v60  ;;  %v1027_v4 = vmul.f32 %v420_v60, %v420_v60 }
 0x102   :  { %v1593_v5 = vpop.f32.mrf.mxu0  ;;  %1510 = vst [vmem:[%s2136_s2 + $0xb8] sm:$0xff] %v1446_v62   ;;  %v1441_v6 = vpack.c.bf16 %v1920_v63, %v1914_v48  ;;  %v1930_v7 = vpop.f32.mrf.mxu1 }
 0x103   :  { %1493 = vst [vmem:[%s2136_s2 + $0x30] sm:$0xff] %v1361_v1   ;;  %v957_v10 = vadd.f32 %v1589_v38, %v956_v3  ;;  %v1090_v11 = vadd.f32 %v1089_v0, %v1027_v4  ;;  %v1032_v37 = vmul.f32 %v1593_v5, %v1593_v5 }
 0x104   :  { %v433_v12 = vpop.f32.mrf.mxu0  ;;  %1509 = vst [vmem:[%s2136_s2 + $0xb0] sm:$0xff] %v1441_v6   ;;  %v1938_v13 = vpop.f32.mrf.mxu1 }
 0x105   :  { %v1091_v15 = vadd.f32 %v1090_v11, %v1028_v8  ;;  %v958_v17 = vadd.f32 %v1590_v53, %v957_v10  ;;  %v1030_v22 = vmul.f32 %v433_v12, %v433_v12 }
 0x106   :  { %v1594_v18 = vpop.f32.mrf.mxu0  ;;  %v1940_v19 = vpop.f32.mrf.mxu1 }
 0x107   :  { %v959_v20 = vadd.f32 %v958_v17, %v433_v12  ;;  %v1092_v23 = vadd.f32 %v1091_v15, %v1029_v14  ;;  %v1376_v24 = vpack.c.bf16 %v1594_v18, %v1593_v5  ;;  %v1456_v27 = vpack.c.bf16 %v1940_v19, %v1930_v7 }
 0x108   :  { %v436_v25 = vpop.f32.mrf.mxu0  ;;  %v1944_v28 = vpop.f32.mrf.mxu1  ;;  %v1033_v46 = vmul.f32 %v1594_v18, %v1594_v18 }
 0x109   :  { %v1093_v29 = vadd.f32 %v1092_v23, %v1030_v22  ;;  %1496 = vst [vmem:[%s2136_s2 + $0x48] sm:$0xff] %v1376_v24   ;;  %v1371_v30 = vpack.c.bf16 %v436_v25, %v433_v12  ;;  %v960_v31 = vadd.f32 %v959_v20, %v436_v25  ;;  %v1031_v32 = vmul.f32 %v436_v25, %v436_v25 }
 0x10a   :  { %v1597_v34 = vpop.f32.mrf.mxu0  ;;  %1512 = vst [vmem:[%s2136_s2 + $0xc8] sm:$0xff] %v1456_v27   ;;  %v1451_v35 = vpack.c.bf16 %v1944_v28, %v1938_v13  ;;  %v1954_v36 = vpop.f32.mrf.mxu1 }
 0x10b   :  { %1495 = vst [vmem:[%s2136_s2 + $0x40] sm:$0xff] %v1371_v30   ;;  %v961_v38 = vadd.f32 %v1593_v5, %v960_v31  ;;  %v1094_v39 = vadd.f32 %v1093_v29, %v1031_v32  ;;  %v1036_v10 = vmul.f32 %v1597_v34, %v1597_v34 }
 0x10c   :  { %v449_v42 = vpop.f32.mrf.mxu0  ;;  %1511 = vst [vmem:[%s2136_s2 + $0xc0] sm:$0xff] %v1451_v35   ;;  %v1962_v44 = vpop.f32.mrf.mxu1 }
 0x10d   :  { %v1095_v47 = vadd.f32 %v1094_v39, %v1032_v37  ;;  %v962_v49 = vadd.f32 %v1594_v18, %v961_v38  ;;  %v1034_v55 = vmul.f32 %v449_v42, %v449_v42 }
 0x10e   :  { %v1598_v51 = vpop.f32.mrf.mxu0  ;;  %v1964_v52 = vpop.f32.mrf.mxu1 }
 0x10f   :  { %v963_v53 = vadd.f32 %v962_v49, %v449_v42  ;;  %v1096_v57 = vadd.f32 %v1095_v47, %v1033_v46  ;;  %v1386_v58 = vpack.c.bf16 %v1598_v51, %v1597_v34  ;;  %v1466_v60 = vpack.c.bf16 %v1964_v52, %v1954_v36 }
 0x110   :  { %v452_v59 = vpop.f32.mrf.mxu0  ;;  %v1968_v62 = vpop.f32.mrf.mxu1  ;;  %v1037_v17 = vmul.f32 %v1598_v51, %v1598_v51 }
 0x111   :  { %v1097_v0 = vadd.f32 %v1096_v57, %v1034_v55  ;;  %1498 = vst [vmem:[%s2136_s2 + $0x58] sm:$0xff] %v1386_v58   ;;  %v1381_v1 = vpack.c.bf16 %v452_v59, %v449_v42  ;;  %v964_v3 = vadd.f32 %v963_v53, %v452_v59  ;;  %v1035_v4 = vmul.f32 %v452_v59, %v452_v59 }
 0x112   :  { %v1601_v5 = vpop.f32.mrf.mxu0  ;;  %1514 = vst [vmem:[%s2136_s2 + $0xd8] sm:$0xff] %v1466_v60   ;;  %v1461_v6 = vpack.c.bf16 %v1968_v62, %v1962_v44  ;;  %v1978_v8 = vpop.f32.mrf.mxu1 }
 0x113   :  { %1497 = vst [vmem:[%s2136_s2 + $0x50] sm:$0xff] %v1381_v1   ;;  %v965_v11 = vadd.f32 %v1597_v34, %v964_v3  ;;  %v1098_v12 = vadd.f32 %v1097_v0, %v1035_v4  ;;  %v1040_v47 = vmul.f32 %v1601_v5, %v1601_v5 }
 0x114   :  { %v465_v14 = vpop.f32.mrf.mxu0  ;;  %1513 = vst [vmem:[%s2136_s2 + $0xd0] sm:$0xff] %v1461_v6   ;;  %v1986_v15 = vpop.f32.mrf.mxu1 }
 0x115   :  { %v1099_v18 = vadd.f32 %v1098_v12, %v1036_v10  ;;  %v966_v20 = vadd.f32 %v1598_v51, %v965_v11  ;;  %v1038_v25 = vmul.f32 %v465_v14, %v465_v14 }
 0x116   :  { %v1602_v22 = vpop.f32.mrf.mxu0  ;;  %v1988_v23 = vpop.f32.mrf.mxu1 }
 0x117   :  { %v967_v24 = vadd.f32 %v966_v20, %v465_v14  ;;  %v1100_v27 = vadd.f32 %v1099_v18, %v1037_v17  ;;  %v1396_v29 = vpack.c.bf16 %v1602_v22, %v1601_v5  ;;  %v1476_v31 = vpack.c.bf16 %v1988_v23, %v1978_v8 }
 0x118   :  { %v468_v30 = vpop.f32.mrf.mxu0  ;;  %v1992_v32 = vpop.f32.mrf.mxu1  ;;  %v1041_v57 = vmul.f32 %v1602_v22, %v1602_v22 }
 0x119   :  { %v1101_v34 = vadd.f32 %v1100_v27, %v1038_v25  ;;  %1500 = vst [vmem:[%s2136_s2 + $0x68] sm:$0xff] %v1396_v29   ;;  %v1391_v35 = vpack.c.bf16 %v468_v30, %v465_v14  ;;  %v968_v37 = vadd.f32 %v967_v24, %v468_v30  ;;  %v1039_v38 = vmul.f32 %v468_v30, %v468_v30 }
 0x11a   :  { %v1605_v39 = vpop.f32.mrf.mxu0  ;;  %1516 = vst [vmem:[%s2136_s2 + $0xe8] sm:$0xff] %v1476_v31   ;;  %v1471_v42 = vpack.c.bf16 %v1992_v32, %v1986_v15  ;;  %v2002_v46 = vpop.f32.mrf.mxu1  ;;  %v1046_v31 = vmul.f32 %v1842_v43, %v1842_v43 }
 0x11b   :  { %1499 = vst [vmem:[%s2136_s2 + $0x60] sm:$0xff] %v1391_v35   ;;  %v969_v49 = vadd.f32 %v1601_v5, %v968_v37  ;;  %v1102_v51 = vadd.f32 %v1101_v34, %v1039_v38  ;;  %v1047_v38 = vmul.f32 %v1848_v50, %v1848_v50 }
 0x11c   :  { %v481_v53 = vpop.f32.mrf.mxu0  ;;  %1515 = vst [vmem:[%s2136_s2 + $0xe0] sm:$0xff] %v1471_v42   ;;  %v2010_v55 = vpop.f32.mrf.mxu1  ;;  %v1048_v42 = vmul.f32 %v1840_v41, %v1840_v41 }
 0x11d   :  { %v1103_v58 = vadd.f32 %v1102_v51, %v1040_v47  ;;  %v970_v59 = vadd.f32 %v1602_v22, %v969_v49  ;;  %v1042_v3 = vmul.f32 %v481_v53, %v481_v53  ;;  %v1044_v22 = vmul.f32 %v1605_v39, %v1605_v39 }
 0x11e   :  { %v1606_v60 = vpop.f32.mrf.mxu0  ;;  %v2012_v0 = vpop.f32.mrf.mxu1  ;;  %v1049_v51 = vmul.f32 %v1844_v45, %v1844_v45 }
 0x11f   :  { %v971_v1 = vadd.f32 %v970_v59, %v481_v53  ;;  %v1104_v4 = vadd.f32 %v1103_v58, %v1041_v57  ;;  %v1406_v6 = vpack.c.bf16 %v1606_v60, %v1605_v39  ;;  %v1486_v5 = vpack.c.bf16 %v2012_v0, %v2002_v46 }
 0x120   :  { %v484_v10 = vpop.f32.mrf.mxu0  ;;  %v2016_v11 = vpop.f32.mrf.mxu1  ;;  %v1045_v27 = vmul.f32 %v1606_v60, %v1606_v60  ;;  %v1050_v58 = vmul.f32 %v1866_v61, %v1866_v61 }
 0x121   :  { %v1105_v12 = vadd.f32 %v1104_v4, %v1042_v3  ;;  %1502 = vst [vmem:[%s2136_s2 + $0x78] sm:$0xff] %v1406_v6   ;;  %v1401_v14 = vpack.c.bf16 %v484_v10, %v481_v53  ;;  %v972_v17 = vadd.f32 %v971_v1, %v484_v10  ;;  %v1043_v18 = vmul.f32 %v484_v10, %v484_v10 }
 0x122   :  { %1518 = vst [vmem:[%s2136_s2 + $0xf8] sm:$0xff] %v1486_v5   ;;  %v1481_v20 = vpack.c.bf16 %v2016_v11, %v2010_v55  ;;  %v1051_v1 = vmul.f32 %v1872_v9, %v1872_v9  ;;  %v1054_v5 = vmul.f32 %v1890_v21, %v1890_v21 }
 0x123   :  { %1501 = vst [vmem:[%s2136_s2 + $0x70] sm:$0xff] %v1401_v14   ;;  %v973_v24 = vadd.f32 %v1605_v39, %v972_v17  ;;  %v1106_v25 = vadd.f32 %v1105_v12, %v1043_v18  ;;  %v1055_v17 = vmul.f32 %v1896_v33, %v1896_v33 }
 0x124   :  { %1517 = vst [vmem:[%s2136_s2 + $0xf0] sm:$0xff] %v1481_v20  }
 0x125   :  { %v974_v29 = vadd.f32 %v1606_v60, %v973_v24  ;;  %v1107_v30 = vadd.f32 %v1106_v25, %v1044_v22  ;;  %v1058_v25 = vmul.f32 %v1914_v48, %v1914_v48 }
 0x127   :  { %v1108_v34 = vadd.f32 %v1107_v30, %v1045_v27  ;;  %v975_v35 = vadd.f32 %v974_v29, %v1842_v43  ;;  %v1059_v30 = vmul.f32 %v1920_v63, %v1920_v63 }
 0x129   :  { %v976_v37 = vadd.f32 %v975_v35, %v1848_v50  ;;  %v1109_v39 = vadd.f32 %v1108_v34, %v1046_v31 }
 0x12b   :  { %v977_v47 = vadd.f32 %v1840_v41, %v976_v37  ;;  %v1110_v49 = vadd.f32 %v1109_v39, %v1047_v38  ;;  %v1052_v41 = vmul.f32 %v1858_v56, %v1858_v56  ;;  %v1062_v38 = vmul.f32 %v1938_v13, %v1938_v13 }
 0x12d   :  { %v1111_v53 = vadd.f32 %v1110_v49, %v1048_v42  ;;  %v978_v57 = vadd.f32 %v1844_v45, %v977_v47  ;;  %v1053_v45 = vmul.f32 %v1868_v2, %v1868_v2  ;;  %v1063_v47 = vmul.f32 %v1944_v28, %v1944_v28 }
 0x12f   :  { %v979_v43 = vadd.f32 %v978_v57, %v1866_v61  ;;  %v1112_v59 = vadd.f32 %v1111_v53, %v1049_v51 }
 0x131   :  { %v1113_v50 = vadd.f32 %v1112_v59, %v1050_v58  ;;  %v980_v60 = vadd.f32 %v979_v43, %v1872_v9  ;;  %v1066_v43 = vmul.f32 %v1962_v44, %v1962_v44 }
 0x133   :  { %v981_v3 = vadd.f32 %v1858_v56, %v980_v60  ;;  %v1114_v4 = vadd.f32 %v1113_v50, %v1051_v1  ;;  %v1056_v56 = vmul.f32 %v1882_v16, %v1882_v16  ;;  %v1067_v50 = vmul.f32 %v1968_v62, %v1968_v62 }
 0x135   :  { %v1115_v6 = vadd.f32 %v1114_v4, %v1052_v41  ;;  %v982_v10 = vadd.f32 %v1868_v2, %v981_v3  ;;  %v1057_v2 = vmul.f32 %v1892_v26, %v1892_v26  ;;  %v1070_v4 = vmul.f32 %v1986_v15, %v1986_v15 }
 0x137   :  { %v983_v61 = vadd.f32 %v982_v10, %v1890_v21  ;;  %v1116_v12 = vadd.f32 %v1115_v6, %v1053_v45  ;;  %v1071_v10 = vmul.f32 %v1992_v32, %v1992_v32 }
 0x139   :  { %v1117_v14 = vadd.f32 %v1116_v12, %v1054_v5  ;;  %v984_v9 = vadd.f32 %v983_v61, %v1896_v33 }
 0x13b   :  { %v985_v18 = vadd.f32 %v1882_v16, %v984_v9  ;;  %v1118_v20 = vadd.f32 %v1117_v14, %v1055_v17  ;;  %v1060_v16 = vmul.f32 %v1906_v40, %v1906_v40  ;;  %v1074_v9 = vmul.f32 %v2010_v55, %v2010_v55 }
 0x13d   :  { %v1119_v22 = vadd.f32 %v1118_v20, %v1056_v56  ;;  %v986_v24 = vadd.f32 %v1892_v26, %v985_v18  ;;  %v1061_v26 = vmul.f32 %v1916_v54, %v1916_v54  ;;  %v1075_v18 = vmul.f32 %v2016_v11, %v2016_v11 }
 0x13f   :  { %v987_v21 = vadd.f32 %v986_v24, %v1914_v48  ;;  %v1120_v27 = vadd.f32 %v1119_v22, %v1057_v2 }
 0x141   :  { %v1121_v29 = vadd.f32 %v1120_v27, %v1058_v25  ;;  %v988_v33 = vadd.f32 %v987_v21, %v1920_v63 }
 0x143   :  { %v989_v31 = vadd.f32 %v1906_v40, %v988_v33  ;;  %v1122_v34 = vadd.f32 %v1121_v29, %v1059_v30  ;;  %v1064_v40 = vmul.f32 %v1930_v7, %v1930_v7 }
 0x145   :  { %v1123_v35 = vadd.f32 %v1122_v34, %v1060_v16  ;;  %v990_v37 = vadd.f32 %v1916_v54, %v989_v31  ;;  %v1065_v54 = vmul.f32 %v1940_v19, %v1940_v19 }
 0x147   :  { %v991_v48 = vadd.f32 %v990_v37, %v1938_v13  ;;  %v1124_v39 = vadd.f32 %v1123_v35, %v1061_v26 }
 0x149   :  { %v1125_v42 = vadd.f32 %v1124_v39, %v1062_v38  ;;  %v992_v63 = vadd.f32 %v991_v48, %v1944_v28 }
 0x14b   :  { %v993_v49 = vadd.f32 %v1930_v7, %v992_v63  ;;  %v1126_v51 = vadd.f32 %v1125_v42, %v1063_v47  ;;  %v1068_v7 = vmul.f32 %v1954_v36, %v1954_v36 }
 0x14d   :  { %v1127_v53 = vadd.f32 %v1126_v51, %v1064_v40  ;;  %v994_v57 = vadd.f32 %v1940_v19, %v993_v49  ;;  %v1069_v19 = vmul.f32 %v1964_v52, %v1964_v52 }
 0x14f   :  { %v995_v13 = vadd.f32 %v994_v57, %v1962_v44  ;;  %v1128_v58 = vadd.f32 %v1127_v53, %v1065_v54 }
 0x151   :  { %v1129_v59 = vadd.f32 %v1128_v58, %v1066_v43  ;;  %v996_v28 = vadd.f32 %v995_v13, %v1968_v62 }
 0x153   :  { %v997_v60 = vadd.f32 %v1954_v36, %v996_v28  ;;  %v1130_v1 = vadd.f32 %v1129_v59, %v1067_v50  ;;  %v1072_v36 = vmul.f32 %v1978_v8, %v1978_v8 }
 0x155   :  { %v1131_v41 = vadd.f32 %v1130_v1, %v1068_v7  ;;  %v998_v3 = vadd.f32 %v1964_v52, %v997_v60  ;;  %v1073_v52 = vmul.f32 %v1988_v23, %v1988_v23 }
 0x157   :  { %v999_v44 = vadd.f32 %v998_v3, %v1986_v15  ;;  %v1132_v45 = vadd.f32 %v1131_v41, %v1069_v19 }
 0x159   :  { %v1133_v6 = vadd.f32 %v1132_v45, %v1070_v4  ;;  %v1000_v62 = vadd.f32 %v999_v44, %v1992_v32 }
 0x15b   :  { %v1001_v61 = vadd.f32 %v1978_v8, %v1000_v62  ;;  %v1134_v5 = vadd.f32 %v1133_v6, %v1071_v10  ;;  %v1076_v8 = vmul.f32 %v2002_v46, %v2002_v46 }
 0x15d   :  { %v1135_v12 = vadd.f32 %v1134_v5, %v1072_v36  ;;  %v1002_v14 = vadd.f32 %v1988_v23, %v1001_v61  ;;  %v1077_v23 = vmul.f32 %v2012_v0, %v2012_v0 }
 0x15f   :  { %v1003_v15 = vadd.f32 %v1002_v14, %v2010_v55  ;;  %v1136_v17 = vadd.f32 %v1135_v12, %v1073_v52 }
 0x161   :  { %v1137_v56 = vadd.f32 %v1136_v17, %v1074_v9  ;;  %v1004_v32 = vadd.f32 %v1003_v15, %v2016_v11 }
 0x163   :  { %v1005_v20 = vadd.f32 %v2002_v46, %v1004_v32  ;;  %v1138_v2 = vadd.f32 %v1137_v56, %v1075_v18 }
 0x165   :  { %v1006_v22 = vadd.f32 %v2012_v0, %v1005_v20  ;;  %v1139_v24 = vadd.f32 %v1138_v2, %v1076_v8 }
 0x167   :  { %v1007_v55 = vrot.slane %v1006_v22, 4  ;;  %v1140_v21 = vadd.f32 %v1139_v24, %v1077_v23 }
 0x169   :  { %v1008_v25 = vadd.f32 %v1007_v55, %v1006_v22  ;;  %v1141_v27 = vrot.slane %v1140_v21, 4 }
 0x16b   :  { %v1009_v29 = vrot.slane %v1008_v25, 2  ;;  %v1142_v33 = vadd.f32 %v1141_v27, %v1140_v21 }
 0x16d   :  { %v1010_v30 = vadd.f32 %v1009_v29, %v1008_v25  ;;  %v1143_v11 = vrot.slane %v1142_v33, 2 }
 0x16f   :  { %v1011_v16 = vrot.slane %v1010_v30, 1  ;;  %v1144_v31 = vadd.f32 %v1143_v11, %v1142_v33 }
 0x171   :  { %v1012_v34 = vadd.f32 %v1011_v16, %v1010_v30  ;;  %v1145_v26 = vrot.slane %v1144_v31, 1 }
 0x173   :  { %1013 = vst [vmem:[%s2137_s3] sm:$0xff] %v1012_v34  ;;  %v1146_v46 = vadd.f32 %v1145_v26, %v1144_v31 }
 0x175   :  { %1147 = vst [vmem:[%s2138_s4] sm:$0xff] %v1146_v46 }

// kernel: incept_block_b.4
= control target key start
LH: loop header
LB: loop body
LE: loop exit
PB: predicated region body
PF: predicated region fallthrough
CT: control target
= control target key end

     0   :  { %v515_v0 = vlaneseq  ;;  %vm1127_vm2 = vsmask.f32 7424  ;;  %vm2299_vm3 = vcmask 1046528   ;;  %vm4337_vm4 = vmmov 1   ;;  %s6195_s3 = inlined_call_operand.vmem [shape: bf16[3,128,128], index: 3, kind: input, shape index: {}]   ;;  %s6196_s0 = inlined_call_operand.vmem [shape: bf16[32,18,128], index: 0, kind: input, shape index: {}]   ;;  %s6197_s1 = inlined_call_operand.vmem [shape: f32[1,128], index: 1, kind: input, shape index: {}]   ;;  %s6198_s2 = inlined_call_operand.vmem [shape: f32[1,128], index: 2, kind: input, shape index: {}]   ;;  %s6199_s4 = inlined_call_operand.vmem [shape: bf16[32,16,128], index: 4, kind: output, shape index: {0}]   ;;  %s6200_s5 = inlined_call_operand.vmem [shape: f32[8,128], index: 5, kind: output, shape index: {1}]   ;;  %s6201_s6 = inlined_call_operand.vmem [shape: f32[8,128], index: 6, kind: output, shape index: {2}]  }
   0x1   :  { %v4311_v1 = vld [vmem:[%s6195_s3 + $0x78] sm:$0xff]   ;;  %v4312_v2 = vld [vmem:[%s6195_s3 + $0x70] sm:$0xff]   ;;  %v4313_v4 = vld [vmem:[%s6195_s3 + $0x68] sm:$0xff]  }
   0x2   :  { %4054 = vmatprep.subr.bf16.mxu0 %v4311_v1  ;;  %4294 = vmatprep.subr.bf16.mxu1 %v4311_v1  ;;  %v4379_v3 = vshrl.u32 %v515_v0, 7  ;;  %v4314_v6 = vld [vmem:[%s6195_s3 + $0x60] sm:$0xff]   ;;  %v23_v8 = vld [vmem:[%s6196_s0 + $0x8] sm:$0x1]  ;;  %v24_v19 = vld [vmem:[%s6196_s0 + $0xc] sm:$0xff]  }
   0x3   :  { %4055 = vmatpush3.bf16.msra.mxu0 %v4311_v1  ;;  %4302 = vmatpush3.bf16.msra.mxu1 %v4311_v1  ;;  %v3665_v7 = vld [vmem:[%s6196_s0] sm:$0xff]   ;;  %v119_v12 = vunpack.c.l.bf16 %v23_v8  ;;  %v71_v14 = vld [vmem:[%s6196_s0 + $0xc8] sm:$0x1]  ;;  %v26_v20 = vld [vmem:[%s6196_s0 + $0x14] sm:$0x1]  ;;  %v120_v24 = vunpack.c.l.bf16 %v24_v19  ;;  %v121_v29 = vunpack.c.h.bf16 %v24_v19 }
   0x4   :  { %4056 = vmatprep.subr.bf16.mxu0 %v4312_v2  ;;  %4295 = vmatprep.subr.bf16.mxu1 %v4312_v2  ;;  %v4385_v5 = vadd.s32 16, %v4379_v3  ;;  %v4399_v9 = vld [vmem:[%s6197_s1] ss:$0 sm:$0xff]  ;;  %v3666_v10 = vunpack.c.l.bf16 %v3665_v7  ;;  %v3667_v11 = vunpack.c.h.bf16 %v3665_v7  ;;  %vm552_vm0 = vcmp.ge.s32.totalorder %v4379_v3, 1  ;;  %v4315_v25 = vld [vmem:[%s6195_s3 + $0x58] sm:$0xff]   ;;  %v4316_v42 = vld [vmem:[%s6195_s3 + $0x50] sm:$0xff]  }
   0x5   :  { %v3895_v13 = vld [vmem:[%s6196_s0 + $0xc0] sm:$0xff]   ;;  %v167_v18 = vunpack.c.l.bf16 %v71_v14  ;;  %v222_v23 = vmul.f32 %v4399_v9, %v119_v12  ;;  %v122_v33 = vunpack.c.l.bf16 %v26_v20  ;;  %v223_v37 = vmul.f32 %v4399_v9, %v120_v24  ;;  %v4317_v59 = vld [vmem:[%s6195_s3 + $0x48] sm:$0xff]   ;;  %v74_v12 = vld [vmem:[%s6196_s0 + $0xd4] sm:$0x1] }
   0x6   :  { %v4411_v15 = vld [vmem:[%s6198_s2] ss:$0 sm:$0xff]  ;;  %vm557_vm1 = vcmp.le.s32.totalorder %v4385_v5, 16  ;;  %v3698_v16 = vunpack.c.l.bf16 %v3895_v13  ;;  %v3699_v17 = vunpack.c.h.bf16 %v3895_v13  ;;  %v220_v21 = vmul.f32 %v3666_v10, %v4399_v9  ;;  %v3888_v19 = vld [vmem:[%s6196_s0 + $0x18] sm:$0xff]   ;;  %vm5568_vm5 = vmpackc.low %vm4337_vm4, %vm552_vm0 }
   0x7   :  { %4057 = vmatpush3.bf16.msra.mxu0 %v4312_v2  ;;  %4303 = vmatpush3.bf16.msra.mxu1 %v4312_v2  ;;  %v221_v22 = vmul.f32 %v3667_v11, %v4399_v9  ;;  %v270_v28 = vmul.f32 %v4399_v9, %v167_v18  ;;  %v325_v32 = vadd.f32 %v4411_v15, %v222_v23  ;;  %v4318_v13 = vld [vmem:[%s6195_s3 + $0x40] sm:$0xff]  }
   0x8   :  { %4058 = vmatprep.subr.bf16.mxu0 %v4313_v4  ;;  %4296 = vmatprep.subr.bf16.mxu1 %v4313_v4  ;;  %v268_v26 = vmul.f32 %v3698_v16, %v4399_v9  ;;  %v269_v27 = vmul.f32 %v3699_v17, %v4399_v9  ;;  %v4430_v30 = vadd.f32 %v4411_v15, %v220_v21 }
   0x9   :  { %v4433_v31 = vadd.f32 %v4411_v15, %v221_v22  ;;  %v373_v36 = vadd.f32 %v4411_v15, %v270_v28  ;;  %v421_v40 = vmax.f32 %v325_v32, 0.0  ;;  %v224_v41 = vmul.f32 %v4399_v9, %v121_v29 }
   0xa   :  { %v4437_v34 = vadd.f32 %v4411_v15, %v268_v26  ;;  %v4440_v35 = vadd.f32 %v4411_v15, %v269_v27  ;;  %v6219_v38 = vmax.f32 %v4430_v30, 0.0  ;;  %v225_v46 = vmul.f32 %v4399_v9, %v122_v33 }
   0xb   :  { %4059 = vmatpush3.bf16.msra.mxu0 %v4313_v4  ;;  %4304 = vmatpush3.bf16.msra.mxu1 %v4313_v4  ;;  %v6218_v39 = vmax.f32 %v4433_v31, 0.0  ;;  %v469_v45 = vmax.f32 %v373_v36, 0.0  ;;  %v953_v48 = vsel %vm557_vm1, %v421_v40, 0.0  ;;  %v326_v49 = vadd.f32 %v4411_v15, %v223_v37  ;;  %v29_v36 = vld [vmem:[%s6196_s0 + $0x20] sm:$0x1] }
   0xc   :  { %4060 = vmatprep.subr.bf16.mxu0 %v4314_v6  ;;  %4297 = vmatprep.subr.bf16.mxu1 %v4314_v6  ;;  %6333 = vst [vmem:[#allocation2_spill] sm:$0xff] %v4437_v34  ;;  %6334 = vst [vmem:[#allocation3_spill] sm:$0xff] %v4440_v35  ;;  %v6209_v43 = vmax.f32 %v4437_v34, 0.0  ;;  %v6208_v44 = vmax.f32 %v4440_v35, 0.0  ;;  %v951_v47 = vsel %vm552_vm0, %v6219_v38, 0.0  ;;  %v327_v50 = vadd.f32 %v4411_v15, %v224_v41 }
   0xd   :  { %v4463_v51 = vpack.c.bf16 %v6218_v39, %v951_v47  ;;  %v4465_v52 = vpack.c.bf16 %v953_v48, %v953_v48  ;;  %v1001_v54 = vsel %vm557_vm1, %v469_v45, 0.0  ;;  %v328_v57 = vadd.f32 %v4411_v15, %v225_v46  ;;  %v3896_v46 = vld [vmem:[%s6196_s0 + $0xd8] sm:$0xff]  }
   0xe   :  { %v999_v53 = vsel %vm552_vm0, %v6209_v43, 0.0  ;;  %v4477_v56 = vpack.c.bf16 %v1001_v54, %v1001_v54  ;;  %v422_v58 = vmax.f32 %v326_v49, 0.0  ;;  %v423_v63 = vmax.f32 %v327_v50, 0.0  ;;  %v4320_v50 = vld [vmem:[%s6195_s3 + $0xb8] sm:$0xff]   ;;  %v77_v54 = vld [vmem:[%s6196_s0 + $0xe0] sm:$0x1] }
   0xf   :  { %4061 = vmatpush3.bf16.msra.mxu0 %v4314_v6  ;;  %4305 = vmatpush3.bf16.msra.mxu1 %v4314_v6  ;;  %v4475_v55 = vpack.c.bf16 %v6208_v44, %v999_v53  ;;  %v1129_v60 = vshrl.u32 %v4463_v51, 16  ;;  %v1131_v61 = vshll.u32 %v4463_v51, 16  ;;  %v1136_v62 = vshll.u32 %v4465_v52, 16  ;;  %v72_v6 = vld [vmem:[%s6196_s0 + $0xcc] sm:$0xff]  }
  0x10   :  { %4062 = vmatprep.subr.bf16.mxu0 %v4315_v25  ;;  %4298 = vmatprep.subr.bf16.mxu1 %v4315_v25  ;;  %6336 = vst [vmem:[#allocation5_spill] sm:$0xff] %v4477_v56  ;;  %v1328_v2 = vshll.u32 %v4477_v56, 16  ;;  %v424_v4 = vmax.f32 %v328_v57, 0.0  ;;  %v954_v10 = vsel %vm552_vm0, %v422_v58, 0.0  ;;  %v4494_v11 = vpack.c.bf16 %v423_v63, %v422_v58 }
  0x11   :  { %6335 = vst [vmem:[#allocation4_spill] sm:$0xff] %v4475_v55  ;;  %v1321_v0 = vshrl.u32 %v4475_v55, 16  ;;  %v1323_v1 = vshll.u32 %v4475_v55, 16  ;;  %v1133_v7 = vrot.slane %v1131_v61, 1  ;;  %v1138_v8 = vrot.slane %v1136_v62, 1 }
  0x12   :  { %v1330_v16 = vrot.slane %v1328_v2, 1  ;;  %v956_v17 = vsel %vm557_vm1, %v424_v4, 0.0  ;;  %v4504_v18 = vpack.c.bf16 %v423_v63, %v954_v10  ;;  %v168_v22 = vunpack.c.l.bf16 %v72_v6 }
  0x13   :  { %4063 = vmatpush3.bf16.msra.mxu0 %v4315_v25  ;;  %4306 = vmatpush3.bf16.msra.mxu1 %v4315_v25  ;;  %v1325_v14 = vrot.slane %v1323_v1, 1  ;;  %v1134_v20 = vor.u32 %v1133_v7, %v1129_v60  ;;  %v4509_v21 = vpack.c.bf16 %v956_v17, %v956_v17  ;;  %v169_v23 = vunpack.c.h.bf16 %v72_v6 }
  0x14   :  { %4064 = vmatprep.subr.bf16.mxu0 %v4316_v42  ;;  %4299 = vmatprep.subr.bf16.mxu1 %v4316_v42  ;;  %v1141_v25 = vshrl.u32 %v4504_v18, 16  ;;  %v1143_v26 = vshll.u32 %v4504_v18, 16  ;;  %v170_v27 = vunpack.c.l.bf16 %v74_v12  ;;  %v271_v32 = vmul.f32 %v4399_v9, %v168_v22 }
  0x15   :  { %v1326_v24 = vor.u32 %v1325_v14, %v1321_v0  ;;  %v1139_v28 = vsel %vm1127_vm2, %v1134_v20, %v1138_v8  ;;  %v1148_v29 = vshll.u32 %v4509_v21, 16  ;;  %v272_v33 = vmul.f32 %v4399_v9, %v169_v23 }
  0x16   :  { %v1145_v40 = vrot.slane %v1143_v26, 1  ;;  %v273_v41 = vmul.f32 %v4399_v9, %v170_v27  ;;  %v3670_v45 = vunpack.c.l.bf16 %v3888_v19  ;;  %v4531_v48 = vadd.f32 %v4411_v15, %v271_v32  ;;  %4070 = vmatprep.mubr.bf16.mxu0 %v1139_v28 }
  0x17   :  { %4065 = vmatpush3.bf16.msra.mxu0 %v4316_v42  ;;  %4307 = vmatpush3.bf16.msra.mxu1 %v4316_v42  ;;  %v1331_v37 = vsel %vm1127_vm2, %v1326_v24, %v1330_v16  ;;  %v4525_v42 = vld [vmem:[%s6195_s3 + $0x38] sm:$0xff]   ;;  %v1150_v47 = vrot.slane %v1148_v29, 1  ;;  %v4534_v49 = vadd.f32 %v4411_v15, %v272_v33  ;;  %v3671_v53 = vunpack.c.h.bf16 %v3888_v19 }
  0x18   :  { %4066 = vmatprep.subr.bf16.mxu0 %v4317_v59  ;;  %4300 = vmatprep.subr.bf16.mxu1 %v4317_v59  ;;  %6337 = vst [vmem:[#allocation6_spill] sm:$0xff] %v4531_v48  ;;  %v1146_v57 = vor.u32 %v1145_v40, %v1141_v25  ;;  %v376_v58 = vadd.f32 %v4411_v15, %v273_v41  ;;  %v6207_v61 = vmax.f32 %v4531_v48, 0.0  ;;  %v3702_v0 = vunpack.c.l.bf16 %v3896_v46  ;;  %v30_v25 = vld [vmem:[%s6196_s0 + $0x24] sm:$0xff]  }
  0x19   :  { %6338 = vst [vmem:[#allocation7_spill] sm:$0xff] %v4534_v49  ;;  %4102 = vmatprep.mubr.bf16.mxu1 %v1331_v37  ;;  %v226_v60 = vmul.f32 %v3670_v45, %v4399_v9  ;;  %v6206_v62 = vmax.f32 %v4534_v49, 0.0  ;;  %v227_v63 = vmul.f32 %v3671_v53, %v4399_v9  ;;  %v3703_v10 = vunpack.c.h.bf16 %v3896_v46  ;;  %v4324_v40 = vld [vmem:[%s6195_s3 + $0xa8] sm:$0xff]  }
  0x1a   :  { %v1151_v1 = vsel %vm1127_vm2, %v1146_v57, %v1150_v47  ;;  %v472_v2 = vmax.f32 %v376_v58, 0.0  ;;  %v1002_v7 = vsel %vm552_vm0, %v6207_v61, 0.0  ;;  %v173_v12 = vunpack.c.l.bf16 %v77_v54  ;;  %v32_v47 = vld [vmem:[%s6196_s0 + $0x2c] sm:$0x1] }
  0x1b   :  { %4067 = vmatpush3.bf16.msra.mxu0 %v4317_v59  ;;  %4308 = vmatpush3.bf16.msra.mxu1 %v4317_v59  ;;  %v125_v59 = vunpack.c.l.bf16 %v29_v36  ;;  %v4550_v6 = vadd.f32 %v4411_v15, %v226_v60  ;;  %v4558_v8 = vadd.f32 %v4411_v15, %v227_v63  ;;  %v4567_v16 = vpack.c.bf16 %v6206_v62, %v1002_v7  ;;  %v4321_v60 = vld [vmem:[%s6195_s3 + $0x30] sm:$0xff]   ;;  %v4326_v63 = vld [vmem:[%s6195_s3 + $0xa0] sm:$0xff]  }
  0x1c   :  { %4068 = vmatprep.subr.bf16.mxu0 %v4318_v13  ;;  %4301 = vmatprep.subr.bf16.mxu1 %v4318_v13  ;;  %v1004_v14 = vsel %vm557_vm1, %v472_v2, 0.0  ;;  %v274_v23 = vmul.f32 %v3702_v0, %v4399_v9  ;;  %v275_v24 = vmul.f32 %v3703_v10, %v4399_v9  ;;  %v276_v36 = vmul.f32 %v4399_v9, %v173_v12 }
  0x1d   :  { %v228_v4 = vmul.f32 %v4399_v9, %v125_v59  ;;  %6339 = vst [vmem:[#allocation8_spill] sm:$0xff] %v4567_v16  ;;  %v6217_v19 = vmax.f32 %v4550_v6, 0.0  ;;  %v4571_v20 = vpack.c.bf16 %v1004_v14, %v1004_v14  ;;  %v6214_v22 = vmax.f32 %v4558_v8, 0.0  ;;  %v78_v59 = vld [vmem:[%s6196_s0 + $0xe4] sm:$0xff]  }
  0x1e   :  { %v1333_v26 = vshrl.u32 %v4567_v16, 16  ;;  %v1335_v27 = vshll.u32 %v4567_v16, 16  ;;  %v4592_v37 = vadd.f32 %v4411_v15, %v274_v23  ;;  %v4600_v46 = vadd.f32 %v4411_v15, %v275_v24 }
  0x1f   :  { %4069 = vmatpush3.bf16.msra.mxu0 %v4318_v13  ;;  %4309 = vmatpush3.bf16.msra.mxu1 %v4318_v13  ;;  %v4322_v13 = vld [vmem:[%s6195_s3 + $0xb0] sm:$0xff]   ;;  %v331_v17 = vadd.f32 %v4411_v15, %v228_v4  ;;  %6340 = vst [vmem:[#allocation9_spill] sm:$0xff] %v4571_v20  ;;  %v957_v29 = vsel %vm552_vm0, %v6217_v19, 0.0  ;;  %v1340_v32 = vshll.u32 %v4571_v20, 16  ;;  %v127_v12 = vunpack.c.h.bf16 %v30_v25 }
  0x20   :  { %4134 = vmatprep.subr.bf16.mxu1 %v4525_v42  ;;  %4214 = vmatprep.subr.bf16.mxu0 %v4320_v50  ;;  %v4588_v33 = vpack.c.bf16 %v6214_v22, %v957_v29  ;;  %6341 = vst [vmem:[#allocation10_spill] sm:$0xff] %v4592_v37  ;;  %v1337_v41 = vrot.slane %v1335_v27, 1  ;;  %6342 = vst [vmem:[#allocation11_spill] sm:$0xff] %v4600_v46  ;;  %v6204_v2 = vmax.f32 %v4592_v37, 0.0  ;;  %v6202_v4 = vmax.f32 %v4600_v46, 0.0 }
  0x21   :  { %v427_v28 = vmax.f32 %v331_v17, 0.0  ;;  %v1342_v53 = vrot.slane %v1340_v32, 1  ;;  %v128_v14 = vunpack.c.l.bf16 %v32_v47  ;;  %v4323_v47 = vld [vmem:[%s6195_s3 + $0x28] sm:$0xff]  }
  0x22   :  { %4071 = vmatmul.mubr.bf16.vlgmr.msra.gmra.mxu0 %v1151_v1  ;;  %v1153_v57 = vshrl.u32 %v4588_v33, 16  ;;  %v1155_v58 = vshll.u32 %v4588_v33, 16  ;;  %v1338_v0 = vor.u32 %v1337_v41, %v1333_v26  ;;  %v379_v1 = vadd.f32 %v4411_v15, %v276_v36  ;;  %v80_v41 = vld [vmem:[%s6196_s0 + $0xec] sm:$0x1] }
  0x23   :  { %4215 = vmatpush3.bf16.msra.mxu0 %v4320_v50  ;;  %v959_v45 = vsel %vm557_vm1, %v427_v28, 0.0  ;;  %v126_v50 = vunpack.c.l.bf16 %v30_v25  ;;  %v1005_v24 = vsel %vm552_vm0, %v6204_v2, 0.0  ;;  %v230_v25 = vmul.f32 %v4399_v9, %v127_v12 }
  0x24   :  { %4216 = vmatprep.subr.bf16.mxu0 %v4322_v13  ;;  %v4605_v54 = vpack.c.bf16 %v959_v45, %v959_v45  ;;  %v1157_v7 = vrot.slane %v1155_v58, 1  ;;  %v1343_v17 = vsel %vm1127_vm2, %v1338_v0, %v1342_v53  ;;  %v475_v23 = vmax.f32 %v379_v1, 0.0 }
  0x25   :  { %v229_v26 = vmul.f32 %v4399_v9, %v126_v50  ;;  %4103 = vmatmul.mubr.bf16.vlgmr.msra.gmra.mxu1 %v1343_v17  ;;  %v231_v32 = vmul.f32 %v4399_v9, %v128_v14  ;;  %v174_v45 = vunpack.c.l.bf16 %v78_v59  ;;  %v4655_v0 = vadd.f32 %v4411_v15, %v230_v25 }
  0x26   :  { %v1160_v10 = vshll.u32 %v4605_v54, 16  ;;  %v1158_v27 = vor.u32 %v1157_v7, %v1153_v57  ;;  %4135 = vmatpush3.bf16.msra.mxu1 %v4525_v42  ;;  %v1007_v29 = vsel %vm557_vm1, %v475_v23, 0.0  ;;  %v4328_v42 = vld [vmem:[%s6195_s3 + $0x98] sm:$0xff]   ;;  %v175_v7 = vunpack.c.h.bf16 %v78_v59  ;;  %v3889_v23 = vld [vmem:[%s6196_s0 + $0x30] sm:$0xff]  }
  0x27   :  { %4217 = vmatpush3.bf16.msra.mxu0 %v4322_v13  ;;  %v4630_v13 = vpack.c.bf16 %v6202_v4, %v1005_v24  ;;  %v4638_v36 = vadd.f32 %v4411_v15, %v229_v26  ;;  %v4650_v53 = vpack.c.bf16 %v1007_v29, %v1007_v29  ;;  %4136 = vmatprep.subr.bf16.mxu1 %v4321_v60  ;;  %v176_v14 = vunpack.c.l.bf16 %v80_v41  ;;  %v35_v41 = vld [vmem:[%s6196_s0 + $0x38] sm:$0x1] }
  0x28   :  { %4218 = vmatprep.subr.bf16.mxu0 %v4324_v40  ;;  %v1162_v28 = vrot.slane %v1160_v10, 1  ;;  %v277_v17 = vmul.f32 %v4399_v9, %v174_v45  ;;  %v6210_v24 = vmax.f32 %v4655_v0, 0.0  ;;  %v278_v59 = vmul.f32 %v4399_v9, %v175_v7  ;;  %v4325_v45 = vld [vmem:[%s6195_s3 + $0x20] sm:$0xff]  }
  0x29   :  { %6343 = vst [vmem:[#allocation12_spill] sm:$0xff] %v4630_v13  ;;  %6344 = vst [vmem:[#allocation13_spill] sm:$0xff] %v4650_v53  ;;  %v1345_v57 = vshrl.u32 %v4630_v13, 16  ;;  %v1347_v58 = vshll.u32 %v4630_v13, 16  ;;  %v6213_v1 = vmax.f32 %v4638_v36, 0.0  ;;  %v1352_v12 = vshll.u32 %v4650_v53, 16 }
  0x2a   :  { %v1163_v50 = vsel %vm1127_vm2, %v1158_v27, %v1162_v28  ;;  %4137 = vmatpush3.bf16.msra.mxu1 %v4321_v60  ;;  %v279_v29 = vmul.f32 %v4399_v9, %v176_v14 }
  0x2b   :  { %4219 = vmatpush3.bf16.msra.mxu0 %v4324_v40  ;;  %4074 = vmatprep.mubr.bf16.mxu0 %v1163_v50  ;;  %v334_v40 = vadd.f32 %v4411_v15, %v231_v32  ;;  %v1349_v10 = vrot.slane %v1347_v58, 1  ;;  %v960_v27 = vsel %vm552_vm0, %v6213_v1, 0.0  ;;  %v1354_v25 = vrot.slane %v1352_v12, 1  ;;  %v4330_v58 = vld [vmem:[%s6195_s3 + $0x90] sm:$0xff]  }
  0x2c   :  { %4220 = vmatprep.subr.bf16.mxu0 %v4326_v63  ;;  %v4672_v32 = vadd.f32 %v4411_v15, %v277_v17  ;;  %4138 = vmatprep.subr.bf16.mxu1 %v4323_v47  ;;  %v4687_v50 = vadd.f32 %v4411_v15, %v278_v59  ;;  %v3897_v59 = vld [vmem:[%s6196_s0 + $0xf0] sm:$0xff]  }
  0x2d   :  { %v430_v26 = vmax.f32 %v334_v40, 0.0  ;;  %v1350_v28 = vor.u32 %v1349_v10, %v1345_v57  ;;  %v3674_v57 = vunpack.c.l.bf16 %v3889_v23  ;;  %v382_v10 = vadd.f32 %v4411_v15, %v279_v29 }
  0x2e   :  { %6345 = vst [vmem:[#allocation14_spill] sm:$0xff] %v4672_v32  ;;  %6346 = vst [vmem:[#allocation15_spill] sm:$0xff] %v4687_v50  ;;  %v6203_v12 = vmax.f32 %v4672_v32, 0.0  ;;  %4139 = vmatpush3.bf16.msra.mxu1 %v4323_v47  ;;  %v3707_v61 = vunpack.c.h.bf16 %v3897_v59 }
  0x2f   :  { %4221 = vmatpush3.bf16.msra.mxu0 %v4326_v63  ;;  %v962_v60 = vsel %vm557_vm1, %v430_v26, 0.0  ;;  %v4684_v63 = vpack.c.bf16 %v6210_v24, %v960_v27  ;;  %v1355_v40 = vsel %vm1127_vm2, %v1350_v28, %v1354_v25  ;;  %v6205_v26 = vmax.f32 %v4687_v50, 0.0  ;;  %4140 = vmatprep.subr.bf16.mxu1 %v4325_v45 }
  0x30   :  { %4222 = vmatprep.subr.bf16.mxu0 %v4328_v42  ;;  %v4693_v7 = vpack.c.bf16 %v962_v60, %v962_v60  ;;  %4106 = vmatprep.mubr.bf16.mxu1 %v1355_v40  ;;  %v3675_v27 = vunpack.c.h.bf16 %v3889_v23  ;;  %v478_v25 = vmax.f32 %v382_v10, 0.0  ;;  %v1008_v29 = vsel %vm552_vm0, %v6203_v12, 0.0  ;;  %v4327_v40 = vld [vmem:[%s6195_s3 + $0x18] sm:$0xff]  }
  0x31   :  { %v1165_v14 = vshrl.u32 %v4684_v63, 16  ;;  %v1167_v17 = vshll.u32 %v4684_v63, 16  ;;  %v131_v60 = vunpack.c.l.bf16 %v35_v41  ;;  %v4713_v4 = vpack.c.bf16 %v6205_v26, %v1008_v29  ;;  %v4332_v41 = vld [vmem:[%s6195_s3 + $0x88] sm:$0xff]   ;;  %v83_v29 = vld [vmem:[%s6196_s0 + $0xf8] sm:$0x1] }
  0x32   :  { %v1172_v28 = vshll.u32 %v4693_v7, 16  ;;  %v232_v47 = vmul.f32 %v3674_v57, %v4399_v9  ;;  %v233_v10 = vmul.f32 %v3675_v27, %v4399_v9  ;;  %v1010_v2 = vsel %vm557_vm1, %v478_v25, 0.0  ;;  %4141 = vmatpush3.bf16.msra.mxu1 %v4325_v45 }
  0x33   :  { %4223 = vmatpush3.bf16.msra.mxu0 %v4328_v42  ;;  %v1169_v23 = vrot.slane %v1167_v17, 1  ;;  %6347 = vst [vmem:[#allocation16_spill] sm:$0xff] %v4713_v4  ;;  %v234_v42 = vmul.f32 %v4399_v9, %v131_v60  ;;  %v3706_v17 = vunpack.c.l.bf16 %v3897_v59  ;;  %v4726_v57 = vpack.c.bf16 %v1010_v2, %v1010_v2  ;;  %4142 = vmatprep.subr.bf16.mxu1 %v4327_v40  ;;  %v4329_v2 = vld [vmem:[%s6195_s3 + $0x10] sm:$0xff]  }
  0x34   :  { %4224 = vmatprep.subr.bf16.mxu0 %v4330_v58  ;;  %v1174_v12 = vrot.slane %v1172_v28, 1  ;;  %v1357_v27 = vshrl.u32 %v4713_v4, 16  ;;  %v1359_v62 = vshll.u32 %v4713_v4, 16  ;;  %v4731_v28 = vadd.f32 %v4411_v15, %v232_v47  ;;  %v36_v47 = vld [vmem:[%s6196_s0 + $0x3c] sm:$0xff]  }
  0x35   :  { %v1170_v26 = vor.u32 %v1169_v23, %v1165_v14  ;;  %6348 = vst [vmem:[#allocation17_spill] sm:$0xff] %v4726_v57  ;;  %v4734_v25 = vadd.f32 %v4411_v15, %v233_v10  ;;  %v337_v60 = vadd.f32 %v4411_v15, %v234_v42  ;;  %v1364_v45 = vshll.u32 %v4726_v57, 16 }
  0x36   :  { %v1361_v23 = vrot.slane %v1359_v62, 1  ;;  %v179_v44 = vunpack.c.l.bf16 %v83_v29  ;;  %v6211_v59 = vmax.f32 %v4731_v28, 0.0  ;;  %v280_v43 = vmul.f32 %v3706_v17, %v4399_v9  ;;  %4143 = vmatpush3.bf16.msra.mxu1 %v4327_v40 }
  0x37   :  { %6349 = vst [vmem:[#allocation18_spill] sm:$0xff] %v4734_v25  ;;  %4225 = vmatpush3.bf16.msra.mxu0 %v4330_v58  ;;  %v1175_v14 = vsel %vm1127_vm2, %v1170_v26, %v1174_v12  ;;  %v6212_v10 = vmax.f32 %v4734_v25, 0.0  ;;  %v433_v42 = vmax.f32 %v337_v60, 0.0  ;;  %v1366_v24 = vrot.slane %v1364_v45, 1  ;;  %v38_v26 = vld [vmem:[%s6196_s0 + $0x44] sm:$0x1]  ;;  %4144 = vmatprep.subr.bf16.mxu1 %v4329_v2 }
  0x38   :  { %4226 = vmatprep.subr.bf16.mxu0 %v4332_v41  ;;  %4075 = vmatmul.mubr.bf16.gmra.mxu0 %v1175_v14  ;;  %v1362_v58 = vor.u32 %v1361_v23, %v1357_v27  ;;  %v281_v62 = vmul.f32 %v3707_v61, %v4399_v9  ;;  %v282_v12 = vmul.f32 %v4399_v9, %v179_v44  ;;  %v963_v29 = vsel %vm552_vm0, %v6211_v59, 0.0  ;;  %v4331_v44 = vld [vmem:[%s6195_s3 + $0x8] sm:$0xff]  }
  0x39   :  { %v965_v60 = vsel %vm557_vm1, %v433_v42, 0.0  ;;  %v4760_v17 = vadd.f32 %v4411_v15, %v280_v43  ;;  %v132_v27 = vunpack.c.l.bf16 %v36_v47  ;;  %v4768_v40 = vpack.c.bf16 %v6212_v10, %v963_v29 }
  0x3a   :  { %v1367_v61 = vsel %vm1127_vm2, %v1362_v58, %v1366_v24  ;;  %v4770_v14 = vpack.c.bf16 %v965_v60, %v965_v60  ;;  %v4773_v23 = vadd.f32 %v4411_v15, %v281_v62  ;;  %v385_v43 = vadd.f32 %v4411_v15, %v282_v12  ;;  %v84_v62 = vld [vmem:[%s6196_s0 + $0xfc] sm:$0xff]   ;;  %4145 = vmatpush3.bf16.msra.mxu1 %v4329_v2 }
  0x3b   :  { %6350 = vst [vmem:[#allocation19_spill] sm:$0xff] %v4760_v17  ;;  %4227 = vmatpush3.bf16.msra.mxu0 %v4332_v41  ;;  %4107 = vmatmul.mubr.bf16.gmra.mxu1 %v1367_v61  ;;  %v6215_v45 = vmax.f32 %v4760_v17, 0.0  ;;  %v133_v42 = vunpack.c.h.bf16 %v36_v47  ;;  %v134_v59 = vunpack.c.l.bf16 %v38_v26  ;;  %v1177_v41 = vshrl.u32 %v4768_v40, 16 }
  0x3c   :  { %6351 = vst [vmem:[#allocation20_spill] sm:$0xff] %v4773_v23  ;;  %v1179_v24 = vshll.u32 %v4768_v40, 16  ;;  %v1184_v58 = vshll.u32 %v4770_v14, 16  ;;  %v6216_v29 = vmax.f32 %v4773_v23, 0.0  ;;  %v481_v60 = vmax.f32 %v385_v43, 0.0  ;;  %4146 = vmatprep.subr.bf16.mxu1 %v4331_v44 }
  0x3d   :  { %v1011_v47 = vsel %vm552_vm0, %v6215_v45, 0.0  ;;  %v235_v12 = vmul.f32 %v4399_v9, %v132_v27  ;;  %v236_v26 = vmul.f32 %v4399_v9, %v133_v42  ;;  %v237_v22 = vmul.f32 %v4399_v9, %v134_v59  ;;  %v86_v27 = vld [vmem:[%s6196_s0 + $0x104] sm:$0x1] }
  0x3e   :  { %v1181_v61 = vrot.slane %v1179_v24, 1  ;;  %v1186_v10 = vrot.slane %v1184_v58, 1  ;;  %v4792_v1 = vpack.c.bf16 %v6216_v29, %v1011_v47  ;;  %v1013_v2 = vsel %vm557_vm1, %v481_v60, 0.0  ;;  %4147 = vmatpush3.bf16.msra.mxu1 %v4331_v44 }
  0x3f   :  { %v4798_v43 = vadd.f32 %v4411_v15, %v235_v12  ;;  %v4801_v45 = vadd.f32 %v4411_v15, %v236_v26  ;;  %v180_v42 = vunpack.c.l.bf16 %v84_v62  ;;  %v4806_v58 = vpack.c.bf16 %v1013_v2, %v1013_v2 }
  0x40   :  { %6352 = vst [vmem:[#allocation21_spill] sm:$0xff] %v4792_v1  ;;  %v1182_v24 = vor.u32 %v1181_v61, %v1177_v41  ;;  %v1369_v47 = vshrl.u32 %v4792_v1, 16  ;;  %v1371_v59 = vshll.u32 %v4792_v1, 16  ;;  %v340_v60 = vadd.f32 %v4411_v15, %v237_v22  ;;  %v3890_v61 = vld [vmem:[%s6196_s0 + $0x48] sm:$0xff]  }
  0x41   :  { %6353 = vst [vmem:[#allocation22_spill] sm:$0xff] %v4798_v43  ;;  %6354 = vst [vmem:[#allocation23_spill] sm:$0xff] %v4801_v45  ;;  %v6220_v12 = vmax.f32 %v4798_v43, 0.0  ;;  %v6221_v26 = vmax.f32 %v4801_v45, 0.0  ;;  %v181_v29 = vunpack.c.h.bf16 %v84_v62  ;;  %v1376_v38 = vshll.u32 %v4806_v58, 16 }
  0x42   :  { %6355 = vst [vmem:[#allocation24_spill] sm:$0xff] %v4806_v58  ;;  %v1187_v19 = vsel %vm1127_vm2, %v1182_v24, %v1186_v10  ;;  %v1373_v39 = vrot.slane %v1371_v59, 1  ;;  %v182_v41 = vunpack.c.l.bf16 %v86_v27  ;;  %v436_v2 = vmax.f32 %v340_v60, 0.0 }
  0x43   :  { %4078 = vmatprep.mubr.bf16.mxu0 %v1187_v19  ;;  %v966_v22 = vsel %vm552_vm0, %v6220_v12, 0.0  ;;  %v283_v44 = vmul.f32 %v4399_v9, %v180_v42  ;;  %v284_v62 = vmul.f32 %v4399_v9, %v181_v29  ;;  %v1378_v24 = vrot.slane %v1376_v38, 1  ;;  %v41_v38 = vld [vmem:[%s6196_s0 + $0x50] sm:$0x1] }
  0x44   :  { %v1374_v10 = vor.u32 %v1373_v39, %v1369_v47  ;;  %v4826_v27 = vpack.c.bf16 %v6221_v26, %v966_v22  ;;  %v285_v59 = vmul.f32 %v4399_v9, %v182_v41  ;;  %v968_v19 = vsel %vm557_vm1, %v436_v2, 0.0  ;;  %v3898_v2 = vld [vmem:[%s6196_s0 + $0x108] sm:$0xff]  }
  0x45   :  { %v4832_v60 = vadd.f32 %v4411_v15, %v283_v44  ;;  %v4835_v12 = vadd.f32 %v4411_v15, %v284_v62  ;;  %v3678_v42 = vunpack.c.l.bf16 %v3890_v61  ;;  %v4841_v29 = vpack.c.bf16 %v968_v19, %v968_v19 }
  0x46   :  { %v1379_v39 = vsel %vm1127_vm2, %v1374_v10, %v1378_v24  ;;  %v1189_v47 = vshrl.u32 %v4826_v27, 16  ;;  %v1191_v41 = vshll.u32 %v4826_v27, 16  ;;  %v388_v22 = vadd.f32 %v4411_v15, %v285_v59  ;;  %v4333_v10 = vld [vmem:[%s6195_s3] sm:$0xff]  }
  0x47   :  { %6356 = vst [vmem:[#allocation25_spill] sm:$0xff] %v4832_v60  ;;  %6357 = vst [vmem:[#allocation26_spill] sm:$0xff] %v4835_v12  ;;  %4110 = vmatprep.mubr.bf16.mxu1 %v1379_v39  ;;  %v6228_v44 = vmax.f32 %v4832_v60, 0.0  ;;  %v3679_v26 = vunpack.c.h.bf16 %v3890_v61  ;;  %v4334_v24 = vld [vmem:[%s6195_s3 + $0x80] sm:$0xff]   ;;  %v1196_v23 = vshll.u32 %v4841_v29, 16  ;;  %v137_v17 = vunpack.c.l.bf16 %v41_v38  ;;  %4148 = vmatprep.subr.bf16.mxu1 %v4333_v10 }
  0x48   :  { %v1193_v19 = vrot.slane %v1191_v41, 1  ;;  %v238_v39 = vmul.f32 %v3678_v42, %v4399_v9  ;;  %v484_v59 = vmax.f32 %v388_v22, 0.0  ;;  %v3710_v50 = vunpack.c.l.bf16 %v3898_v2  ;;  %4228 = vmatprep.subr.bf16.mxu0 %v4334_v24  ;;  %v89_v42 = vld [vmem:[%s6196_s0 + $0x110] sm:$0x1]  ;;  %4149 = vmatpush3.bf16.msra.mxu1 %v4333_v10  ;;  %v42_v10 = vld [vmem:[%s6196_s0 + $0x54] sm:$0xff]  }
  0x49   :  { %v1014_v61 = vsel %vm552_vm0, %v6228_v44, 0.0  ;;  %v239_v62 = vmul.f32 %v3679_v26, %v4399_v9  ;;  %v1198_v46 = vrot.slane %v1196_v23, 1  ;;  %v6358_v41 = vmax.f32 %v4835_v12, 0.0  ;;  %4229 = vmatpush3.bf16.msra.mxu0 %v4334_v24 }
  0x4a   :  { %v1194_v32 = vor.u32 %v1193_v19, %v1189_v47  ;;  %v240_v38 = vmul.f32 %v4399_v9, %v137_v17  ;;  %v1016_v26 = vsel %vm557_vm1, %v484_v59, 0.0  ;;  %v4875_v22 = vadd.f32 %v4411_v15, %v238_v39 }
  0x4b   :  { %v4866_v37 = vpack.c.bf16 %v6358_v41, %v1014_v61  ;;  %v4878_v23 = vadd.f32 %v4411_v15, %v239_v62  ;;  %v3711_v47 = vunpack.c.h.bf16 %v3898_v2  ;;  %v4881_v61 = vpack.c.bf16 %v1016_v26, %v1016_v26 }
  0x4c   :  { %6360 = vst [vmem:[#allocation28_spill] sm:$0xff] %v4875_v22  ;;  %v1199_v19 = vsel %vm1127_vm2, %v1194_v32, %v1198_v46  ;;  %v343_v24 = vadd.f32 %v4411_v15, %v240_v38  ;;  %v6233_v39 = vmax.f32 %v4875_v22, 0.0  ;;  %v185_v2 = vunpack.c.l.bf16 %v89_v42 }
  0x4d   :  { %6359 = vst [vmem:[#allocation27_spill] sm:$0xff] %v4866_v37  ;;  %6361 = vst [vmem:[#allocation29_spill] sm:$0xff] %v4878_v23  ;;  %v1381_v17 = vshrl.u32 %v4866_v37, 16  ;;  %v1383_v41 = vshll.u32 %v4866_v37, 16  ;;  %4079 = vmatmul.mubr.bf16.gmra.mxu0 %v1199_v19  ;;  %v6232_v62 = vmax.f32 %v4878_v23, 0.0  ;;  %v1388_v46 = vshll.u32 %v4881_v61, 16 }
  0x4e   :  { %6362 = vst [vmem:[#allocation30_spill] sm:$0xff] %v4881_v61  ;;  %v286_v32 = vmul.f32 %v3710_v50, %v4399_v9  ;;  %v287_v26 = vmul.f32 %v3711_v47, %v4399_v9  ;;  %v439_v44 = vmax.f32 %v343_v24, 0.0  ;;  %v969_v19 = vsel %vm552_vm0, %v6233_v39, 0.0  ;;  %v44_v50 = vld [vmem:[%s6196_s0 + $0x5c] sm:$0x1] }
  0x4f   :  { %v1385_v59 = vrot.slane %v1383_v41, 1  ;;  %v288_v38 = vmul.f32 %v4399_v9, %v185_v2  ;;  %v138_v12 = vunpack.c.l.bf16 %v42_v10  ;;  %v1390_v37 = vrot.slane %v1388_v46, 1 }
  0x50   :  { %v4901_v42 = vpack.c.bf16 %v6232_v62, %v969_v19  ;;  %v4904_v41 = vadd.f32 %v4411_v15, %v286_v32  ;;  %v971_v47 = vsel %vm557_vm1, %v439_v44, 0.0  ;;  %v4912_v24 = vadd.f32 %v4411_v15, %v287_v26  ;;  %v90_v62 = vld [vmem:[%s6196_s0 + $0x114] sm:$0xff]  }
  0x51   :  { %v1386_v60 = vor.u32 %v1385_v59, %v1381_v17  ;;  %v391_v17 = vadd.f32 %v4411_v15, %v288_v38  ;;  %v139_v2 = vunpack.c.h.bf16 %v42_v10  ;;  %v4916_v46 = vpack.c.bf16 %v971_v47, %v971_v47 }
  0x52   :  { %6363 = vst [vmem:[#allocation31_spill] sm:$0xff] %v4904_v41  ;;  %6364 = vst [vmem:[#allocation32_spill] sm:$0xff] %v4912_v24  ;;  %v1201_v32 = vshrl.u32 %v4901_v42, 16  ;;  %v1203_v19 = vshll.u32 %v4901_v42, 16  ;;  %v6237_v44 = vmax.f32 %v4904_v41, 0.0  ;;  %v140_v38 = vunpack.c.l.bf16 %v44_v50 }
  0x53   :  { %v1391_v59 = vsel %vm1127_vm2, %v1386_v60, %v1390_v37  ;;  %v487_v39 = vmax.f32 %v391_v17, 0.0  ;;  %v1208_v37 = vshll.u32 %v4916_v46, 16  ;;  %v241_v60 = vmul.f32 %v4399_v9, %v138_v12 }
  0x54   :  { %4111 = vmatmul.mubr.bf16.gmra.mxu1 %v1391_v59  ;;  %v1205_v10 = vrot.slane %v1203_v19, 1  ;;  %v242_v47 = vmul.f32 %v4399_v9, %v139_v2  ;;  %v1017_v61 = vsel %vm552_vm0, %v6237_v44, 0.0  ;;  %v243_v58 = vmul.f32 %v4399_v9, %v140_v38  ;;  %v92_v2 = vld [vmem:[%s6196_s0 + $0x11c] sm:$0x1] }
  0x55   :  { %v1019_v59 = vsel %vm557_vm1, %v487_v39, 0.0  ;;  %v186_v26 = vunpack.c.l.bf16 %v90_v62  ;;  %v1210_v50 = vrot.slane %v1208_v37, 1  ;;  %v6365_v19 = vmax.f32 %v4912_v24, 0.0 }
  0x56   :  { %v1206_v17 = vor.u32 %v1205_v10, %v1201_v32  ;;  %v4939_v12 = vpack.c.bf16 %v1019_v59, %v1019_v59  ;;  %v4945_v44 = vadd.f32 %v4411_v15, %v241_v60  ;;  %v4948_v39 = vadd.f32 %v4411_v15, %v242_v47 }
  0x57   :  { %v4937_v1 = vpack.c.bf16 %v6365_v19, %v1017_v61  ;;  %v346_v38 = vadd.f32 %v4411_v15, %v243_v58  ;;  %v187_v32 = vunpack.c.h.bf16 %v90_v62  ;;  %v3891_v19 = vld [vmem:[%s6196_s0 + $0x60] sm:$0xff]   ;;  %v188_v58 = vunpack.c.l.bf16 %v92_v2 }
  0x58   :  { %6367 = vst [vmem:[#allocation34_spill] sm:$0xff] %v4939_v12  ;;  %6368 = vst [vmem:[#allocation35_spill] sm:$0xff] %v4945_v44  ;;  %v1211_v10 = vsel %vm1127_vm2, %v1206_v17, %v1210_v50  ;;  %v1400_v59 = vshll.u32 %v4939_v12, 16  ;;  %v6243_v60 = vmax.f32 %v4945_v44, 0.0  ;;  %v289_v17 = vmul.f32 %v4399_v9, %v186_v26  ;;  %v47_v12 = vld [vmem:[%s6196_s0 + $0x68] sm:$0x1] }
  0x59   :  { %6366 = vst [vmem:[#allocation33_spill] sm:$0xff] %v4937_v1  ;;  %6369 = vst [vmem:[#allocation36_spill] sm:$0xff] %v4948_v39  ;;  %v1393_v61 = vshrl.u32 %v4937_v1, 16  ;;  %v1395_v37 = vshll.u32 %v4937_v1, 16  ;;  %4082 = vmatprep.mubr.bf16.mxu0 %v1211_v10  ;;  %v442_v24 = vmax.f32 %v346_v38, 0.0  ;;  %v290_v50 = vmul.f32 %v4399_v9, %v187_v32 }
  0x5a   :  { %v1402_v41 = vrot.slane %v1400_v59, 1  ;;  %v972_v10 = vsel %vm552_vm0, %v6243_v60, 0.0  ;;  %v291_v2 = vmul.f32 %v4399_v9, %v188_v58  ;;  %v3682_v38 = vunpack.c.l.bf16 %v3891_v19 }
  0x5b   :  { %v1397_v62 = vrot.slane %v1395_v37, 1  ;;  %v974_v47 = vsel %vm557_vm1, %v442_v24, 0.0  ;;  %v6370_v26 = vmax.f32 %v4948_v39, 0.0  ;;  %v4979_v1 = vadd.f32 %v4411_v15, %v289_v17 }
  0x5c   :  { %v4976_v32 = vpack.c.bf16 %v974_v47, %v974_v47  ;;  %v4982_v49 = vadd.f32 %v4411_v15, %v290_v50  ;;  %v394_v60 = vadd.f32 %v4411_v15, %v291_v2  ;;  %v3683_v48 = vunpack.c.h.bf16 %v3891_v19  ;;  %v3899_v47 = vld [vmem:[%s6196_s0 + $0x120] sm:$0xff]  }
  0x5d   :  { %v1398_v37 = vor.u32 %v1397_v62, %v1393_v61  ;;  %v4974_v59 = vpack.c.bf16 %v6370_v26, %v972_v10  ;;  %6373 = vst [vmem:[#allocation39_spill] sm:$0xff] %v4979_v1  ;;  %v143_v24 = vunpack.c.l.bf16 %v47_v12  ;;  %v6246_v17 = vmax.f32 %v4979_v1, 0.0  ;;  %v95_v26 = vld [vmem:[%s6196_s0 + $0x128] sm:$0x1] }
  0x5e   :  { %6372 = vst [vmem:[#allocation38_spill] sm:$0xff] %v4976_v32  ;;  %6374 = vst [vmem:[#allocation40_spill] sm:$0xff] %v4982_v49  ;;  %v1220_v62 = vshll.u32 %v4976_v32, 16  ;;  %v6251_v50 = vmax.f32 %v4982_v49, 0.0  ;;  %v490_v15 = vmax.f32 %v394_v60, 0.0  ;;  %v3715_v4 = vunpack.c.h.bf16 %v3899_v47 }
  0x5f   :  { %6371 = vst [vmem:[#allocation37_spill] sm:$0xff] %v4974_v59  ;;  %v1403_v9 = vsel %vm1127_vm2, %v1398_v37, %v1402_v41  ;;  %v1213_v61 = vshrl.u32 %v4974_v59, 16  ;;  %v1215_v58 = vshll.u32 %v4974_v59, 16  ;;  %v4997_v41 = vld [vmem:[%s6197_s1] ss:$0 sm:$0xff]  ;;  %v1020_v60 = vsel %vm552_vm0, %v6246_v17, 0.0 }
  0x60   :  { %4114 = vmatprep.mubr.bf16.mxu1 %v1403_v9  ;;  %v244_v12 = vmul.f32 %v4997_v41, %v3682_v38  ;;  %v1222_v10 = vrot.slane %v1220_v62, 1  ;;  %v245_v2 = vmul.f32 %v4997_v41, %v3683_v48  ;;  %v246_v37 = vmul.f32 %v4997_v41, %v143_v24  ;;  %v5014_v38 = vld [vmem:[%s6198_s2] ss:$0 sm:$0xff] }
  0x61   :  { %v1217_v19 = vrot.slane %v1215_v58, 1  ;;  %v1022_v9 = vsel %vm557_vm1, %v490_v15, 0.0  ;;  %v3714_v24 = vunpack.c.l.bf16 %v3899_v47  ;;  %v5021_v62 = vpack.c.bf16 %v6251_v50, %v1020_v60  ;;  %v48_v60 = vld [vmem:[%s6196_s0 + $0x6c] sm:$0xff]  }
  0x62   :  { %v5017_v48 = vadd.f32 %v5014_v38, %v244_v12  ;;  %v5023_v1 = vpack.c.bf16 %v1022_v9, %v1022_v9  ;;  %v5026_v17 = vadd.f32 %v5014_v38, %v245_v2  ;;  %v349_v15 = vadd.f32 %v5014_v38, %v246_v37 }
  0x63   :  { %v1218_v58 = vor.u32 %v1217_v19, %v1213_v61  ;;  %6376 = vst [vmem:[#allocation42_spill] sm:$0xff] %v5021_v62  ;;  %v191_v35 = vunpack.c.l.bf16 %v95_v26  ;;  %v1405_v34 = vshrl.u32 %v5021_v62, 16  ;;  %v1407_v61 = vshll.u32 %v5021_v62, 16 }
  0x64   :  { %6375 = vst [vmem:[#allocation41_spill] sm:$0xff] %v5017_v48  ;;  %6377 = vst [vmem:[#allocation43_spill] sm:$0xff] %v5023_v1  ;;  %v6254_v57 = vmax.f32 %v5017_v48, 0.0  ;;  %v1412_v19 = vshll.u32 %v5023_v1, 16  ;;  %v6256_v2 = vmax.f32 %v5026_v17, 0.0  ;;  %v445_v37 = vmax.f32 %v349_v15, 0.0 }
  0x65   :  { %6378 = vst [vmem:[#allocation44_spill] sm:$0xff] %v5026_v17  ;;  %v1223_v12 = vsel %vm1127_vm2, %v1218_v58, %v1222_v10  ;;  %v292_v10 = vmul.f32 %v4997_v41, %v3714_v24  ;;  %v1409_v26 = vrot.slane %v1407_v61, 1  ;;  %v293_v58 = vmul.f32 %v4997_v41, %v3715_v4 }
  0x66   :  { %4083 = vmatmul.mubr.bf16.gmra.mxu0 %v1223_v12  ;;  %v975_v47 = vsel %vm552_vm0, %v6254_v57, 0.0  ;;  %v1414_v9 = vrot.slane %v1412_v19, 1  ;;  %v294_v50 = vmul.f32 %v4997_v41, %v191_v35  ;;  %v977_v49 = vsel %vm557_vm1, %v445_v37, 0.0  ;;  %v50_v35 = vld [vmem:[%s6196_s0 + $0x74] sm:$0x1] }
  0x67   :  { %v5049_v12 = vpack.c.bf16 %v6256_v2, %v975_v47  ;;  %v5052_v15 = vadd.f32 %v5014_v38, %v292_v10  ;;  %v144_v1 = vunpack.c.l.bf16 %v48_v60  ;;  %v1410_v57 = vor.u32 %v1409_v26, %v1405_v34 }
  0x68   :  { %v5054_v62 = vpack.c.bf16 %v977_v49, %v977_v49  ;;  %v5057_v24 = vadd.f32 %v5014_v38, %v293_v58  ;;  %v397_v4 = vadd.f32 %v5014_v38, %v294_v50  ;;  %v145_v47 = vunpack.c.h.bf16 %v48_v60  ;;  %v96_v60 = vld [vmem:[%s6196_s0 + $0x12c] sm:$0xff]  }
  0x69   :  { %6379 = vst [vmem:[#allocation45_spill] sm:$0xff] %v5049_v12  ;;  %6380 = vst [vmem:[#allocation46_spill] sm:$0xff] %v5052_v15  ;;  %v1225_v61 = vshrl.u32 %v5049_v12, 16  ;;  %v1227_v19 = vshll.u32 %v5049_v12, 16  ;;  %v6259_v37 = vmax.f32 %v5052_v15, 0.0  ;;  %v1415_v34 = vsel %vm1127_vm2, %v1410_v57, %v1414_v9 }
  0x6a   :  { %6381 = vst [vmem:[#allocation47_spill] sm:$0xff] %v5054_v62  ;;  %6382 = vst [vmem:[#allocation48_spill] sm:$0xff] %v5057_v24  ;;  %v1232_v49 = vshll.u32 %v5054_v62, 16  ;;  %v6260_v10 = vmax.f32 %v5057_v24, 0.0  ;;  %v493_v26 = vmax.f32 %v397_v4, 0.0  ;;  %4115 = vmatmul.mubr.bf16.gmra.mxu1 %v1415_v34  ;;  %v146_v2 = vunpack.c.l.bf16 %v50_v35 }
  0x6b   :  { %v1229_v50 = vrot.slane %v1227_v19, 1  ;;  %v1023_v58 = vsel %vm552_vm0, %v6259_v37, 0.0  ;;  %v247_v53 = vmul.f32 %v4997_v41, %v144_v1  ;;  %v248_v19 = vmul.f32 %v4997_v41, %v145_v47 }
  0x6c   :  { %v1234_v57 = vrot.slane %v1232_v49, 1  ;;  %v1025_v9 = vsel %vm557_vm1, %v493_v26, 0.0  ;;  %v5081_v4 = vpack.c.bf16 %v6260_v10, %v1023_v58  ;;  %v249_v35 = vmul.f32 %v4997_v41, %v146_v2  ;;  %v98_v49 = vld [vmem:[%s6196_s0 + $0x134] sm:$0x1] }
  0x6d   :  { %v1230_v34 = vor.u32 %v1229_v50, %v1225_v61  ;;  %v5084_v15 = vpack.c.bf16 %v1025_v9, %v1025_v9  ;;  %v5088_v1 = vadd.f32 %v5014_v38, %v247_v53  ;;  %v5096_v58 = vadd.f32 %v5014_v38, %v248_v19  ;;  %v3892_v19 = vld [vmem:[%s6196_s0 + $0x78] sm:$0xff]  }
  0x6e   :  { %6383 = vst [vmem:[#allocation49_spill] sm:$0xff] %v5081_v4  ;;  %v1417_v26 = vshrl.u32 %v5081_v4, 16  ;;  %v1419_v37 = vshll.u32 %v5081_v4, 16  ;;  %v192_v47 = vunpack.c.l.bf16 %v96_v60  ;;  %v352_v2 = vadd.f32 %v5014_v38, %v249_v35 }
  0x6f   :  { %6384 = vst [vmem:[#allocation50_spill] sm:$0xff] %v5084_v15  ;;  %6385 = vst [vmem:[#allocation51_spill] sm:$0xff] %v5088_v1  ;;  %v1235_v61 = vsel %vm1127_vm2, %v1230_v34, %v1234_v57  ;;  %v1424_v50 = vshll.u32 %v5084_v15, 16  ;;  %v6266_v53 = vmax.f32 %v5088_v1, 0.0  ;;  %v6265_v10 = vmax.f32 %v5096_v58, 0.0 }
  0x70   :  { %6386 = vst [vmem:[#allocation52_spill] sm:$0xff] %v5096_v58  ;;  %4086 = vmatprep.mubr.bf16.mxu0 %v1235_v61  ;;  %v1421_v9 = vrot.slane %v1419_v37, 1  ;;  %v193_v24 = vunpack.c.h.bf16 %v96_v60  ;;  %v194_v13 = vunpack.c.l.bf16 %v98_v49  ;;  %v448_v20 = vmax.f32 %v352_v2, 0.0  ;;  %v53_v61 = vld [vmem:[%s6196_s0 + $0x80] sm:$0x1] }
  0x71   :  { %v1426_v4 = vrot.slane %v1424_v50, 1  ;;  %v978_v57 = vsel %vm552_vm0, %v6266_v53, 0.0  ;;  %v295_v34 = vmul.f32 %v4997_v41, %v192_v47  ;;  %v3686_v47 = vunpack.c.l.bf16 %v3892_v19 }
  0x72   :  { %v1422_v35 = vor.u32 %v1421_v9, %v1417_v26  ;;  %v5113_v37 = vpack.c.bf16 %v6265_v10, %v978_v57  ;;  %v296_v60 = vmul.f32 %v4997_v41, %v193_v24  ;;  %v297_v49 = vmul.f32 %v4997_v41, %v194_v13 }
  0x73   :  { %v980_v50 = vsel %vm557_vm1, %v448_v20, 0.0  ;;  %v5123_v2 = vadd.f32 %v5014_v38, %v295_v34  ;;  %v3687_v26 = vunpack.c.h.bf16 %v3892_v19  ;;  %v149_v34 = vunpack.c.l.bf16 %v53_v61 }
  0x74   :  { %6387 = vst [vmem:[#allocation53_spill] sm:$0xff] %v5113_v37  ;;  %v1427_v9 = vsel %vm1127_vm2, %v1422_v35, %v1426_v4  ;;  %v5126_v57 = vpack.c.bf16 %v980_v50, %v980_v50  ;;  %v1237_v24 = vshrl.u32 %v5113_v37, 16  ;;  %v1239_v13 = vshll.u32 %v5113_v37, 16  ;;  %v3900_v50 = vld [vmem:[%s6196_s0 + $0x138] sm:$0xff]  }
  0x75   :  { %6388 = vst [vmem:[#allocation54_spill] sm:$0xff] %v5123_v2  ;;  %4118 = vmatprep.mubr.bf16.mxu1 %v1427_v9  ;;  %v5131_v10 = vadd.f32 %v5014_v38, %v296_v60  ;;  %v400_v53 = vadd.f32 %v5014_v38, %v297_v49  ;;  %v6271_v20 = vmax.f32 %v5123_v2, 0.0  ;;  %v250_v4 = vmul.f32 %v4997_v41, %v3686_v47 }
  0x76   :  { %6389 = vst [vmem:[#allocation55_spill] sm:$0xff] %v5126_v57  ;;  %v1241_v15 = vrot.slane %v1239_v13, 1  ;;  %v1244_v19 = vshll.u32 %v5126_v57, 16  ;;  %v251_v35 = vmul.f32 %v4997_v41, %v3687_v26  ;;  %v252_v61 = vmul.f32 %v4997_v41, %v149_v34 }
  0x77   :  { %6390 = vst [vmem:[#allocation56_spill] sm:$0xff] %v5131_v10  ;;  %v6272_v9 = vmax.f32 %v5131_v10, 0.0  ;;  %v496_v60 = vmax.f32 %v400_v53, 0.0  ;;  %v1026_v49 = vsel %vm552_vm0, %v6271_v20, 0.0  ;;  %v5148_v47 = vadd.f32 %v5014_v38, %v250_v4 }
  0x78   :  { %v1242_v13 = vor.u32 %v1241_v15, %v1237_v24  ;;  %v1246_v16 = vrot.slane %v1244_v19, 1  ;;  %v5151_v26 = vadd.f32 %v5014_v38, %v251_v35  ;;  %v355_v2 = vadd.f32 %v5014_v38, %v252_v61  ;;  %v101_v15 = vld [vmem:[%s6196_s0 + $0x140] sm:$0x1] }
  0x79   :  { %6391 = vst [vmem:[#allocation57_spill] sm:$0xff] %v5148_v47  ;;  %v1028_v56 = vsel %vm557_vm1, %v496_v60, 0.0  ;;  %v5157_v53 = vpack.c.bf16 %v6272_v9, %v1026_v49  ;;  %v3718_v20 = vunpack.c.l.bf16 %v3900_v50  ;;  %v6278_v19 = vmax.f32 %v5148_v47, 0.0 }
  0x7a   :  { %6392 = vst [vmem:[#allocation58_spill] sm:$0xff] %v5151_v26  ;;  %v1247_v24 = vsel %vm1127_vm2, %v1242_v13, %v1246_v16  ;;  %v5164_v34 = vpack.c.bf16 %v1028_v56, %v1028_v56  ;;  %v6277_v4 = vmax.f32 %v5151_v26, 0.0  ;;  %v451_v49 = vmax.f32 %v355_v2, 0.0 }
  0x7b   :  { %6393 = vst [vmem:[#allocation59_spill] sm:$0xff] %v5157_v53  ;;  %4087 = vmatmul.mubr.bf16.gmra.mxu0 %v1247_v24  ;;  %v1429_v35 = vshrl.u32 %v5157_v53, 16  ;;  %v1431_v60 = vshll.u32 %v5157_v53, 16  ;;  %v3719_v61 = vunpack.c.h.bf16 %v3900_v50  ;;  %v981_v16 = vsel %vm552_vm0, %v6278_v19, 0.0  ;;  %v54_v50 = vld [vmem:[%s6196_s0 + $0x84] sm:$0xff]  }
  0x7c   :  { %6394 = vst [vmem:[#allocation60_spill] sm:$0xff] %v5164_v34  ;;  %v1436_v9 = vshll.u32 %v5164_v34, 16  ;;  %v197_v56 = vunpack.c.l.bf16 %v101_v15  ;;  %v298_v13 = vmul.f32 %v4997_v41, %v3718_v20  ;;  %v983_v24 = vsel %vm557_vm1, %v451_v49, 0.0 }
  0x7d   :  { %v1433_v10 = vrot.slane %v1431_v60, 1  ;;  %v5180_v55 = vpack.c.bf16 %v6277_v4, %v981_v16  ;;  %v299_v2 = vmul.f32 %v4997_v41, %v3719_v61  ;;  %v5186_v53 = vpack.c.bf16 %v983_v24, %v983_v24  ;;  %v56_v61 = vld [vmem:[%s6196_s0 + $0x8c] sm:$0x1] }
  0x7e   :  { %v1438_v34 = vrot.slane %v1436_v9, 1  ;;  %v300_v15 = vmul.f32 %v4997_v41, %v197_v56  ;;  %v5190_v20 = vadd.f32 %v5014_v38, %v298_v13  ;;  %v150_v13 = vunpack.c.l.bf16 %v54_v50 }
  0x7f   :  { %6395 = vst [vmem:[#allocation61_spill] sm:$0xff] %v5180_v55  ;;  %6396 = vst [vmem:[#allocation62_spill] sm:$0xff] %v5186_v53  ;;  %v1434_v60 = vor.u32 %v1433_v10, %v1429_v35  ;;  %v1249_v49 = vshrl.u32 %v5180_v55, 16  ;;  %v1251_v16 = vshll.u32 %v5180_v55, 16  ;;  %v5195_v4 = vadd.f32 %v5014_v38, %v299_v2  ;;  %v102_v2 = vld [vmem:[%s6196_s0 + $0x144] sm:$0xff]  }
  0x80   :  { %6397 = vst [vmem:[#allocation63_spill] sm:$0xff] %v5190_v20  ;;  %v1256_v9 = vshll.u32 %v5186_v53, 16  ;;  %v403_v24 = vadd.f32 %v5014_v38, %v300_v15  ;;  %v6285_v56 = vmax.f32 %v5190_v20, 0.0  ;;  %v151_v26 = vunpack.c.h.bf16 %v54_v50 }
  0x81   :  { %6398 = vst [vmem:[#allocation64_spill] sm:$0xff] %v5195_v4  ;;  %v1439_v10 = vsel %vm1127_vm2, %v1434_v60, %v1438_v34  ;;  %v1253_v35 = vrot.slane %v1251_v16, 1  ;;  %v6284_v19 = vmax.f32 %v5195_v4, 0.0  ;;  %v152_v1 = vunpack.c.l.bf16 %v56_v61  ;;  %v104_v16 = vld [vmem:[%s6196_s0 + $0x14c] sm:$0x1] }
  0x82   :  { %4119 = vmatmul.mubr.bf16.gmra.mxu1 %v1439_v10  ;;  %v1258_v47 = vrot.slane %v1256_v9, 1  ;;  %v499_v58 = vmax.f32 %v403_v24, 0.0  ;;  %v1029_v15 = vsel %vm552_vm0, %v6285_v56, 0.0  ;;  %v253_v50 = vmul.f32 %v4997_v41, %v150_v13 }
  0x83   :  { %v1254_v17 = vor.u32 %v1253_v35, %v1249_v49  ;;  %v5214_v34 = vpack.c.bf16 %v6284_v19, %v1029_v15  ;;  %v254_v60 = vmul.f32 %v4997_v41, %v151_v26  ;;  %v255_v24 = vmul.f32 %v4997_v41, %v152_v1 }
  0x84   :  { %v1031_v9 = vsel %vm557_vm1, %v499_v58, 0.0  ;;  %v198_v10 = vunpack.c.l.bf16 %v102_v2  ;;  %v199_v61 = vunpack.c.h.bf16 %v102_v2  ;;  %v5230_v26 = vadd.f32 %v5014_v38, %v253_v50 }
  0x85   :  { %6399 = vst [vmem:[#allocation65_spill] sm:$0xff] %v5214_v34  ;;  %v1259_v49 = vsel %vm1127_vm2, %v1254_v17, %v1258_v47  ;;  %v5225_v35 = vpack.c.bf16 %v1031_v9, %v1031_v9  ;;  %v1441_v15 = vshrl.u32 %v5214_v34, 16  ;;  %v1443_v13 = vshll.u32 %v5214_v34, 16  ;;  %v3893_v9 = vld [vmem:[%s6196_s0 + $0x90] sm:$0xff]  }
  0x86   :  { %4090 = vmatprep.mubr.bf16.mxu0 %v1259_v49  ;;  %v5233_v19 = vadd.f32 %v5014_v38, %v254_v60  ;;  %v358_v58 = vadd.f32 %v5014_v38, %v255_v24  ;;  %v200_v1 = vunpack.c.l.bf16 %v104_v16  ;;  %v301_v17 = vmul.f32 %v4997_v41, %v198_v10 }
  0x87   :  { %6400 = vst [vmem:[#allocation66_spill] sm:$0xff] %v5225_v35  ;;  %v1445_v56 = vrot.slane %v1443_v13, 1  ;;  %v1448_v2 = vshll.u32 %v5225_v35, 16  ;;  %v302_v47 = vmul.f32 %v4997_v41, %v199_v61  ;;  %v6289_v50 = vmax.f32 %v5230_v26, 0.0  ;;  %v59_v61 = vld [vmem:[%s6196_s0 + $0x98] sm:$0x1] }
  0x88   :  { %v454_v60 = vmax.f32 %v358_v58, 0.0  ;;  %v303_v4 = vmul.f32 %v4997_v41, %v200_v1  ;;  %v5246_v13 = vadd.f32 %v5014_v38, %v301_v17  ;;  %v3691_v34 = vunpack.c.h.bf16 %v3893_v9 }
  0x89   :  { %v1446_v24 = vor.u32 %v1445_v56, %v1441_v15  ;;  %v1450_v16 = vrot.slane %v1448_v2, 1  ;;  %v5249_v10 = vadd.f32 %v5014_v38, %v302_v47  ;;  %v984_v49 = vsel %vm552_vm0, %v6289_v50, 0.0 }
  0x8a   :  { %6401 = vst [vmem:[#allocation67_spill] sm:$0xff] %v5246_v13  ;;  %v986_v58 = vsel %vm557_vm1, %v454_v60, 0.0  ;;  %v406_v56 = vadd.f32 %v5014_v38, %v303_v4  ;;  %v3690_v15 = vunpack.c.l.bf16 %v3893_v9  ;;  %v6403_v2 = vmax.f32 %v5233_v19, 0.0 }
  0x8b   :  { %6402 = vst [vmem:[#allocation68_spill] sm:$0xff] %v5249_v10  ;;  %v1451_v1 = vsel %vm1127_vm2, %v1446_v24, %v1450_v16  ;;  %v5266_v47 = vpack.c.bf16 %v986_v58, %v986_v58  ;;  %v6293_v20 = vmax.f32 %v5246_v13, 0.0  ;;  %v6295_v35 = vmax.f32 %v5249_v10, 0.0 }
  0x8c   :  { %v5264_v17 = vpack.c.bf16 %v6403_v2, %v984_v49  ;;  %4122 = vmatprep.mubr.bf16.mxu1 %v1451_v1  ;;  %v502_v50 = vmax.f32 %v406_v56, 0.0  ;;  %v155_v48 = vunpack.c.l.bf16 %v59_v61  ;;  %v256_v9 = vmul.f32 %v4997_v41, %v3690_v15  ;;  %v3901_v56 = vld [vmem:[%s6196_s0 + $0x150] sm:$0xff]  }
  0x8d   :  { %v1268_v24 = vshll.u32 %v5266_v47, 16  ;;  %v1032_v49 = vsel %vm552_vm0, %v6293_v20, 0.0  ;;  %v257_v61 = vmul.f32 %v4997_v41, %v3691_v34  ;;  %v107_v34 = vld [vmem:[%s6196_s0 + $0x158] sm:$0x1]  ;;  %v2309_v3 = vrot.slane %v4684_v63, 1 }
  0x8e   :  { %v1261_v60 = vshrl.u32 %v5264_v17, 16  ;;  %v1263_v4 = vshll.u32 %v5264_v17, 16  ;;  %v1034_v16 = vsel %vm557_vm1, %v502_v50, 0.0  ;;  %v5281_v58 = vpack.c.bf16 %v6295_v35, %v1032_v49 }
  0x8f   :  { %v1270_v2 = vrot.slane %v1268_v24, 1  ;;  %v5288_v13 = vpack.c.bf16 %v1034_v16, %v1034_v16  ;;  %v258_v20 = vmul.f32 %v4997_v41, %v155_v48  ;;  %v5294_v49 = vadd.f32 %v5014_v38, %v256_v9 }
  0x90   :  { %6404 = vst [vmem:[#allocation69_spill] sm:$0xff] %v5281_v58  ;;  %v1265_v1 = vrot.slane %v1263_v4, 1  ;;  %v1453_v50 = vshrl.u32 %v5281_v58, 16  ;;  %v1455_v10 = vshll.u32 %v5281_v58, 16  ;;  %v5297_v15 = vadd.f32 %v5014_v38, %v257_v61  ;;  %v60_v61 = vld [vmem:[%s6196_s0 + $0x9c] sm:$0xff]  }
  0x91   :  { %6405 = vst [vmem:[#allocation70_spill] sm:$0xff] %v5288_v13  ;;  %v1460_v24 = vshll.u32 %v5288_v13, 16  ;;  %v361_v16 = vadd.f32 %v5014_v38, %v258_v20  ;;  %v3722_v48 = vunpack.c.l.bf16 %v3901_v56  ;;  %v6302_v53 = vmax.f32 %v5294_v49, 0.0 }
  0x92   :  { %v1266_v4 = vor.u32 %v1265_v1, %v1261_v60  ;;  %v1457_v35 = vrot.slane %v1455_v10, 1  ;;  %v3723_v9 = vunpack.c.h.bf16 %v3901_v56  ;;  %v203_v60 = vunpack.c.l.bf16 %v107_v34 }
  0x93   :  { %v1462_v39 = vrot.slane %v1460_v24, 1  ;;  %v457_v44 = vmax.f32 %v361_v16, 0.0  ;;  %v987_v20 = vsel %vm552_vm0, %v6302_v53, 0.0  ;;  %v304_v10 = vmul.f32 %v4997_v41, %v3722_v48 }
  0x94   :  { %v1271_v55 = vsel %vm1127_vm2, %v1266_v4, %v1270_v2  ;;  %v1458_v1 = vor.u32 %v1457_v35, %v1453_v50  ;;  %v305_v56 = vmul.f32 %v4997_v41, %v3723_v9  ;;  %v6406_v13 = vmax.f32 %v5297_v15, 0.0 }
  0x95   :  { %4091 = vmatmul.mubr.bf16.gmra.mxu0 %v1271_v55  ;;  %v989_v58 = vsel %vm557_vm1, %v457_v44, 0.0  ;;  %v306_v34 = vmul.f32 %v4997_v41, %v203_v60  ;;  %v62_v55 = vld [vmem:[%s6196_s0 + $0xa4] sm:$0x1]  ;;  %v156_v35 = vunpack.c.l.bf16 %v60_v61  ;;  %v5330_v24 = vadd.f32 %v5014_v38, %v304_v10 }
  0x96   :  { %v5320_v2 = vpack.c.bf16 %v6406_v13, %v987_v20  ;;  %v1463_v50 = vsel %vm1127_vm2, %v1458_v1, %v1462_v39  ;;  %v5327_v4 = vpack.c.bf16 %v989_v58, %v989_v58  ;;  %v5333_v44 = vadd.f32 %v5014_v38, %v305_v56  ;;  %v108_v39 = vld [vmem:[%s6196_s0 + $0x15c] sm:$0xff]  }
  0x97   :  { %6407 = vst [vmem:[#allocation71_spill] sm:$0xff] %v5330_v24  ;;  %4123 = vmatmul.mubr.bf16.gmra.mxu1 %v1463_v50  ;;  %v409_v48 = vadd.f32 %v5014_v38, %v306_v34  ;;  %v157_v9 = vunpack.c.h.bf16 %v60_v61  ;;  %v6306_v60 = vmax.f32 %v5330_v24, 0.0  ;;  %v158_v20 = vunpack.c.l.bf16 %v62_v55 }
  0x98   :  { %6408 = vst [vmem:[#allocation72_spill] sm:$0xff] %v5333_v44  ;;  %v1273_v13 = vshrl.u32 %v5320_v2, 16  ;;  %v1275_v16 = vshll.u32 %v5320_v2, 16  ;;  %v1280_v58 = vshll.u32 %v5327_v4, 16  ;;  %v259_v50 = vmul.f32 %v4997_v41, %v156_v35 }
  0x99   :  { %v505_v56 = vmax.f32 %v409_v48, 0.0  ;;  %v260_v53 = vmul.f32 %v4997_v41, %v157_v9  ;;  %v1035_v61 = vsel %vm552_vm0, %v6306_v60, 0.0  ;;  %v261_v34 = vmul.f32 %v4997_v41, %v158_v20  ;;  %v110_v48 = vld [vmem:[%s6196_s0 + $0x164] sm:$0x1] }
  0x9a   :  { %v1277_v10 = vrot.slane %v1275_v16, 1  ;;  %v1282_v57 = vrot.slane %v1280_v58, 1  ;;  %v204_v37 = vunpack.c.l.bf16 %v108_v39  ;;  %v6409_v55 = vmax.f32 %v5333_v44, 0.0 }
  0x9b   :  { %v1037_v1 = vsel %vm557_vm1, %v505_v56, 0.0  ;;  %v5358_v35 = vadd.f32 %v5014_v38, %v259_v50  ;;  %v5366_v58 = vadd.f32 %v5014_v38, %v260_v53  ;;  %v205_v20 = vunpack.c.h.bf16 %v108_v39 }
  0x9c   :  { %v1278_v23 = vor.u32 %v1277_v10, %v1273_v13  ;;  %v5355_v16 = vpack.c.bf16 %v6409_v55, %v1035_v61  ;;  %v5363_v9 = vpack.c.bf16 %v1037_v1, %v1037_v1  ;;  %v364_v13 = vadd.f32 %v5014_v38, %v261_v34  ;;  %v3894_v34 = vld [vmem:[%s6196_s0 + $0xa8] sm:$0xff]  }
  0x9d   :  { %v6309_v50 = vmax.f32 %v5358_v35, 0.0  ;;  %v206_v22 = vunpack.c.l.bf16 %v110_v48  ;;  %v6412_v48 = vmax.f32 %v5366_v58, 0.0  ;;  %v3695_v44 = vunpack.c.h.bf16 %v3894_v34 }
  0x9e   :  { %6410 = vst [vmem:[#allocation73_spill] sm:$0xff] %v5355_v16  ;;  %6411 = vst [vmem:[#allocation74_spill] sm:$0xff] %v5363_v9  ;;  %v1283_v10 = vsel %vm1127_vm2, %v1278_v23, %v1282_v57  ;;  %v1465_v56 = vshrl.u32 %v5355_v16, 16  ;;  %v1467_v61 = vshll.u32 %v5355_v16, 16  ;;  %v1472_v55 = vshll.u32 %v5363_v9, 16 }
  0x9f   :  { %4094 = vmatprep.mubr.bf16.mxu0 %v1283_v10  ;;  %v460_v60 = vmax.f32 %v364_v13, 0.0  ;;  %v990_v39 = vsel %vm552_vm0, %v6309_v50, 0.0  ;;  %v307_v23 = vmul.f32 %v4997_v41, %v204_v37  ;;  %v308_v57 = vmul.f32 %v4997_v41, %v205_v20 }
  0xa0   :  { %v1469_v53 = vrot.slane %v1467_v61, 1  ;;  %v1474_v10 = vrot.slane %v1472_v55, 1  ;;  %v5388_v13 = vpack.c.bf16 %v6412_v48, %v990_v39  ;;  %v309_v61 = vmul.f32 %v4997_v41, %v206_v22  ;;  %v65_v55 = vld [vmem:[%s6196_s0 + $0xb0] sm:$0x1] }
  0xa1   :  { %v992_v1 = vsel %vm557_vm1, %v460_v60, 0.0  ;;  %v5394_v37 = vadd.f32 %v5014_v38, %v307_v23  ;;  %v5397_v20 = vadd.f32 %v5014_v38, %v308_v57  ;;  %v3694_v22 = vunpack.c.l.bf16 %v3894_v34 }
  0xa2   :  { %v1470_v9 = vor.u32 %v1469_v53, %v1465_v56  ;;  %v5391_v50 = vpack.c.bf16 %v992_v1, %v992_v1  ;;  %v1285_v60 = vshrl.u32 %v5388_v13, 16  ;;  %v1287_v39 = vshll.u32 %v5388_v13, 16  ;;  %v3902_v56 = vld [vmem:[%s6196_s0 + $0x168] sm:$0xff]  }
  0xa3   :  { %6413 = vst [vmem:[#allocation75_spill] sm:$0xff] %v5394_v37  ;;  %6414 = vst [vmem:[#allocation76_spill] sm:$0xff] %v5397_v20  ;;  %v412_v48 = vadd.f32 %v5014_v38, %v309_v61  ;;  %v6318_v23 = vmax.f32 %v5394_v37, 0.0  ;;  %v6317_v57 = vmax.f32 %v5397_v20, 0.0  ;;  %v161_v24 = vunpack.c.l.bf16 %v65_v55  ;;  %v113_v55 = vld [vmem:[%s6196_s0 + $0x170] sm:$0x1] }
  0xa4   :  { %v1475_v1 = vsel %vm1127_vm2, %v1470_v9, %v1474_v10  ;;  %v1292_v53 = vshll.u32 %v5391_v50, 16  ;;  %v1289_v62 = vrot.slane %v1287_v39, 1  ;;  %v262_v32 = vmul.f32 %v4997_v41, %v3694_v22 }
  0xa5   :  { %4126 = vmatprep.mubr.bf16.mxu1 %v1475_v1  ;;  %v508_v16 = vmax.f32 %v412_v48, 0.0  ;;  %v1038_v61 = vsel %vm552_vm0, %v6318_v23, 0.0  ;;  %v3726_v9 = vunpack.c.l.bf16 %v3902_v56  ;;  %v263_v34 = vmul.f32 %v4997_v41, %v3695_v44 }
  0xa6   :  { %v1294_v12 = vrot.slane %v1292_v53, 1  ;;  %v1290_v10 = vor.u32 %v1289_v62, %v1285_v60  ;;  %v5421_v1 = vpack.c.bf16 %v6317_v57, %v1038_v61  ;;  %v264_v48 = vmul.f32 %v4997_v41, %v161_v24 }
  0xa7   :  { %v1040_v59 = vsel %vm557_vm1, %v508_v16, 0.0  ;;  %v5431_v22 = vadd.f32 %v5014_v38, %v262_v32  ;;  %v3727_v62 = vunpack.c.h.bf16 %v3902_v56  ;;  %v5437_v44 = vadd.f32 %v5014_v38, %v263_v34  ;;  %v66_v34 = vld [vmem:[%s6196_s0 + $0xb4] sm:$0xff]  }
  0xa8   :  { %6415 = vst [vmem:[#allocation77_spill] sm:$0xff] %v5421_v1  ;;  %v5427_v39 = vpack.c.bf16 %v1040_v59, %v1040_v59  ;;  %v1295_v16 = vsel %vm1127_vm2, %v1290_v10, %v1294_v12  ;;  %v1477_v60 = vshrl.u32 %v5421_v1, 16  ;;  %v1479_v53 = vshll.u32 %v5421_v1, 16 }
  0xa9   :  { %4095 = vmatmul.mubr.bf16.gmra.mxu0 %v1295_v16  ;;  %v367_v59 = vadd.f32 %v5014_v38, %v264_v48  ;;  %v6321_v24 = vmax.f32 %v5431_v22, 0.0  ;;  %v209_v57 = vunpack.c.l.bf16 %v113_v55  ;;  %v6320_v56 = vmax.f32 %v5437_v44, 0.0 }
  0xaa   :  { %6416 = vst [vmem:[#allocation78_spill] sm:$0xff] %v5427_v39  ;;  %v1484_v61 = vshll.u32 %v5427_v39, 16  ;;  %v1481_v32 = vrot.slane %v1479_v53, 1  ;;  %v310_v12 = vmul.f32 %v4997_v41, %v3726_v9  ;;  %v311_v10 = vmul.f32 %v4997_v41, %v3727_v62 }
  0xab   :  { %v463_v16 = vmax.f32 %v367_v59, 0.0  ;;  %v993_v48 = vsel %vm552_vm0, %v6321_v24, 0.0  ;;  %v312_v55 = vmul.f32 %v4997_v41, %v209_v57  ;;  %v114_v24 = vld [vmem:[%s6196_s0 + $0x174] sm:$0xff]  }
  0xac   :  { %v1486_v23 = vrot.slane %v1484_v61, 1  ;;  %v1482_v53 = vor.u32 %v1481_v32, %v1477_v60  ;;  %v5455_v39 = vpack.c.bf16 %v6320_v56, %v993_v48  ;;  %v5458_v9 = vadd.f32 %v5014_v38, %v310_v12  ;;  %v68_v61 = vld [vmem:[%s6196_s0 + $0xbc] sm:$0x1] }
  0xad   :  { %v5461_v62 = vadd.f32 %v5014_v38, %v311_v10  ;;  %v995_v59 = vsel %vm557_vm1, %v463_v16, 0.0  ;;  %v415_v57 = vadd.f32 %v5014_v38, %v312_v55  ;;  %v162_v60 = vunpack.c.l.bf16 %v66_v34 }
  0xae   :  { %6417 = vst [vmem:[#allocation79_spill] sm:$0xff] %v5458_v9  ;;  %v163_v32 = vunpack.c.h.bf16 %v66_v34  ;;  %v1487_v48 = vsel %vm1127_vm2, %v1482_v53, %v1486_v23  ;;  %v5470_v56 = vpack.c.bf16 %v995_v59, %v995_v59  ;;  %v1297_v12 = vshrl.u32 %v5455_v39, 16 }
  0xaf   :  { %6418 = vst [vmem:[#allocation80_spill] sm:$0xff] %v5461_v62  ;;  %v1299_v10 = vshll.u32 %v5455_v39, 16  ;;  %4127 = vmatmul.mubr.bf16.gmra.mxu1 %v1487_v48  ;;  %v6327_v1 = vmax.f32 %v5458_v9, 0.0  ;;  %v511_v55 = vmax.f32 %v415_v57, 0.0  ;;  %v164_v20 = vunpack.c.l.bf16 %v68_v61 }
  0xb0   :  { %v1304_v23 = vshll.u32 %v5470_v56, 16  ;;  %v265_v53 = vmul.f32 %v4997_v41, %v162_v60  ;;  %v266_v59 = vmul.f32 %v4997_v41, %v163_v32  ;;  %v210_v16 = vunpack.c.l.bf16 %v114_v24  ;;  %v116_v32 = vld [vmem:[%s6196_s0 + $0x17c] sm:$0x1] }
  0xb1   :  { %v1301_v34 = vrot.slane %v1299_v10, 1  ;;  %v1041_v37 = vsel %vm552_vm0, %v6327_v1, 0.0  ;;  %v1043_v48 = vsel %vm557_vm1, %v511_v55, 0.0  ;;  %v267_v45 = vmul.f32 %v4997_v41, %v164_v20 }
  0xb2   :  { %v1306_v61 = vrot.slane %v1304_v23, 1  ;;  %v6419_v10 = vmax.f32 %v5461_v62, 0.0  ;;  %v5493_v60 = vpack.c.bf16 %v1043_v48, %v1043_v48  ;;  %v5499_v1 = vadd.f32 %v5014_v38, %v265_v53 }
  0xb3   :  { %v1302_v57 = vor.u32 %v1301_v34, %v1297_v12  ;;  %v5502_v55 = vadd.f32 %v5014_v38, %v266_v59  ;;  %v370_v20 = vadd.f32 %v5014_v38, %v267_v45  ;;  %v211_v12 = vunpack.c.h.bf16 %v114_v24 }
  0xb4   :  { %v5491_v43 = vpack.c.bf16 %v6419_v10, %v1041_v37  ;;  %6420 = vst [vmem:[#allocation81_spill] sm:$0xff] %v5493_v60  ;;  %v1496_v48 = vshll.u32 %v5493_v60, 16  ;;  %v464_v10 = vmax.f32 %v5499_v1, 0.0  ;;  %v212_v9 = vunpack.c.l.bf16 %v116_v32 }
  0xb5   :  { %v1307_v34 = vsel %vm1127_vm2, %v1302_v57, %v1306_v61  ;;  %v465_v53 = vmax.f32 %v5502_v55, 0.0  ;;  %v466_v62 = vmax.f32 %v370_v20, 0.0  ;;  %v313_v45 = vmul.f32 %v4997_v41, %v210_v16 }
  0xb6   :  { %v1489_v37 = vshrl.u32 %v5491_v43, 16  ;;  %v1491_v23 = vshll.u32 %v5491_v43, 16  ;;  %4098 = vmatprep.mubr.bf16.mxu0 %v1307_v34  ;;  %v1498_v25 = vrot.slane %v1496_v48, 1  ;;  %v314_v24 = vmul.f32 %v4997_v41, %v211_v12 }
  0xb7   :  { %v996_v57 = vsel %vm552_vm0, %v464_v10, 0.0  ;;  %v998_v61 = vsel %vm557_vm1, %v466_v62, 0.0  ;;  %v315_v34 = vmul.f32 %v4997_v41, %v212_v9  ;;  %v5527_v16 = vadd.f32 %v5014_v38, %v313_v45 }
  0xb8   :  { %v1493_v59 = vrot.slane %v1491_v23, 1  ;;  %v5522_v32 = vpack.c.bf16 %v465_v53, %v996_v57  ;;  %v5524_v20 = vpack.c.bf16 %v998_v61, %v998_v61  ;;  %v5530_v12 = vadd.f32 %v5014_v38, %v314_v24 }
  0xb9   :  { %v418_v23 = vadd.f32 %v5014_v38, %v315_v34  ;;  %v2300_v57 = vrot.slane %v4463_v51, 1  ;;  %v2301_v38 = vrot.slane %v4465_v52, 1 }
  0xba   :  { %v1494_v60 = vor.u32 %v1493_v59, %v1489_v37  ;;  %v1309_v62 = vshrl.u32 %v5522_v32, 16  ;;  %v1311_v41 = vshll.u32 %v5522_v32, 16  ;;  %v1316_v9 = vshll.u32 %v5524_v20, 16 }
  0xbb   :  { %v6332_v37 = vmax.f32 %v5527_v16, 0.0  ;;  %v513_v59 = vmax.f32 %v5530_v12, 0.0  ;;  %v514_v45 = vmax.f32 %v418_v23, 0.0  ;;  %v2302_v51 = vsel %vm2299_vm3, %v2300_v57, %v2301_v38 }
  0xbc   :  { %v1499_v48 = vsel %vm1127_vm2, %v1494_v60, %v1498_v25  ;;  %v1313_v24 = vrot.slane %v1311_v41, 1  ;;  %v1318_v61 = vrot.slane %v1316_v9, 1  ;;  %v2307_v57 = vrot.slane %v4605_v54, 1 }
  0xbd   :  { %4130 = vmatprep.mubr.bf16.mxu1 %v1499_v48  ;;  %v1044_v25 = vsel %vm552_vm0, %v6332_v37, 0.0  ;;  %v1046_v60 = vsel %vm557_vm1, %v514_v45, 0.0 }
  0xbe   :  { %v1314_v34 = vor.u32 %v1313_v24, %v1309_v62  ;;  %v5549_v48 = vpack.c.bf16 %v513_v59, %v1044_v25  ;;  %v5551_v23 = vpack.c.bf16 %v1046_v60, %v1046_v60  ;;  %v2303_v62 = vrot.slane %v4504_v18, 1 }
  0xbf   :  { %v2304_v24 = vrot.slane %v4509_v21, 1  ;;  %v2306_v25 = vrot.slane %v4588_v33, 1  ;;  %v6422_v60 = vmax.f32 %v4433_v31, 0.0  ;;  %v6426_v31 = vmax.f32 %v4558_v8, 0.0 }
  0xc0   :  { %v1319_v41 = vsel %vm1127_vm2, %v1314_v34, %v1318_v61  ;;  %v1501_v52 = vshrl.u32 %v5549_v48, 16  ;;  %v1503_v9 = vshll.u32 %v5549_v48, 16  ;;  %v1508_v37 = vshll.u32 %v5551_v23, 16 }
  0xc1   :  { %4099 = vmatmul.mubr.bf16.gmra.mxu0 %v1319_v41  ;;  %v6421_v61 = vmax.f32 %v4430_v30, 0.0  ;;  %v2305_v21 = vsel %vm2299_vm3, %v2303_v62, %v2304_v24  ;;  %v2308_v33 = vsel %vm2299_vm3, %v2306_v25, %v2307_v57  ;;  %v6425_v30 = vmax.f32 %v4550_v6, 0.0 }
  0xc2   :  { %v1505_v5 = vrot.slane %v1503_v9, 1  ;;  %v1510_v45 = vrot.slane %v1508_v37, 1  ;;  %4230 = vmatprep.mubr.bf16.mxu0 %v2302_v51  ;;  %v2310_v51 = vrot.slane %v4693_v7, 1  ;;  %v6427_v41 = vmax.f32 %v5230_v26, 0.0 }
  0xc3   :  { %v3417_v34 = vpack.c.bf16 %v6422_v60, %v6421_v61  ;;  %v3423_v54 = vpack.c.bf16 %v6426_v31, %v6425_v30  ;;  %v2334_v6 = vrot.slane %v5266_v47, 1  ;;  %v6429_v8 = vmax.f32 %v5294_v49, 0.0  ;;  %v6438_v60 = vld [vmem:[#allocation18_spill] sm:$0xff] }
  0xc4   :  { %v1506_v38 = vor.u32 %v1505_v5, %v1501_v52  ;;  %v6428_v52 = vmax.f32 %v5233_v19, 0.0  ;;  %v2333_v5 = vrot.slane %v5264_v17, 1  ;;  %v6430_v62 = vmax.f32 %v5297_v15, 0.0  ;;  %v6445_v30 = vld [vmem:[#allocation38_spill] sm:$0xff] }
  0xc5   :  { %v2336_v7 = vrot.slane %v5320_v2, 1  ;;  %v2313_v26 = vrot.slane %v4770_v14, 1  ;;  %v2337_v19 = vrot.slane %v5327_v4, 1  ;;  %v6431_v24 = vmax.f32 %v5358_v35, 0.0 }
  0xc6   :  { %v1511_v18 = vsel %vm1127_vm2, %v1506_v38, %v1510_v45  ;;  %v5587_v9 = vpack.c.bf16 %v6428_v52, %v6427_v41  ;;  %v2312_v45 = vrot.slane %v4768_v40, 1  ;;  %v5596_v63 = vpack.c.bf16 %v6430_v62, %v6429_v8  ;;  %v6449_v52 = vld [vmem:[#allocation72_spill] sm:$0xff]  ;;  %v6452_v62 = vld [vmem:[#allocation47_spill] sm:$0xff] }
  0xc7   :  { %4131 = vmatmul.mubr.bf16.gmra.mxu1 %v1511_v18  ;;  %v6432_v17 = vmax.f32 %v5366_v58, 0.0  ;;  %v2339_v40 = vrot.slane %v5388_v13, 1  ;;  %v5609_v47 = vsel %vm2299_vm3, %v2333_v5, %v2334_v6  ;;  %v2340_v49 = vrot.slane %v5391_v50, 1  ;;  %v6451_v6 = vld [vmem:[#allocation73_spill] sm:$0xff] }
  0xc8   :  { %4150 = vmatprep.mubr.msk.bf16.mxu1 %vm5568_vm5, %v3417_v34  ;;  %v6433_v15 = vmax.f32 %v5431_v22, 0.0  ;;  %v6434_v2 = vmax.f32 %v5437_v44, 0.0  ;;  %v2342_v4 = vrot.slane %v5455_v39, 1  ;;  %v5620_v35 = vsel %vm2299_vm3, %v2336_v7, %v2337_v19 }
  0xc9   :  { %4231 = vmatmul.mubr.bf16.vlgmr.msra.gmra.mxu0 %v2305_v21  ;;  %v5605_v25 = vpack.c.bf16 %v6432_v17, %v6431_v24  ;;  %v2343_v58 = vrot.slane %v5470_v56, 1  ;;  %v5627_v13 = vpack.c.bf16 %v465_v53, %v464_v10  ;;  %v2345_v50 = vrot.slane %v5522_v32, 1  ;;  %v6454_v24 = vld [vmem:[#allocation75_spill] sm:$0xff] }
  0xca   :  { %4234 = vmatprep.mubr.bf16.mxu0 %v2308_v33  ;;  %v5616_v14 = vpack.c.bf16 %v6434_v2, %v6433_v15  ;;  %v2311_v22 = vsel %vm2299_vm3, %v2309_v3, %v2310_v51  ;;  %v5632_v44 = vsel %vm2299_vm3, %v2339_v40, %v2340_v49  ;;  %v2346_v39 = vrot.slane %v5524_v20, 1  ;;  %v6447_v51 = vld [vmem:[#allocation71_spill] sm:$0xff]  ;;  %v6456_v40 = vld [vmem:[#allocation76_spill] sm:$0xff]  ;;  %v6458_v2 = vld [vmem:[#allocation77_spill] sm:$0xff] }
  0xcb   :  { %v2314_v56 = vsel %vm2299_vm3, %v2312_v45, %v2313_v26  ;;  %v5640_v1 = vsel %vm2299_vm3, %v2342_v4, %v2343_v58  ;;  %v2315_v10 = vrot.slane %v4826_v27, 1  ;;  %v2316_v53 = vrot.slane %v4841_v29, 1  ;;  %v6442_v29 = vld [vmem:[#allocation23_spill] sm:$0xff]  ;;  %v6453_v26 = vld [vmem:[#allocation74_spill] sm:$0xff]  ;;  %v6459_v58 = vld [vmem:[#allocation28_spill] sm:$0xff] }
  0xcc   :  { %v5645_v55 = vsel %vm2299_vm3, %v2345_v50, %v2346_v39  ;;  %v6435_v32 = vmax.f32 %v4638_v36, 0.0  ;;  %v2318_v57 = vrot.slane %v4901_v42, 1  ;;  %v2319_v38 = vrot.slane %v4916_v46, 1  ;;  %v6440_v36 = vld [vmem:[#allocation22_spill] sm:$0xff] }
  0xcd   :  { %v6437_v61 = vmax.f32 %v4731_v28, 0.0  ;;  %v6439_v34 = vmax.f32 %v6438_v60, 0.0  ;;  %v2317_v21 = vsel %vm2299_vm3, %v2315_v10, %v2316_v53  ;;  %v6443_v42 = vmax.f32 %v6442_v29, 0.0  ;;  %v6444_v28 = vld [vmem:[#allocation37_spill] sm:$0xff]  ;;  %v6463_v10 = vld [vmem:[#allocation78_spill] sm:$0xff] }
  0xce   :  { %v2320_v27 = vsel %vm2299_vm3, %v2318_v57, %v2319_v38  ;;  %v2321_v33 = vrot.slane %v6444_v28, 1  ;;  %v2322_v31 = vrot.slane %v6445_v30, 1  ;;  %v6448_v41 = vmax.f32 %v6447_v51, 0.0  ;;  %v6471_v28 = vld [vmem:[#allocation55_spill] sm:$0xff] }
  0xcf   :  { %4151 = vmatmul.mubr.msk.bf16.vlgmr.msra.gmra.mxu1 %vm5568_vm5, %v4494_v11  ;;  %v6436_v11 = vmax.f32 %v4655_v0, 0.0  ;;  %v3429_v18 = vpack.c.bf16 %v6439_v34, %v6437_v61  ;;  %v6441_v0 = vmax.f32 %v6440_v36, 0.0  ;;  %v6450_v5 = vmax.f32 %v6449_v52, 0.0  ;;  %v6468_v34 = vld [vmem:[#allocation81_spill] sm:$0xff] }
  0xd0   :  { %4154 = vmatprep.mubr.msk.bf16.mxu1 %vm5568_vm5, %v3423_v54  ;;  %v6446_v54 = vld [vmem:[#allocation45_spill] sm:$0xff]  ;;  %v2384_v8 = vrot.slane %v6451_v6, 1  ;;  %v2325_v7 = vrot.slane %v6452_v62, 1  ;;  %v2385_v19 = vrot.slane %v6453_v26, 1  ;;  %v6455_v17 = vmax.f32 %v6454_v24, 0.0  ;;  %v6482_v24 = vld [vmem:[#allocation51_spill] sm:$0xff] }
  0xd1   :  { %4235 = vmatmul.mubr.bf16.gmra.mxu0 %v2311_v22  ;;  %v3426_v20 = vpack.c.bf16 %v6436_v11, %v6435_v32  ;;  %v3432_v46 = vpack.c.bf16 %v6443_v42, %v6441_v0  ;;  %v2324_v3 = vrot.slane %v6446_v54, 1  ;;  %v5676_v45 = vpack.c.bf16 %v6450_v5, %v6448_v41  ;;  %v6461_v22 = vld [vmem:[#allocation29_spill] sm:$0xff]  ;;  %v6464_v32 = vld [vmem:[#allocation79_spill] sm:$0xff]  ;;  %v6477_v41 = vld [vmem:[#allocation62_spill] sm:$0xff] }
  0xd2   :  { %4238 = vmatprep.mubr.bf16.mxu0 %v2314_v56  ;;  %v6457_v49 = vmax.f32 %v6456_v40, 0.0  ;;  %v2387_v4 = vrot.slane %v6458_v2, 1  ;;  %v6460_v50 = vmax.f32 %v6459_v58, 0.0  ;;  %v6462_v39 = vmax.f32 %v6461_v22, 0.0  ;;  %v6478_v5 = vld [vmem:[#allocation41_spill] sm:$0xff]  ;;  %v6484_v40 = vld [vmem:[#allocation52_spill] sm:$0xff] }
  0xd3   :  { %v2388_v53 = vrot.slane %v6463_v10, 1  ;;  %v6465_v11 = vmax.f32 %v6464_v32, 0.0  ;;  %v2390_v61 = vrot.slane %v5491_v43, 1  ;;  %v5701_v60 = vsel %vm2299_vm3, %v2384_v8, %v2385_v19  ;;  %v6480_v8 = vld [vmem:[#allocation44_spill] sm:$0xff] }
  0xd4   :  { %v5685_v15 = vpack.c.bf16 %v6457_v49, %v6455_v17  ;;  %v3435_v56 = vpack.c.bf16 %v6462_v39, %v6460_v50  ;;  %v2393_v36 = vrot.slane %v5549_v48, 1  ;;  %v2323_v0 = vsel %vm2299_vm3, %v2321_v33, %v2322_v31  ;;  %v6472_v33 = vld [vmem:[#allocation35_spill] sm:$0xff]  ;;  %v6488_v50 = vld [vmem:[#allocation58_spill] sm:$0xff] }
  0xd5   :  { %v5713_v29 = vsel %vm2299_vm3, %v2387_v4, %v2388_v53  ;;  %v2394_v43 = vrot.slane %v5551_v23, 1  ;;  %v2326_v42 = vsel %vm2299_vm3, %v2324_v3, %v2325_v7  ;;  %v2328_v23 = vrot.slane %v6471_v28, 1  ;;  %v6476_v3 = vld [vmem:[#allocation61_spill] sm:$0xff]  ;;  %v6504_v28 = vld [vmem:[#allocation7_spill] sm:$0xff] }
  0xd6   :  { %v6473_v30 = vmax.f32 %v6472_v33, 0.0  ;;  %v2330_v51 = vrot.slane %v6476_v3, 1  ;;  %v2331_v52 = vrot.slane %v6477_v41, 1  ;;  %v6479_v6 = vmax.f32 %v6478_v5, 0.0  ;;  %v6486_v4 = vld [vmem:[#allocation57_spill] sm:$0xff] }
  0xd7   :  { %4155 = vmatmul.mubr.msk.bf16.gmra.mxu1 %vm5568_vm5, %v3426_v20  ;;  %v6466_v20 = vld [vmem:[#allocation80_spill] sm:$0xff]  ;;  %v5725_v12 = vsel %vm2299_vm3, %v2393_v36, %v2394_v43  ;;  %v6481_v62 = vmax.f32 %v6480_v8, 0.0  ;;  %v6483_v17 = vmax.f32 %v6482_v24, 0.0  ;;  %v6485_v49 = vmax.f32 %v6484_v40, 0.0  ;;  %v6491_v53 = vld [vmem:[#allocation5_spill] sm:$0xff]  ;;  %v6514_v24 = vld [vmem:[#allocation14_spill] sm:$0xff] }
  0xd8   :  { %4158 = vmatprep.mubr.msk.bf16.mxu1 %vm5568_vm5, %v3429_v18  ;;  %v6467_v57 = vmax.f32 %v6466_v20, 0.0  ;;  %v2391_v18 = vrot.slane %v6468_v34, 1  ;;  %v2332_v19 = vsel %vm2299_vm3, %v2330_v51, %v2331_v52  ;;  %v6487_v58 = vmax.f32 %v6486_v4, 0.0  ;;  %v6495_v20 = vld [vmem:[#allocation13_spill] sm:$0xff]  ;;  %v6510_v51 = vld [vmem:[#allocation11_spill] sm:$0xff] }
  0xd9   :  { %4239 = vmatmul.mubr.bf16.gmra.mxu0 %v2317_v21  ;;  %v6469_v21 = vmax.f32 %v5527_v16, 0.0  ;;  %v3441_v7 = vpack.c.bf16 %v6481_v62, %v6479_v6  ;;  %v3444_v2 = vpack.c.bf16 %v6485_v49, %v6483_v17  ;;  %v6489_v22 = vmax.f32 %v6488_v50, 0.0  ;;  %v6501_v43 = vld [vmem:[#allocation17_spill] sm:$0xff]  ;;  %v6512_v62 = vld [vmem:[#allocation27_spill] sm:$0xff]  ;;  %v6519_v50 = vld [vmem:[#allocation34_spill] sm:$0xff] }
  0xda   :  { %4242 = vmatprep.mubr.bf16.mxu0 %v2320_v27  ;;  %v5697_v38 = vpack.c.bf16 %v6467_v57, %v6465_v11  ;;  %v5720_v16 = vsel %vm2299_vm3, %v2390_v61, %v2391_v18  ;;  %v2349_v32 = vrot.slane %v6491_v53, 1  ;;  %v2355_v57 = vrot.slane %v6495_v20, 1  ;;  %v6496_v61 = vld [vmem:[#allocation2_spill] sm:$0xff]  ;;  %v6516_v40 = vld [vmem:[#allocation15_spill] sm:$0xff]  ;;  %v6518_v4 = vld [vmem:[#allocation33_spill] sm:$0xff] }
  0xdb   :  { %v5708_v27 = vpack.c.bf16 %v513_v59, %v6469_v21  ;;  %v6470_v59 = vld [vmem:[#allocation53_spill] sm:$0xff]  ;;  %v3447_v39 = vpack.c.bf16 %v6489_v22, %v6487_v58  ;;  %v6497_v34 = vmax.f32 %v6496_v61, 0.0  ;;  %v6511_v41 = vmax.f32 %v6510_v51, 0.0  ;;  %v6525_v20 = vld [vmem:[#allocation43_spill] sm:$0xff]  ;;  %v6537_v51 = vld [vmem:[#allocation60_spill] sm:$0xff] }
  0xdc   :  { %v2327_v48 = vrot.slane %v6470_v59, 1  ;;  %v6502_v59 = vld [vmem:[#allocation6_spill] sm:$0xff]  ;;  %v6515_v17 = vmax.f32 %v6514_v24, 0.0  ;;  %v6517_v49 = vmax.f32 %v6516_v40, 0.0  ;;  %v2366_v58 = vrot.slane %v6518_v4, 1  ;;  %v6526_v61 = vld [vmem:[#allocation25_spill] sm:$0xff] }
  0xdd   :  { %v2367_v22 = vrot.slane %v6519_v50, 1  ;;  %v6543_v24 = vld [vmem:[#allocation66_spill] sm:$0xff]  ;;  %v6546_v4 = vld [vmem:[#allocation48_spill] sm:$0xff] }
  0xde   :  { %v2329_v26 = vsel %vm2299_vm3, %v2327_v48, %v2328_v23  ;;  %v6503_v48 = vmax.f32 %v6502_v59, 0.0  ;;  %v6505_v23 = vmax.f32 %v6504_v28, 0.0 }
  0xdf   :  { %4159 = vmatmul.mubr.msk.bf16.gmra.mxu1 %vm5568_vm5, %v3432_v46  ;;  %v6474_v46 = vld [vmem:[#allocation36_spill] sm:$0xff] }
  0xe0   :  { %4162 = vmatprep.mubr.msk.bf16.mxu1 %vm5568_vm5, %v3435_v56  ;;  %v6475_v31 = vmax.f32 %v6474_v46, 0.0  ;;  %v6490_v56 = vld [vmem:[#allocation4_spill] sm:$0xff]  ;;  %v3468_v33 = vpack.c.bf16 %v6505_v23, %v6503_v48 }
  0xe1   :  { %4243 = vmatmul.mubr.bf16.gmra.mxu0 %v2323_v0  ;;  %v2348_v10 = vrot.slane %v6490_v56, 1  ;;  %v6534_v48 = vld [vmem:[#allocation32_spill] sm:$0xff] }
  0xe2   :  { %4246 = vmatprep.mubr.bf16.mxu0 %v2326_v42  ;;  %v3438_v54 = vpack.c.bf16 %v6475_v31, %v6473_v30  ;;  %v2358_v42 = vrot.slane %v6501_v43, 1  ;;  %v6506_v30 = vld [vmem:[#allocation21_spill] sm:$0xff]  ;;  %v6507_v31 = vld [vmem:[#allocation24_spill] sm:$0xff]  ;;  %v5810_v8 = vpop.f32.mrf.mxu0  ;;  %v6535_v28 = vmax.f32 %v6534_v48, 0.0 }
  0xe3   :  { %v2360_v46 = vrot.slane %v6506_v30, 1 }
  0xe7   :  { %4163 = vmatmul.mubr.msk.bf16.gmra.mxu1 %vm5568_vm5, %v3438_v54  ;;  %v6508_v54 = vld [vmem:[#allocation10_spill] sm:$0xff] }
  0xe8   :  { %4166 = vmatprep.mubr.msk.bf16.mxu1 %vm5568_vm5, %v3441_v7  ;;  %v6509_v3 = vmax.f32 %v6508_v54, 0.0  ;;  %v2363_v7 = vrot.slane %v6512_v62, 1  ;;  %v6536_v54 = vld [vmem:[#allocation59_spill] sm:$0xff] }
  0xe9   :  { %4247 = vmatmul.mubr.bf16.gmra.mxu0 %v2329_v26  ;;  %v6513_v26 = vld [vmem:[#allocation30_spill] sm:$0xff] }
  0xea   :  { %4250 = vmatprep.mubr.bf16.mxu0 %v2332_v19  ;;  %v3471_v52 = vpack.c.bf16 %v6511_v41, %v6509_v3  ;;  %v2364_v19 = vrot.slane %v6513_v26, 1  ;;  %v2375_v3 = vrot.slane %v6536_v54, 1  ;;  %v2376_v41 = vrot.slane %v6537_v51, 1  ;;  %v6542_v26 = vld [vmem:[#allocation65_spill] sm:$0xff] }
  0xef   :  { %4167 = vmatmul.mubr.msk.bf16.gmra.mxu1 %vm5568_vm5, %v3444_v2  ;;  %v3474_v2 = vpack.c.bf16 %v6517_v49, %v6515_v17  ;;  %v2379_v17 = vrot.slane %v6543_v24, 1  ;;  %v6544_v49 = vld [vmem:[#allocation46_spill] sm:$0xff] }
  0xf0   :  { %4170 = vmatprep.mubr.msk.bf16.mxu1 %vm5568_vm5, %v3447_v39  ;;  %v6520_v39 = vld [vmem:[#allocation19_spill] sm:$0xff] }
  0xf1   :  { %4251 = vmatmul.mubr.bf16.gmra.mxu0 %v5609_v47  ;;  %v2350_v47 = vsel %vm2299_vm3, %v2348_v10, %v2349_v32  ;;  %v6521_v56 = vmax.f32 %v6520_v39, 0.0  ;;  %v6522_v10 = vld [vmem:[#allocation20_spill] sm:$0xff]  ;;  %v2377_v39 = vsel %vm2299_vm3, %v2375_v3, %v2376_v41 }
  0xf2   :  { %4254 = vmatprep.mubr.bf16.mxu0 %v5620_v35  ;;  %v6493_v35 = vld [vmem:[#allocation9_spill] sm:$0xff]  ;;  %v6523_v53 = vmax.f32 %v6522_v10, 0.0 }
  0xf4   :  { %v3477_v32 = vpack.c.bf16 %v6523_v53, %v6521_v56 }
  0xf7   :  { %4171 = vmatmul.mubr.msk.bf16.gmra.mxu1 %vm5568_vm5, %v5587_v9  ;;  %v6492_v9 = vld [vmem:[#allocation8_spill] sm:$0xff] }
  0xf8   :  { %4174 = vmatprep.mubr.msk.bf16.mxu1 %vm5568_vm5, %v5596_v63  ;;  %v2351_v63 = vrot.slane %v6492_v9, 1  ;;  %v2365_v9 = vsel %vm2299_vm3, %v2363_v7, %v2364_v19  ;;  %v2378_v19 = vrot.slane %v6542_v26, 1 }
  0xf9   :  { %4255 = vmatmul.mubr.bf16.gmra.mxu0 %v5632_v44  ;;  %v2352_v44 = vrot.slane %v6493_v35, 1  ;;  %v5830_v35 = vpop.f32.mrf.mxu1 }
  0xfa   :  { %4258 = vmatprep.mubr.bf16.mxu0 %v5640_v1  ;;  %v6494_v1 = vld [vmem:[#allocation12_spill] sm:$0xff]  ;;  %v2380_v56 = vsel %vm2299_vm3, %v2378_v19, %v2379_v17 }
  0xfb   :  { %v2354_v11 = vrot.slane %v6494_v1, 1  ;;  %v2353_v36 = vsel %vm2299_vm3, %v2351_v63, %v2352_v44  ;;  %v2368_v63 = vsel %vm2299_vm3, %v2366_v58, %v2367_v22  ;;  %v6524_v1 = vld [vmem:[#allocation42_spill] sm:$0xff]  ;;  %v5844_v43 = vpop.f32.mrf.mxu1  ;;  %v6547_v58 = vmax.f32 %v6546_v4, 0.0 }
  0xff   :  { %4175 = vmatmul.mubr.msk.bf16.gmra.mxu1 %vm5568_vm5, %v5605_v25  ;;  %v6498_v25 = vld [vmem:[#allocation3_spill] sm:$0xff] }
 0x100   :  { %4178 = vmatprep.mubr.msk.bf16.mxu1 %vm5568_vm5, %v5616_v14  ;;  %v6499_v18 = vmax.f32 %v6498_v25, 0.0  ;;  %v2356_v14 = vsel %vm2299_vm3, %v2354_v11, %v2355_v57  ;;  %v2369_v11 = vrot.slane %v6524_v1, 1  ;;  %v2370_v57 = vrot.slane %v6525_v20, 1  ;;  %v6528_v25 = vld [vmem:[#allocation26_spill] sm:$0xff] }
 0x101   :  { %4259 = vmatmul.mubr.bf16.gmra.mxu0 %v5645_v55  ;;  %v6500_v55 = vld [vmem:[#allocation16_spill] sm:$0xff] }
 0x102   :  { %4262 = vmatprep.mubr.bf16.mxu0 %v2350_v47  ;;  %v3465_v21 = vpack.c.bf16 %v6499_v18, %v6497_v34  ;;  %v2357_v0 = vrot.slane %v6500_v55, 1  ;;  %v5824_v47 = vpop.f32.mrf.mxu0  ;;  %v6527_v34 = vmax.f32 %v6526_v61, 0.0  ;;  %v6529_v18 = vmax.f32 %v6528_v25, 0.0  ;;  %v6531_v55 = vld [vmem:[#allocation50_spill] sm:$0xff] }
 0x103   :  { %v2371_v30 = vsel %vm2299_vm3, %v2369_v11, %v2370_v57  ;;  %v6550_v11 = vld [vmem:[#allocation54_spill] sm:$0xff]  ;;  %v6552_v57 = vld [vmem:[#allocation56_spill] sm:$0xff] }
 0x104   :  { %v2359_v5 = vsel %vm2299_vm3, %v2357_v0, %v2358_v42  ;;  %v5834_v44 = vpop.f32.mrf.mxu0  ;;  %v2373_v0 = vrot.slane %v6531_v55, 1  ;;  %v6532_v42 = vld [vmem:[#allocation31_spill] sm:$0xff]  ;;  %v6551_v20 = vmax.f32 %v6550_v11, 0.0  ;;  %v6553_v61 = vmax.f32 %v6552_v57, 0.0 }
 0x105   :  { %v6533_v59 = vmax.f32 %v6532_v42, 0.0 }
 0x107   :  { %4179 = vmatmul.mubr.msk.bf16.gmra.mxu1 %vm5568_vm5, %v5627_v13  ;;  %v2361_v13 = vrot.slane %v6507_v31, 1  ;;  %v3483_v23 = vpack.c.bf16 %v6535_v28, %v6533_v59  ;;  %v5856_v31 = vpop.f32.mrf.mxu1  ;;  %v6560_v28 = vld [vmem:[#allocation67_spill] sm:$0xff] }
 0x108   :  { %4182 = vmatprep.mubr.msk.bf16.mxu1 %vm5568_vm5, %v3465_v21  ;;  %v3480_v21 = vpack.c.bf16 %v6529_v18, %v6527_v34  ;;  %v3492_v34 = vpack.c.bf16 %v6553_v61, %v6551_v20  ;;  %v6555_v18 = vld [vmem:[#allocation63_spill] sm:$0xff] }
 0x109   :  { %4263 = vmatmul.mubr.bf16.gmra.mxu0 %v2353_v36  ;;  %v2362_v6 = vsel %vm2299_vm3, %v2360_v46, %v2361_v13  ;;  %v6530_v36 = vld [vmem:[#allocation49_spill] sm:$0xff]  ;;  %v5870_v40 = vpop.f32.mrf.mxu1 }
 0x10a   :  { %4266 = vmatprep.mubr.bf16.mxu0 %v2356_v14  ;;  %v2372_v14 = vrot.slane %v6530_v36, 1  ;;  %v6557_v36 = vld [vmem:[#allocation64_spill] sm:$0xff] }
 0x10b   :  { %v5882_v10 = vpop.f32.mrf.mxu1 }
 0x10c   :  { %v2374_v46 = vsel %vm2299_vm3, %v2372_v14, %v2373_v0  ;;  %v6558_v14 = vmax.f32 %v6557_v36, 0.0 }
 0x10d   :  { %v5894_v25 = vpop.f32.mrf.mxu1 }
 0x10e   :  { %6554 = vst [vmem:[#allocation18_spill] sm:$0xff] %v5894_v25 }
 0x10f   :  { %4183 = vmatmul.mubr.msk.bf16.gmra.mxu1 %vm5568_vm5, %v3468_v33  ;;  %v5850_v33 = vpop.f32.mrf.mxu0  ;;  %v5905_v59 = vpop.f32.mrf.mxu1 }
 0x110   :  { %4186 = vmatprep.mubr.msk.bf16.mxu1 %vm5568_vm5, %v3471_v52  ;;  %v6538_v52 = vld [vmem:[#allocation39_spill] sm:$0xff]  ;;  %6559 = vst [vmem:[#allocation22_spill] sm:$0xff] %v5905_v59 }
 0x111   :  { %4267 = vmatmul.mubr.bf16.gmra.mxu0 %v2359_v5  ;;  %v5860_v13 = vpop.f32.mrf.mxu0  ;;  %v6539_v5 = vmax.f32 %v6538_v52, 0.0  ;;  %v5916_v3 = vpop.f32.mrf.mxu1 }
 0x112   :  { %4270 = vmatprep.mubr.bf16.mxu0 %v2362_v6  ;;  %v6540_v6 = vld [vmem:[#allocation40_spill] sm:$0xff]  ;;  %6564 = vst [vmem:[#allocation23_spill] sm:$0xff] %v5916_v3 }
 0x113   :  { %v6541_v62 = vmax.f32 %v6540_v6, 0.0  ;;  %v5876_v22 = vpop.f32.mrf.mxu0 }
 0x114   :  { %v5922_v41 = vpop.f32.mrf.mxu1 }
 0x115   :  { %v3486_v7 = vpack.c.bf16 %v6541_v62, %v6539_v5  ;;  %v5886_v53 = vpop.f32.mrf.mxu0  ;;  %6565 = vst [vmem:[#allocation37_spill] sm:$0xff] %v5922_v41 }
 0x116   :  { %v5931_v52 = vpop.f32.mrf.mxu1 }
 0x117   :  { %4187 = vmatmul.mubr.msk.bf16.gmra.mxu1 %vm5568_vm5, %v3474_v2  ;;  %v6545_v2 = vmax.f32 %v6544_v49, 0.0  ;;  %v5900_v0 = vpop.f32.mrf.mxu0  ;;  %6566 = vst [vmem:[#allocation38_spill] sm:$0xff] %v5931_v52 }
 0x118   :  { %4190 = vmatprep.mubr.msk.bf16.mxu1 %vm5568_vm5, %v3477_v32  ;;  %v6548_v32 = vld [vmem:[#allocation69_spill] sm:$0xff]  ;;  %v5938_v6 = vpop.f32.mrf.mxu1 }
 0x119   :  { %4271 = vmatmul.mubr.bf16.gmra.mxu0 %v2365_v9  ;;  %v3489_v50 = vpack.c.bf16 %v6547_v58, %v6545_v2  ;;  %v2381_v9 = vrot.slane %v6548_v32, 1  ;;  %v5909_v48 = vpop.f32.mrf.mxu0  ;;  %6567 = vst [vmem:[#allocation45_spill] sm:$0xff] %v5938_v6 }
 0x11a   :  { %4274 = vmatprep.mubr.bf16.mxu0 %v2368_v63  ;;  %v6549_v63 = vld [vmem:[#allocation70_spill] sm:$0xff] }
 0x11b   :  { %v2382_v1 = vrot.slane %v6549_v63, 1  ;;  %v5918_v51 = vpop.f32.mrf.mxu0 }
 0x11d   :  { %v2383_v42 = vsel %vm2299_vm3, %v2381_v9, %v2382_v1 }
 0x11f   :  { %4191 = vmatmul.mubr.msk.bf16.gmra.mxu1 %vm5568_vm5, %v3480_v21  ;;  %v6556_v21 = vmax.f32 %v6555_v18, 0.0 }
 0x120   :  { %4194 = vmatprep.mubr.msk.bf16.mxu1 %vm5568_vm5, %v3483_v23  ;;  %v6561_v23 = vmax.f32 %v6560_v28, 0.0 }
 0x121   :  { %4275 = vmatmul.mubr.bf16.gmra.mxu0 %v2371_v30  ;;  %v3495_v55 = vpack.c.bf16 %v6558_v14, %v6556_v21  ;;  %v6562_v30 = vld [vmem:[#allocation68_spill] sm:$0xff] }
 0x122   :  { %4278 = vmatprep.mubr.bf16.mxu0 %v2374_v46  ;;  %v6563_v46 = vmax.f32 %v6562_v30, 0.0 }
 0x124   :  { %v3498_v54 = vpack.c.bf16 %v6563_v46, %v6561_v23 }
 0x127   :  { %4195 = vmatmul.mubr.msk.bf16.gmra.mxu1 %vm5568_vm5, %v3486_v7 }
 0x128   :  { %4198 = vmatprep.mubr.msk.bf16.mxu1 %vm5568_vm5, %v3489_v50 }
 0x129   :  { %4279 = vmatmul.mubr.bf16.gmra.mxu0 %v2377_v39 }
 0x12a   :  { %4282 = vmatprep.mubr.bf16.mxu0 %v2380_v56 }
 0x12f   :  { %4199 = vmatmul.mubr.msk.bf16.gmra.mxu1 %vm5568_vm5, %v3492_v34 }
 0x130   :  { %4202 = vmatprep.mubr.msk.bf16.mxu1 %vm5568_vm5, %v3495_v55 }
 0x131   :  { %4283 = vmatmul.mubr.bf16.gmra.mxu0 %v2383_v42 }
 0x132   :  { %4286 = vmatprep.mubr.bf16.mxu0 %v5701_v60  ;;  %v5928_v60 = vpop.f32.mrf.mxu0 }
 0x134   :  { %v5933_v5 = vpop.f32.mrf.mxu0 }
 0x137   :  { %4203 = vmatmul.mubr.msk.bf16.gmra.mxu1 %vm5568_vm5, %v3498_v54 }
 0x138   :  { %4206 = vmatprep.mubr.msk.bf16.mxu1 %vm5568_vm5, %v5676_v45  ;;  %v5944_v45 = vpop.f32.mrf.mxu0 }
 0x139   :  { %4287 = vmatmul.mubr.bf16.gmra.mxu0 %v5713_v29  ;;  %v5946_v29 = vpop.f32.mrf.mxu1 }
 0x13a   :  { %4290 = vmatprep.mubr.bf16.mxu0 %v5720_v16  ;;  %6568 = vst [vmem:[#allocation71_spill] sm:$0xff] %v5946_v29  ;;  %v5948_v16 = vpop.f32.mrf.mxu0 }
 0x13b   :  { %v5953_v62 = vpop.f32.mrf.mxu1 }
 0x13c   :  { %6569 = vst [vmem:[#allocation72_spill] sm:$0xff] %v5953_v62 }
 0x13d   :  { %v5957_v7 = vpop.f32.mrf.mxu1 }
 0x13e   :  { %6570 = vst [vmem:[#allocation73_spill] sm:$0xff] %v5957_v7 }
 0x13f   :  { %4207 = vmatmul.mubr.msk.bf16.gmra.mxu1 %vm5568_vm5, %v5685_v15  ;;  %v5955_v15 = vpop.f32.mrf.mxu0 }
 0x140   :  { %4210 = vmatprep.mubr.msk.bf16.mxu1 %vm5568_vm5, %v5697_v38  ;;  %v5961_v38 = vpop.f32.mrf.mxu1 }
 0x141   :  { %4291 = vmatmul.mubr.bf16.gmra.mxu0 %v5725_v12  ;;  %v5959_v26 = vpop.f32.mrf.mxu0  ;;  %6571 = vst [vmem:[#allocation47_spill] sm:$0xff] %v5961_v38 }
 0x142   :  { %v5965_v19 = vpop.f32.mrf.mxu1 }
 0x143   :  { %v5963_v12 = vpop.f32.mrf.mxu0  ;;  %6572 = vst [vmem:[#allocation74_spill] sm:$0xff] %v5965_v19 }
 0x144   :  { %v5969_v17 = vpop.f32.mrf.mxu1 }
 0x145   :  { %v5967_v24 = vpop.f32.mrf.mxu0  ;;  %6573 = vst [vmem:[#allocation75_spill] sm:$0xff] %v5969_v17 }
 0x147   :  { %4211 = vmatmul.mubr.msk.bf16.gmra.mxu1 %vm5568_vm5, %v5708_v27  ;;  %v5971_v37 = vpop.f32.mrf.mxu0  ;;  %v5973_v27 = vpop.f32.mrf.mxu1 }
 0x148   :  { %6574 = vst [vmem:[#allocation76_spill] sm:$0xff] %v5973_v27 }
 0x149   :  { %v5975_v49 = vpop.f32.mrf.mxu0  ;;  %v5977_v2 = vpop.f32.mrf.mxu1 }
 0x14a   :  { %6575 = vst [vmem:[#allocation77_spill] sm:$0xff] %v5977_v2 }
 0x14b   :  { %v5981_v58 = vpop.f32.mrf.mxu1 }
 0x14c   :  { %6576 = vst [vmem:[#allocation28_spill] sm:$0xff] %v5981_v58 }
 0x155   :  { %v5979_v4 = vpop.f32.mrf.mxu0 }
 0x157   :  { %v5983_v50 = vpop.f32.mrf.mxu0  ;;  %v5985_v39 = vpop.f32.mrf.mxu1 }
 0x158   :  { %6577 = vst [vmem:[#allocation29_spill] sm:$0xff] %v5985_v39 }
 0x159   :  { %v5987_v56 = vpop.f32.mrf.mxu0  ;;  %v5989_v32 = vpop.f32.mrf.mxu1 }
 0x15a   :  { %6578 = vst [vmem:[#allocation78_spill] sm:$0xff] %v5989_v32 }
 0x15b   :  { %v5991_v9 = vpop.f32.mrf.mxu0  ;;  %v5993_v63 = vpop.f32.mrf.mxu1 }
 0x15c   :  { %6579 = vst [vmem:[#allocation79_spill] sm:$0xff] %v5993_v63 }
 0x15d   :  { %v5997_v11 = vpop.f32.mrf.mxu1 }
 0x15e   :  { %6580 = vst [vmem:[#allocation80_spill] sm:$0xff] %v5997_v11 }
 0x169   :  { %v5995_v1 = vpop.f32.mrf.mxu0 }
 0x16b   :  { %v5999_v20 = vpop.f32.mrf.mxu0 }
 0x16d   :  { %v6003_v61 = vpop.f32.mrf.mxu0 }
 0x16f   :  { %v6001_v57 = vpop.f32.mrf.mxu1  ;;  %v6007_v18 = vpop.f32.mrf.mxu0 }
 0x170   :  { %6581 = vst [vmem:[#allocation81_spill] sm:$0xff] %v6001_v57 }
 0x171   :  { %v6005_v34 = vpop.f32.mrf.mxu1 }
 0x172   :  { %6582 = vst [vmem:[#allocation53_spill] sm:$0xff] %v6005_v34 }
 0x173   :  { %v6009_v21 = vpop.f32.mrf.mxu1 }
 0x174   :  { %6583 = vst [vmem:[#allocation55_spill] sm:$0xff] %v6009_v21 }
 0x175   :  { %v6013_v14 = vpop.f32.mrf.mxu1 }
 0x176   :  { %6584 = vst [vmem:[#allocation35_spill] sm:$0xff] %v6013_v14 }
 0x181   :  { %v6011_v36 = vpop.f32.mrf.mxu0 }
 0x183   :  { %v6015_v55 = vpop.f32.mrf.mxu0 }
 0x185   :  { %v6017_v42 = vpop.f32.mrf.mxu0 }
 0x187   :  { %v6019_v28 = vpop.f32.mrf.mxu1  ;;  %v6021_v23 = vpop.f32.mrf.mxu0 }
 0x188   :  { %6585 = vst [vmem:[#allocation36_spill] sm:$0xff] %v6019_v28 }
 0x189   :  { %v6023_v30 = vpop.f32.mrf.mxu1  ;;  %v4232_v46 = vpop.f32.mrf.mxu0 }
 0x18a   :  { %6586 = vst [vmem:[#allocation61_spill] sm:$0xff] %v6023_v30 }
 0x18b   :  { %v6025_v54 = vpop.f32.mrf.mxu1  ;;  %v2527_v34 = vpop.f32.mrf.mxu0 }
 0x18c   :  { %6587 = vst [vmem:[#allocation62_spill] sm:$0xff] %v6025_v54 }
 0x18d   :  { %v6027_v57 = vpop.f32.mrf.mxu1  ;;  %v4233_v21 = vpop.f32.mrf.mxu0 }
 0x18e   :  { %6588 = vst [vmem:[#allocation41_spill] sm:$0xff] %v6027_v57 }
 0x18f   :  { %v4152_v11 = vpop.f32.mrf.mxu1  ;;  %v2530_v63 = vpop.f32.mrf.mxu0 }
 0x190   :  { %v1989_v39 = vadd.f32 %v4152_v11, %v5810_v8 }
 0x191   :  { %v1980_v14 = vpop.f32.mrf.mxu1  ;;  %v4236_v32 = vpop.f32.mrf.mxu0 }
 0x192   :  { %v1981_v58 = vadd.f32 %v1980_v14, %v5824_v47  ;;  %v2784_v19 = vadd.f32 %v4232_v46, %v1989_v39 }
 0x193   :  { %v4153_v28 = vpop.f32.mrf.mxu1  ;;  %v2543_v2 = vpop.f32.mrf.mxu0 }
 0x194   :  { %v1992_v27 = vadd.f32 %v4153_v28, %v5834_v44  ;;  %v2782_v54 = vadd.f32 %v2527_v34, %v1981_v58  ;;  %v3238_v34 = vmul.f32 %v2784_v19, %v2784_v19 }
 0x195   :  { %v1983_v30 = vpop.f32.mrf.mxu1  ;;  %v4237_v17 = vpop.f32.mrf.mxu0 }
 0x196   :  { %v2785_v38 = vadd.f32 %v4233_v21, %v1992_v27  ;;  %v1984_v57 = vadd.f32 %v1983_v30, %v5850_v33  ;;  %v3236_v47 = vmul.f32 %v2782_v54, %v2782_v54 }
 0x197   :  { %v4156_v7 = vpop.f32.mrf.mxu1  ;;  %v2546_v62 = vpop.f32.mrf.mxu0 }
 0x198   :  { %v3736_v29 = vpack.c.bf16 %v2785_v38, %v2784_v19  ;;  %v2783_v6 = vadd.f32 %v2530_v63, %v1984_v57  ;;  %v2005_v52 = vadd.f32 %v4156_v7, %v5860_v13  ;;  %v3239_v57 = vmul.f32 %v2785_v38, %v2785_v38 }
 0x199   :  { %v1996_v8 = vpop.f32.mrf.mxu1  ;;  %v4240_v11 = vpop.f32.mrf.mxu0 }
 0x19a   :  { %3903 = vst [vmem:[%s6199_s4 + $0x8] sm:$0xff] %v3736_v29   ;;  %v3731_v44 = vpack.c.bf16 %v2783_v6, %v2782_v54  ;;  %v3166_v14 = vadd.f32 %v2783_v6, %v2782_v54  ;;  %v3237_v39 = vmul.f32 %v2783_v6, %v2783_v6  ;;  %v1997_v27 = vadd.f32 %v1996_v8, %v5876_v22 }
 0x19b   :  { %v4157_v58 = vpop.f32.mrf.mxu1  ;;  %v2559_v33 = vpop.f32.mrf.mxu0  ;;  %v2788_v21 = vadd.f32 %v4236_v32, %v2005_v52 }
 0x19c   :  { %3732 = vst [vmem:[%s6199_s4] sm:$0xff] %v3731_v44   ;;  %v3167_v13 = vadd.f32 %v3166_v14, %v2784_v19  ;;  %v3300_v7 = vadd.f32 %v3237_v39, %v3236_v47  ;;  %v2008_v63 = vadd.f32 %v4157_v58, %v5886_v53  ;;  %v2786_v28 = vadd.f32 %v2543_v2, %v1997_v27 }
 0x19d   :  { %v1999_v29 = vpop.f32.mrf.mxu1  ;;  %v4241_v30 = vpop.f32.mrf.mxu0  ;;  %v3242_v58 = vmul.f32 %v2788_v21, %v2788_v21 }
 0x19e   :  { %v3301_v46 = vadd.f32 %v3300_v7, %v3238_v34  ;;  %v3168_v6 = vadd.f32 %v3167_v13, %v2785_v38  ;;  %v2789_v54 = vadd.f32 %v4237_v17, %v2008_v63  ;;  %v2000_v22 = vadd.f32 %v1999_v29, %v5900_v0 }
 0x19f   :  { %v4160_v8 = vpop.f32.mrf.mxu1  ;;  %v2562_v41 = vpop.f32.mrf.mxu0  ;;  %v3240_v59 = vmul.f32 %v2786_v28, %v2786_v28 }
 0x1a0   :  { %v3169_v3 = vadd.f32 %v3168_v6, %v2786_v28  ;;  %v3302_v25 = vadd.f32 %v3301_v46, %v3239_v57  ;;  %v3746_v44 = vpack.c.bf16 %v2789_v54, %v2788_v21  ;;  %v2787_v19 = vadd.f32 %v2546_v62, %v2000_v22 }
 0x1a1   :  { %v2012_v47 = vpop.f32.mrf.mxu1  ;;  %v4244_v14 = vpop.f32.mrf.mxu0  ;;  %v2021_v52 = vadd.f32 %v4160_v8, %v5909_v48 }
 0x1a2   :  { %v3303_v53 = vadd.f32 %v3302_v25, %v3240_v59  ;;  %3905 = vst [vmem:[%s6199_s4 + $0x18] sm:$0xff] %v3746_v44   ;;  %v2013_v38 = vadd.f32 %v2012_v47, %v5918_v51  ;;  %v3741_v17 = vpack.c.bf16 %v2787_v19, %v2786_v28  ;;  %v3170_v0 = vadd.f32 %v3169_v3, %v2787_v19 }
 0x1a3   :  { %v3241_v2 = vmul.f32 %v2787_v19, %v2787_v19  ;;  %v4161_v32 = vpop.f32.mrf.mxu1  ;;  %v2575_v39 = vpop.f32.mrf.mxu0  ;;  %v2792_v48 = vadd.f32 %v4240_v11, %v2021_v52  ;;  %v3243_v3 = vmul.f32 %v2789_v54, %v2789_v54 }
 0x1a4   :  { %v2024_v27 = vadd.f32 %v4161_v32, %v5928_v60  ;;  %3904 = vst [vmem:[%s6199_s4 + $0x10] sm:$0xff] %v3741_v17   ;;  %v3171_v25 = vadd.f32 %v3170_v0, %v2788_v21  ;;  %v2790_v62 = vadd.f32 %v2559_v33, %v2013_v38 }
 0x1a5   :  { %v3304_v59 = vadd.f32 %v3303_v53, %v3241_v2  ;;  %v2015_v34 = vpop.f32.mrf.mxu1  ;;  %v4245_v13 = vpop.f32.mrf.mxu0  ;;  %v3246_v52 = vmul.f32 %v2792_v48, %v2792_v48 }
 0x1a6   :  { %v2793_v7 = vadd.f32 %v4241_v30, %v2024_v27  ;;  %v2016_v51 = vadd.f32 %v2015_v34, %v5933_v5  ;;  %v3172_v57 = vadd.f32 %v3171_v25, %v2789_v54  ;;  %v3244_v22 = vmul.f32 %v2790_v62, %v2790_v62 }
 0x1a7   :  { %v3305_v63 = vadd.f32 %v3304_v59, %v3242_v58  ;;  %v4164_v28 = vpop.f32.mrf.mxu1  ;;  %v2578_v29 = vpop.f32.mrf.mxu0 }
 0x1a8   :  { %v3756_v60 = vpack.c.bf16 %v2793_v7, %v2792_v48  ;;  %v2791_v46 = vadd.f32 %v2562_v41, %v2016_v51  ;;  %v3173_v6 = vadd.f32 %v3172_v57, %v2790_v62  ;;  %v2037_v5 = vadd.f32 %v4164_v28, %v5944_v45 }
 0x1a9   :  { %v3306_v8 = vadd.f32 %v3305_v63, %v3243_v3  ;;  %v2028_v44 = vpop.f32.mrf.mxu1  ;;  %v4248_v21 = vpop.f32.mrf.mxu0  ;;  %v3247_v58 = vmul.f32 %v2793_v7, %v2793_v7 }
 0x1aa   :  { %3907 = vst [vmem:[%s6199_s4 + $0x28] sm:$0xff] %v3756_v60   ;;  %v3751_v11 = vpack.c.bf16 %v2791_v46, %v2790_v62  ;;  %v3245_v33 = vmul.f32 %v2791_v46, %v2791_v46  ;;  %v2029_v30 = vadd.f32 %v2028_v44, %v5948_v16  ;;  %v3174_v19 = vadd.f32 %v3173_v6, %v2791_v46 }
 0x1ab   :  { %v3307_v54 = vadd.f32 %v3306_v8, %v3244_v22  ;;  %v4165_v47 = vpop.f32.mrf.mxu1  ;;  %v2591_v53 = vpop.f32.mrf.mxu0  ;;  %v2796_v27 = vadd.f32 %v4244_v14, %v2037_v5 }
 0x1ac   :  { %3906 = vst [vmem:[%s6199_s4 + $0x20] sm:$0xff] %v3751_v11   ;;  %v2040_v41 = vadd.f32 %v4165_v47, %v5955_v15  ;;  %v3175_v38 = vadd.f32 %v3174_v19, %v2792_v48  ;;  %v2794_v0 = vadd.f32 %v2575_v39, %v2029_v30 }
 0x1ad   :  { %v3308_v17 = vadd.f32 %v3307_v54, %v3245_v33  ;;  %v2031_v2 = vpop.f32.mrf.mxu1  ;;  %v4249_v32 = vpop.f32.mrf.mxu0  ;;  %v3250_v22 = vmul.f32 %v2796_v27, %v2796_v27 }
 0x1ae   :  { %v2797_v45 = vadd.f32 %v4245_v13, %v2040_v41  ;;  %v2032_v16 = vadd.f32 %v2031_v2, %v5959_v26  ;;  %v3176_v59 = vadd.f32 %v3175_v38, %v2793_v7  ;;  %v3248_v57 = vmul.f32 %v2794_v0, %v2794_v0 }
 0x1af   :  { %v3309_v25 = vadd.f32 %v3308_v17, %v3246_v52  ;;  %v4168_v62 = vpop.f32.mrf.mxu1  ;;  %v2594_v34 = vpop.f32.mrf.mxu0 }
 0x1b0   :  { %v3766_v51 = vpack.c.bf16 %v2797_v45, %v2796_v27  ;;  %v2795_v3 = vadd.f32 %v2578_v29, %v2032_v16  ;;  %v3177_v63 = vadd.f32 %v3176_v59, %v2794_v0  ;;  %v2053_v26 = vadd.f32 %v4168_v62, %v5963_v12 }
 0x1b1   :  { %v3310_v15 = vadd.f32 %v3309_v25, %v3247_v58  ;;  %v2044_v28 = vpop.f32.mrf.mxu1  ;;  %v4252_v48 = vpop.f32.mrf.mxu0  ;;  %v3251_v54 = vmul.f32 %v2797_v45, %v2797_v45 }
 0x1b2   :  { %3909 = vst [vmem:[%s6199_s4 + $0x38] sm:$0xff] %v3766_v51   ;;  %v3761_v14 = vpack.c.bf16 %v2795_v3, %v2794_v0  ;;  %v3249_v39 = vmul.f32 %v2795_v3, %v2795_v3  ;;  %v2045_v13 = vadd.f32 %v2044_v28, %v5967_v24  ;;  %v3178_v60 = vadd.f32 %v3177_v63, %v2795_v3 }
 0x1b3   :  { %v3311_v7 = vadd.f32 %v3310_v15, %v3248_v57  ;;  %v4169_v46 = vpop.f32.mrf.mxu1  ;;  %v2607_v6 = vpop.f32.mrf.mxu0  ;;  %v2800_v30 = vadd.f32 %v4248_v21, %v2053_v26 }
 0x1b4   :  { %3908 = vst [vmem:[%s6199_s4 + $0x30] sm:$0xff] %v3761_v14   ;;  %v2056_v29 = vadd.f32 %v4169_v46, %v5971_v37  ;;  %v3179_v8 = vadd.f32 %v3178_v60, %v2796_v27  ;;  %v2798_v11 = vadd.f32 %v2591_v53, %v2045_v13 }
 0x1b5   :  { %v3312_v44 = vadd.f32 %v3311_v7, %v3249_v39  ;;  %v2047_v33 = vpop.f32.mrf.mxu1  ;;  %v4253_v5 = vpop.f32.mrf.mxu0 }
 0x1b6   :  { %v2801_v12 = vadd.f32 %v4249_v32, %v2056_v29  ;;  %v2048_v24 = vadd.f32 %v2047_v33, %v5975_v49  ;;  %v3180_v47 = vadd.f32 %v3179_v8, %v2797_v45  ;;  %v3252_v2 = vmul.f32 %v2798_v11, %v2798_v11 }
 0x1b7   :  { %v3313_v19 = vadd.f32 %v3312_v44, %v3250_v22  ;;  %v4172_v41 = vpop.f32.mrf.mxu1  ;;  %v2610_v52 = vpop.f32.mrf.mxu0 }
 0x1b8   :  { %v3776_v38 = vpack.c.bf16 %v2801_v12, %v2800_v30  ;;  %v2799_v17 = vadd.f32 %v2594_v34, %v2048_v24  ;;  %v3181_v0 = vadd.f32 %v3180_v47, %v2798_v11  ;;  %v2069_v49 = vadd.f32 %v4172_v41, %v5979_v4 }
 0x1b9   :  { %v3314_v37 = vadd.f32 %v3313_v19, %v3251_v54  ;;  %v2060_v16 = vpop.f32.mrf.mxu1  ;;  %v4256_v27 = vpop.f32.mrf.mxu0  ;;  %v3254_v34 = vmul.f32 %v2800_v30, %v2800_v30  ;;  %v3255_v14 = vmul.f32 %v2801_v12, %v2801_v12 }
 0x1ba   :  { %3911 = vst [vmem:[%s6199_s4 + $0x48] sm:$0xff] %v3776_v38   ;;  %v3771_v21 = vpack.c.bf16 %v2799_v17, %v2798_v11  ;;  %v3253_v53 = vmul.f32 %v2799_v17, %v2799_v17  ;;  %v2061_v32 = vadd.f32 %v2060_v16, %v5983_v50  ;;  %v3182_v58 = vadd.f32 %v3181_v0, %v2799_v17 }
 0x1bb   :  { %v3315_v45 = vadd.f32 %v3314_v37, %v3252_v2  ;;  %v4173_v25 = vpop.f32.mrf.mxu1  ;;  %v2623_v59 = vpop.f32.mrf.mxu0  ;;  %v2804_v28 = vadd.f32 %v4252_v48, %v2069_v49 }
 0x1bc   :  { %3910 = vst [vmem:[%s6199_s4 + $0x40] sm:$0xff] %v3771_v21   ;;  %v2072_v62 = vadd.f32 %v4173_v25, %v5987_v56  ;;  %v3183_v51 = vadd.f32 %v3182_v58, %v2800_v30  ;;  %v2802_v63 = vadd.f32 %v2607_v6, %v2061_v32 }
 0x1bd   :  { %v3316_v3 = vadd.f32 %v3315_v45, %v3253_v53  ;;  %v2063_v57 = vpop.f32.mrf.mxu1  ;;  %v4257_v15 = vpop.f32.mrf.mxu0  ;;  %v3258_v54 = vmul.f32 %v2804_v28, %v2804_v28 }
 0x1be   :  { %v2805_v4 = vadd.f32 %v4253_v5, %v2072_v62  ;;  %v2064_v50 = vadd.f32 %v2063_v57, %v5991_v9  ;;  %v3184_v26 = vadd.f32 %v3183_v51, %v2801_v12  ;;  %v3256_v22 = vmul.f32 %v2802_v63, %v2802_v63 }
 0x1bf   :  { %v3317_v39 = vadd.f32 %v3316_v3, %v3254_v34  ;;  %v4176_v13 = vpop.f32.mrf.mxu1  ;;  %v2626_v7 = vpop.f32.mrf.mxu0 }
 0x1c0   :  { %v3786_v60 = vpack.c.bf16 %v2805_v4, %v2804_v28  ;;  %v2803_v46 = vadd.f32 %v2610_v52, %v2064_v50  ;;  %v3185_v29 = vadd.f32 %v3184_v26, %v2802_v63  ;;  %v2085_v9 = vadd.f32 %v4176_v13, %v5995_v1 }
 0x1c1   :  { %v3318_v56 = vadd.f32 %v3317_v39, %v3255_v14  ;;  %v2076_v8 = vpop.f32.mrf.mxu1  ;;  %v4260_v44 = vpop.f32.mrf.mxu0  ;;  %v3259_v0 = vmul.f32 %v2805_v4, %v2805_v4 }
 0x1c2   :  { %3913 = vst [vmem:[%s6199_s4 + $0x58] sm:$0xff] %v3786_v60   ;;  %v3781_v48 = vpack.c.bf16 %v2803_v46, %v2802_v63  ;;  %v3257_v6 = vmul.f32 %v2803_v46, %v2803_v46  ;;  %v2077_v11 = vadd.f32 %v2076_v8, %v5999_v20  ;;  %v3186_v5 = vadd.f32 %v3185_v29, %v2803_v46 }
 0x1c3   :  { %v3319_v33 = vadd.f32 %v3318_v56, %v3256_v22  ;;  %v4177_v30 = vpop.f32.mrf.mxu1  ;;  %v2639_v12 = vpop.f32.mrf.mxu0  ;;  %v2808_v17 = vadd.f32 %v4256_v27, %v2085_v9 }
 0x1c4   :  { %3912 = vst [vmem:[%s6199_s4 + $0x50] sm:$0xff] %v3781_v48   ;;  %v2088_v24 = vadd.f32 %v4177_v30, %v6003_v61  ;;  %v3187_v19 = vadd.f32 %v3186_v5, %v2804_v28  ;;  %v2806_v41 = vadd.f32 %v2623_v59, %v2077_v11 }
 0x1c5   :  { %v3320_v47 = vadd.f32 %v3319_v33, %v3257_v6  ;;  %v2079_v52 = vpop.f32.mrf.mxu1  ;;  %v4261_v38 = vpop.f32.mrf.mxu0 }
 0x1c6   :  { %v2809_v1 = vadd.f32 %v4257_v15, %v2088_v24  ;;  %v2080_v20 = vadd.f32 %v2079_v52, %v6007_v18  ;;  %v3188_v37 = vadd.f32 %v3187_v19, %v2805_v4  ;;  %v3260_v45 = vmul.f32 %v2806_v41, %v2806_v41 }
 0x1c7   :  { %v3321_v2 = vadd.f32 %v3320_v47, %v3258_v54  ;;  %v4180_v16 = vpop.f32.mrf.mxu1  ;;  %v2642_v21 = vpop.f32.mrf.mxu0  ;;  %v3262_v15 = vmul.f32 %v2808_v17, %v2808_v17 }
 0x1c8   :  { %v3796_v53 = vpack.c.bf16 %v2809_v1, %v2808_v17  ;;  %v2807_v49 = vadd.f32 %v2626_v7, %v2080_v20  ;;  %v3189_v32 = vadd.f32 %v3188_v37, %v2806_v41  ;;  %v2101_v18 = vadd.f32 %v4180_v16, %v6011_v36 }
 0x1c9   :  { %v3322_v61 = vadd.f32 %v3321_v2, %v3259_v0  ;;  %v2092_v58 = vpop.f32.mrf.mxu1  ;;  %v4264_v25 = vpop.f32.mrf.mxu0  ;;  %v3263_v13 = vmul.f32 %v2809_v1, %v2809_v1 }
 0x1ca   :  { %3915 = vst [vmem:[%s6199_s4 + $0x68] sm:$0xff] %v3796_v53   ;;  %v3791_v27 = vpack.c.bf16 %v2807_v49, %v2806_v41  ;;  %v3261_v59 = vmul.f32 %v2807_v49, %v2807_v49  ;;  %v2093_v62 = vadd.f32 %v2092_v58, %v6015_v55  ;;  %v3190_v51 = vadd.f32 %v3189_v32, %v2807_v49 }
 0x1cb   :  { %v3323_v34 = vadd.f32 %v3322_v61, %v3260_v45  ;;  %v4181_v3 = vpop.f32.mrf.mxu1  ;;  %v2655_v63 = vpop.f32.mrf.mxu0  ;;  %v2812_v26 = vadd.f32 %v4260_v44, %v2101_v18 }
 0x1cc   :  { %3914 = vst [vmem:[%s6199_s4 + $0x60] sm:$0xff] %v3791_v27   ;;  %v2104_v57 = vadd.f32 %v4181_v3, %v6017_v42  ;;  %v3191_v28 = vadd.f32 %v3190_v51, %v2808_v17  ;;  %v2810_v50 = vadd.f32 %v2639_v12, %v2093_v62  ;;  %v6589_v27 = vld [vmem:[#allocation18_spill] sm:$0xff] }
 0x1cd   :  { %v3324_v4 = vadd.f32 %v3323_v34, %v3261_v59  ;;  %v2095_v14 = vpop.f32.mrf.mxu1  ;;  %v4265_v39 = vpop.f32.mrf.mxu0  ;;  %v3266_v19 = vmul.f32 %v2812_v26, %v2812_v26  ;;  %v6590_v3 = vld [vmem:[#allocation22_spill] sm:$0xff] }
 0x1ce   :  { %v2813_v36 = vadd.f32 %v4261_v38, %v2104_v57  ;;  %v2096_v55 = vadd.f32 %v2095_v14, %v6021_v23  ;;  %v3192_v60 = vadd.f32 %v3191_v28, %v2809_v1  ;;  %v3264_v48 = vmul.f32 %v2810_v50, %v2810_v50 }
 0x1cf   :  { %v3325_v7 = vadd.f32 %v3324_v4, %v3262_v15  ;;  %v4184_v46 = vpop.f32.mrf.mxu1  ;;  %v2658_v29 = vpop.f32.mrf.mxu0 }
 0x1d0   :  { %v3806_v22 = vpack.c.bf16 %v2813_v36, %v2812_v26  ;;  %v2811_v56 = vadd.f32 %v2642_v21, %v2096_v55  ;;  %v3193_v8 = vadd.f32 %v3192_v60, %v2810_v50  ;;  %v2117_v23 = vadd.f32 %v4184_v46, %v5830_v35 }
 0x1d1   :  { %v3326_v42 = vadd.f32 %v3325_v7, %v3263_v13  ;;  %v2108_v6 = vpop.f32.mrf.mxu1  ;;  %v4268_v9 = vpop.f32.mrf.mxu0  ;;  %v3267_v20 = vmul.f32 %v2813_v36, %v2813_v36 }
 0x1d2   :  { %3917 = vst [vmem:[%s6199_s4 + $0x78] sm:$0xff] %v3806_v22   ;;  %v3801_v44 = vpack.c.bf16 %v2811_v56, %v2810_v50  ;;  %v3265_v11 = vmul.f32 %v2811_v56, %v2811_v56  ;;  %v2109_v33 = vadd.f32 %v2108_v6, %v5844_v43  ;;  %v3194_v30 = vadd.f32 %v3193_v8, %v2811_v56 }
 0x1d3   :  { %v3327_v5 = vadd.f32 %v3326_v42, %v3264_v48  ;;  %v4185_v12 = vpop.f32.mrf.mxu1  ;;  %v2671_v24 = vpop.f32.mrf.mxu0  ;;  %v2816_v1 = vadd.f32 %v4264_v25, %v2117_v23 }
 0x1d4   :  { %3916 = vst [vmem:[%s6199_s4 + $0x70] sm:$0xff] %v3801_v44   ;;  %v2120_v54 = vadd.f32 %v4185_v12, %v5856_v31  ;;  %v3195_v47 = vadd.f32 %v3194_v30, %v2812_v26  ;;  %v2814_v52 = vadd.f32 %v2655_v63, %v2109_v33  ;;  %v6591_v26 = vld [vmem:[#allocation23_spill] sm:$0xff]  ;;  %v6593_v33 = vld [vmem:[#allocation38_spill] sm:$0xff] }
 0x1d5   :  { %v3328_v41 = vadd.f32 %v3327_v5, %v3265_v11  ;;  %v2111_v38 = vpop.f32.mrf.mxu1  ;;  %v4269_v17 = vpop.f32.mrf.mxu0  ;;  %v3270_v57 = vmul.f32 %v2816_v1, %v2816_v1  ;;  %v6592_v11 = vld [vmem:[#allocation37_spill] sm:$0xff] }
 0x1d6   :  { %v2817_v35 = vadd.f32 %v4265_v39, %v2120_v54  ;;  %v2112_v43 = vadd.f32 %v2111_v38, %v5870_v40  ;;  %v3196_v2 = vadd.f32 %v3195_v47, %v2813_v36  ;;  %v3268_v32 = vmul.f32 %v2814_v52, %v2814_v52 }
 0x1d7   :  { %v3329_v0 = vadd.f32 %v3328_v41, %v3266_v19  ;;  %v4188_v37 = vpop.f32.mrf.mxu1  ;;  %v2674_v16 = vpop.f32.mrf.mxu0  ;;  %v6594_v19 = vld [vmem:[#allocation45_spill] sm:$0xff] }
 0x1d8   :  { %v3816_v21 = vpack.c.bf16 %v2817_v35, %v2816_v1  ;;  %v2815_v53 = vadd.f32 %v2658_v29, %v2112_v43  ;;  %v3197_v49 = vadd.f32 %v3196_v2, %v2814_v52  ;;  %v2133_v40 = vadd.f32 %v4188_v37, %v5882_v10 }
 0x1d9   :  { %v3330_v31 = vadd.f32 %v3329_v0, %v3267_v20  ;;  %v2124_v45 = vpop.f32.mrf.mxu1  ;;  %v4272_v61 = vpop.f32.mrf.mxu0  ;;  %v3271_v55 = vmul.f32 %v2817_v35, %v2817_v35  ;;  %v6595_v0 = vld [vmem:[#allocation71_spill] sm:$0xff] }
 0x1da   :  { %3919 = vst [vmem:[%s6199_s4 + $0x88] sm:$0xff] %v3816_v21   ;;  %v3811_v58 = vpack.c.bf16 %v2815_v53, %v2814_v52  ;;  %v3269_v25 = vmul.f32 %v2815_v53, %v2815_v53  ;;  %v2125_v59 = vadd.f32 %v2124_v45, %v6589_v27  ;;  %v3198_v62 = vadd.f32 %v3197_v49, %v2815_v53 }
 0x1db   :  { %v3331_v18 = vadd.f32 %v3330_v31, %v3268_v32  ;;  %v4189_v34 = vpop.f32.mrf.mxu1  ;;  %v2687_v51 = vpop.f32.mrf.mxu0  ;;  %v2820_v39 = vadd.f32 %v4268_v9, %v2133_v40 }
 0x1dc   :  { %3918 = vst [vmem:[%s6199_s4 + $0x80] sm:$0xff] %v3811_v58   ;;  %v2136_v63 = vadd.f32 %v4189_v34, %v6590_v3  ;;  %v3199_v15 = vadd.f32 %v3198_v62, %v2816_v1  ;;  %v2818_v4 = vadd.f32 %v2671_v24, %v2125_v59  ;;  %v6597_v34 = vld [vmem:[#allocation73_spill] sm:$0xff] }
 0x1dd   :  { %v3332_v28 = vadd.f32 %v3331_v18, %v3269_v25  ;;  %v2127_v50 = vpop.f32.mrf.mxu1  ;;  %v4273_v14 = vpop.f32.mrf.mxu0  ;;  %v3274_v41 = vmul.f32 %v2820_v39, %v2820_v39  ;;  %v6596_v18 = vld [vmem:[#allocation72_spill] sm:$0xff] }
 0x1de   :  { %v2821_v10 = vadd.f32 %v4269_v17, %v2136_v63  ;;  %v2128_v36 = vadd.f32 %v2127_v50, %v6591_v26  ;;  %v3200_v7 = vadd.f32 %v3199_v15, %v2817_v35  ;;  %v3272_v8 = vmul.f32 %v2818_v4, %v2818_v4 }
 0x1df   :  { %v3333_v13 = vadd.f32 %v3332_v28, %v3270_v57  ;;  %v4192_v60 = vpop.f32.mrf.mxu1  ;;  %v2690_v46 = vpop.f32.mrf.mxu0  ;;  %v6598_v28 = vld [vmem:[#allocation47_spill] sm:$0xff] }
 0x1e0   :  { %v3826_v29 = vpack.c.bf16 %v2821_v10, %v2820_v39  ;;  %v2819_v22 = vadd.f32 %v2674_v16, %v2128_v36  ;;  %v3201_v56 = vadd.f32 %v3200_v7, %v2818_v4  ;;  %v2149_v23 = vadd.f32 %v4192_v60, %v6592_v11  ;;  %v6599_v7 = vld [vmem:[#allocation74_spill] sm:$0xff] }
 0x1e1   :  { %v3334_v48 = vadd.f32 %v3333_v13, %v3271_v55  ;;  %v2140_v42 = vpop.f32.mrf.mxu1  ;;  %v4276_v6 = vpop.f32.mrf.mxu0  ;;  %v3275_v37 = vmul.f32 %v2821_v10, %v2821_v10 }
 0x1e2   :  { %3921 = vst [vmem:[%s6199_s4 + $0x98] sm:$0xff] %v3826_v29   ;;  %v3821_v9 = vpack.c.bf16 %v2819_v22, %v2818_v4  ;;  %v3273_v44 = vmul.f32 %v2819_v22, %v2819_v22  ;;  %v2141_v5 = vadd.f32 %v2140_v42, %v6593_v33  ;;  %v3202_v12 = vadd.f32 %v3201_v56, %v2819_v22 }
 0x1e3   :  { %v3335_v30 = vadd.f32 %v3334_v48, %v3272_v8  ;;  %v4193_v24 = vpop.f32.mrf.mxu1  ;;  %v2703_v54 = vpop.f32.mrf.mxu0  ;;  %v2824_v43 = vadd.f32 %v4272_v61, %v2149_v23 }
 0x1e4   :  { %3920 = vst [vmem:[%s6199_s4 + $0x90] sm:$0xff] %v3821_v9   ;;  %v2152_v47 = vadd.f32 %v4193_v24, %v6594_v19  ;;  %v3203_v52 = vadd.f32 %v3202_v12, %v2820_v39  ;;  %v2822_v17 = vadd.f32 %v2687_v51, %v2141_v5  ;;  %v6601_v24 = vld [vmem:[#allocation76_spill] sm:$0xff] }
 0x1e5   :  { %v3336_v38 = vadd.f32 %v3335_v30, %v3273_v44  ;;  %v2143_v1 = vpop.f32.mrf.mxu1  ;;  %v4277_v35 = vpop.f32.mrf.mxu0  ;;  %v3278_v50 = vmul.f32 %v2824_v43, %v2824_v43  ;;  %v6600_v30 = vld [vmem:[#allocation75_spill] sm:$0xff] }
 0x1e6   :  { %v2825_v20 = vadd.f32 %v4273_v14, %v2152_v47  ;;  %v2144_v2 = vadd.f32 %v2143_v1, %v6595_v0  ;;  %v3204_v21 = vadd.f32 %v3203_v52, %v2821_v10  ;;  %v3276_v58 = vmul.f32 %v2822_v17, %v2822_v17 }
 0x1e7   :  { %v3337_v16 = vadd.f32 %v3336_v38, %v3274_v41  ;;  %v4196_v53 = vpop.f32.mrf.mxu1  ;;  %v2706_v49 = vpop.f32.mrf.mxu0  ;;  %v6602_v38 = vld [vmem:[#allocation77_spill] sm:$0xff] }
 0x1e8   :  { %v3836_v32 = vpack.c.bf16 %v2825_v20, %v2824_v43  ;;  %v2823_v31 = vadd.f32 %v2690_v46, %v2144_v2  ;;  %v3205_v45 = vadd.f32 %v3204_v21, %v2822_v17  ;;  %v2165_v62 = vadd.f32 %v4196_v53, %v6596_v18  ;;  %v6603_v21 = vld [vmem:[#allocation28_spill] sm:$0xff] }
 0x1e9   :  { %v3338_v25 = vadd.f32 %v3337_v16, %v3275_v37  ;;  %v2156_v40 = vpop.f32.mrf.mxu1  ;;  %v4280_v27 = vpop.f32.mrf.mxu0  ;;  %v3279_v46 = vmul.f32 %v2825_v20, %v2825_v20 }
 0x1ea   :  { %3923 = vst [vmem:[%s6199_s4 + $0xa8] sm:$0xff] %v3836_v32   ;;  %v3831_v61 = vpack.c.bf16 %v2823_v31, %v2822_v17  ;;  %v3277_v59 = vmul.f32 %v2823_v31, %v2823_v31  ;;  %v2157_v51 = vadd.f32 %v2156_v40, %v6597_v34  ;;  %v3206_v63 = vadd.f32 %v3205_v45, %v2823_v31 }
 0x1eb   :  { %v3339_v3 = vadd.f32 %v3338_v25, %v3276_v58  ;;  %v4197_v57 = vpop.f32.mrf.mxu1  ;;  %v2719_v15 = vpop.f32.mrf.mxu0  ;;  %v2828_v55 = vadd.f32 %v4276_v6, %v2165_v62 }
 0x1ec   :  { %3922 = vst [vmem:[%s6199_s4 + $0xa0] sm:$0xff] %v3831_v61   ;;  %v2168_v4 = vadd.f32 %v4197_v57, %v6598_v28  ;;  %v3207_v14 = vadd.f32 %v3206_v63, %v2824_v43  ;;  %v2826_v10 = vadd.f32 %v2703_v54, %v2157_v51  ;;  %v6605_v57 = vld [vmem:[#allocation78_spill] sm:$0xff] }
 0x1ed   :  { %v3340_v39 = vadd.f32 %v3339_v3, %v3277_v59  ;;  %v2159_v26 = vpop.f32.mrf.mxu1  ;;  %v4281_v36 = vpop.f32.mrf.mxu0  ;;  %v3282_v1 = vmul.f32 %v2828_v55, %v2828_v55  ;;  %v6604_v3 = vld [vmem:[#allocation29_spill] sm:$0xff] }
 0x1ee   :  { %v2829_v13 = vadd.f32 %v4277_v35, %v2168_v4  ;;  %v2160_v60 = vadd.f32 %v2159_v26, %v6599_v7  ;;  %v3208_v22 = vadd.f32 %v3207_v14, %v2825_v20  ;;  %v3280_v44 = vmul.f32 %v2826_v10, %v2826_v10 }
 0x1ef   :  { %v3341_v29 = vadd.f32 %v3340_v39, %v3278_v50  ;;  %v4200_v56 = vpop.f32.mrf.mxu1  ;;  %v2722_v8 = vpop.f32.mrf.mxu0  ;;  %v6606_v39 = vld [vmem:[#allocation79_spill] sm:$0xff] }
 0x1f0   :  { %v3846_v48 = vpack.c.bf16 %v2829_v13, %v2828_v55  ;;  %v2827_v42 = vadd.f32 %v2706_v49, %v2160_v60  ;;  %v3209_v9 = vadd.f32 %v3208_v22, %v2826_v10  ;;  %v2181_v12 = vadd.f32 %v4200_v56, %v6600_v30  ;;  %v6607_v22 = vld [vmem:[#allocation80_spill] sm:$0xff] }
 0x1f1   :  { %v3342_v11 = vadd.f32 %v3341_v29, %v3279_v46  ;;  %v2172_v23 = vpop.f32.mrf.mxu1  ;;  %v4284_v33 = vpop.f32.mrf.mxu0  ;;  %v3283_v49 = vmul.f32 %v2829_v13, %v2829_v13 }
 0x1f2   :  { %3925 = vst [vmem:[%s6199_s4 + $0xb8] sm:$0xff] %v3846_v48   ;;  %v3841_v6 = vpack.c.bf16 %v2827_v42, %v2826_v10  ;;  %v3281_v5 = vmul.f32 %v2827_v42, %v2827_v42  ;;  %v2173_v54 = vadd.f32 %v2172_v23, %v6601_v24  ;;  %v3210_v47 = vadd.f32 %v3209_v9, %v2827_v42 }
 0x1f3   :  { %v3343_v19 = vadd.f32 %v3342_v11, %v3280_v44  ;;  %v4201_v41 = vpop.f32.mrf.mxu1  ;;  %v2735_v52 = vpop.f32.mrf.mxu0  ;;  %v2832_v37 = vadd.f32 %v4280_v27, %v2181_v12 }
 0x1f4   :  { %3924 = vst [vmem:[%s6199_s4 + $0xb0] sm:$0xff] %v3841_v6   ;;  %v2184_v17 = vadd.f32 %v4201_v41, %v6602_v38  ;;  %v3211_v35 = vadd.f32 %v3210_v47, %v2828_v55  ;;  %v2830_v20 = vadd.f32 %v2719_v15, %v2173_v54  ;;  %v6608_v54 = vld [vmem:[#allocation81_spill] sm:$0xff] }
 0x1f5   :  { %v3344_v43 = vadd.f32 %v3343_v19, %v3281_v5  ;;  %v2175_v0 = vpop.f32.mrf.mxu1  ;;  %v4285_v2 = vpop.f32.mrf.mxu0  ;;  %v3286_v26 = vmul.f32 %v2832_v37, %v2832_v37  ;;  %v6609_v47 = vld [vmem:[#allocation53_spill] sm:$0xff] }
 0x1f6   :  { %v2833_v16 = vadd.f32 %v4281_v36, %v2184_v17  ;;  %v2176_v53 = vadd.f32 %v2175_v0, %v6603_v21  ;;  %v3212_v31 = vadd.f32 %v3211_v35, %v2829_v13  ;;  %v3284_v59 = vmul.f32 %v2830_v20, %v2830_v20  ;;  %v6610_v35 = vld [vmem:[#allocation55_spill] sm:$0xff] }
 0x1f7   :  { %v3345_v32 = vadd.f32 %v3344_v43, %v3282_v1  ;;  %v4204_v45 = vpop.f32.mrf.mxu1  ;;  %v2738_v58 = vpop.f32.mrf.mxu0 }
 0x1f8   :  { %v3856_v25 = vpack.c.bf16 %v2833_v16, %v2832_v37  ;;  %v2831_v40 = vadd.f32 %v2722_v8, %v2176_v53  ;;  %v3213_v61 = vadd.f32 %v3212_v31, %v2830_v20  ;;  %v2197_v63 = vadd.f32 %v4204_v45, %v6604_v3 }
 0x1f9   :  { %v3346_v18 = vadd.f32 %v3345_v32, %v3283_v49  ;;  %v2188_v62 = vpop.f32.mrf.mxu1  ;;  %v4288_v34 = vpop.f32.mrf.mxu0  ;;  %v3287_v8 = vmul.f32 %v2833_v16, %v2833_v16  ;;  %v6611_v49 = vld [vmem:[#allocation35_spill] sm:$0xff] }
 0x1fa   :  { %3927 = vst [vmem:[%s6199_s4 + $0xc8] sm:$0xff] %v3856_v25   ;;  %v3851_v27 = vpack.c.bf16 %v2831_v40, %v2830_v20  ;;  %v3285_v51 = vmul.f32 %v2831_v40, %v2831_v40  ;;  %v2189_v15 = vadd.f32 %v2188_v62, %v6605_v57  ;;  %v3214_v4 = vadd.f32 %v3213_v61, %v2831_v40 }
 0x1fb   :  { %v3347_v28 = vadd.f32 %v3346_v18, %v3284_v59  ;;  %v4205_v50 = vpop.f32.mrf.mxu1  ;;  %v2751_v14 = vpop.f32.mrf.mxu0  ;;  %v2836_v46 = vadd.f32 %v4284_v33, %v2197_v63  ;;  %v6612_v63 = vld [vmem:[#allocation36_spill] sm:$0xff] }
 0x1fc   :  { %3926 = vst [vmem:[%s6199_s4 + $0xc0] sm:$0xff] %v3851_v27   ;;  %v2200_v10 = vadd.f32 %v4205_v50, %v6606_v39  ;;  %v3215_v36 = vadd.f32 %v3214_v4, %v2832_v37  ;;  %v2834_v13 = vadd.f32 %v2735_v52, %v2189_v15  ;;  %v6613_v15 = vld [vmem:[#allocation61_spill] sm:$0xff] }
 0x1fd   :  { %v3348_v55 = vadd.f32 %v3347_v28, %v3285_v51  ;;  %v2191_v7 = vpop.f32.mrf.mxu1  ;;  %v4289_v60 = vpop.f32.mrf.mxu0  ;;  %v3290_v20 = vmul.f32 %v2836_v46, %v2836_v46 }
 0x1fe   :  { %v2837_v29 = vadd.f32 %v4285_v2, %v2200_v10  ;;  %v2192_v56 = vadd.f32 %v2191_v7, %v6607_v22  ;;  %v3216_v42 = vadd.f32 %v3215_v36, %v2833_v16  ;;  %v3288_v5 = vmul.f32 %v2834_v13, %v2834_v13  ;;  %v6614_v10 = vld [vmem:[#allocation62_spill] sm:$0xff]  ;;  %v6615_v22 = vld [vmem:[#allocation41_spill] sm:$0xff] }
 0x1ff   :  { %v3349_v48 = vadd.f32 %v3348_v55, %v3286_v26  ;;  %v4208_v9 = vpop.f32.mrf.mxu1  ;;  %v2754_v44 = vpop.f32.mrf.mxu0 }
 0x200   :  { %v3866_v11 = vpack.c.bf16 %v2837_v29, %v2836_v46  ;;  %v2835_v23 = vadd.f32 %v2738_v58, %v2192_v56  ;;  %v3217_v6 = vadd.f32 %v3216_v42, %v2834_v13  ;;  %v2213_v19 = vadd.f32 %v4208_v9, %v6608_v54 }
 0x201   :  { %v3350_v30 = vadd.f32 %v3349_v48, %v3287_v8  ;;  %v2204_v12 = vpop.f32.mrf.mxu1  ;;  %v4292_v1 = vpop.f32.mrf.mxu0  ;;  %v3291_v31 = vmul.f32 %v2837_v29, %v2837_v29 }
 0x202   :  { %3929 = vst [vmem:[%s6199_s4 + $0xd8] sm:$0xff] %v3866_v11   ;;  %v3861_v24 = vpack.c.bf16 %v2835_v23, %v2834_v13  ;;  %v3289_v33 = vmul.f32 %v2835_v23, %v2835_v23  ;;  %v2205_v41 = vadd.f32 %v2204_v12, %v6609_v47  ;;  %v3218_v38 = vadd.f32 %v3217_v6, %v2835_v23 }
 0x203   :  { %v3351_v52 = vadd.f32 %v3350_v30, %v3288_v5  ;;  %v4209_v17 = vpop.f32.mrf.mxu1  ;;  %v2840_v21 = vadd.f32 %v4288_v34, %v2213_v19  ;;  %v2767_v40 = vpop.f32.mrf.mxu0 }
 0x204   :  { %3928 = vst [vmem:[%s6199_s4 + $0xd0] sm:$0xff] %v3861_v24   ;;  %v2216_v43 = vadd.f32 %v4209_v17, %v6610_v35  ;;  %v3219_v0 = vadd.f32 %v3218_v38, %v2836_v46  ;;  %v2838_v37 = vadd.f32 %v2751_v14, %v2205_v41 }
 0x205   :  { %v3352_v2 = vadd.f32 %v3351_v52, %v3289_v33  ;;  %v2207_v16 = vpop.f32.mrf.mxu1  ;;  %v4293_v39 = vpop.f32.mrf.mxu0  ;;  %v3294_v36 = vmul.f32 %v2840_v21, %v2840_v21 }
 0x206   :  { %v2841_v53 = vadd.f32 %v4289_v60, %v2216_v43  ;;  %v2208_v32 = vadd.f32 %v2207_v16, %v6611_v49  ;;  %v3220_v58 = vadd.f32 %v3219_v0, %v2837_v29  ;;  %v3292_v62 = vmul.f32 %v2838_v37, %v2838_v37 }
 0x207   :  { %v3353_v45 = vadd.f32 %v3352_v2, %v3290_v20  ;;  %v4212_v25 = vpop.f32.mrf.mxu1  ;;  %v2770_v9 = vpop.f32.mrf.mxu0 }
 0x208   :  { %v3876_v61 = vpack.c.bf16 %v2841_v53, %v2840_v21  ;;  %v2839_v59 = vadd.f32 %v2754_v44, %v2208_v32  ;;  %v3221_v18 = vadd.f32 %v3220_v58, %v2838_v37  ;;  %v2229_v57 = vadd.f32 %v4212_v25, %v6612_v63 }
 0x209   :  { %v3354_v27 = vadd.f32 %v3353_v45, %v3291_v31  ;;  %v2220_v51 = vpop.f32.mrf.mxu1  ;;  %v3295_v8 = vmul.f32 %v2841_v53, %v2841_v53 }
 0x20a   :  { %3931 = vst [vmem:[%s6199_s4 + $0xe8] sm:$0xff] %v3876_v61   ;;  %v3871_v3 = vpack.c.bf16 %v2839_v59, %v2838_v37  ;;  %v3293_v34 = vmul.f32 %v2839_v59, %v2839_v59  ;;  %v2221_v28 = vadd.f32 %v2220_v51, %v6613_v15  ;;  %v3222_v50 = vadd.f32 %v3221_v18, %v2839_v59 }
 0x20b   :  { %v3355_v4 = vadd.f32 %v3354_v27, %v3292_v62  ;;  %v4213_v14 = vpop.f32.mrf.mxu1  ;;  %v2844_v46 = vadd.f32 %v4292_v1, %v2229_v57 }
 0x20c   :  { %3930 = vst [vmem:[%s6199_s4 + $0xe0] sm:$0xff] %v3871_v3   ;;  %v2232_v26 = vadd.f32 %v4213_v14, %v6614_v10  ;;  %v3223_v55 = vadd.f32 %v3222_v50, %v2840_v21  ;;  %v2842_v7 = vadd.f32 %v2767_v40, %v2221_v28 }
 0x20d   :  { %v3356_v13 = vadd.f32 %v3355_v4, %v3293_v34  ;;  %v2223_v60 = vpop.f32.mrf.mxu1  ;;  %v3298_v54 = vmul.f32 %v2844_v46, %v2844_v46 }
 0x20e   :  { %v2845_v29 = vadd.f32 %v4293_v39, %v2232_v26  ;;  %v2224_v56 = vadd.f32 %v2223_v60, %v6615_v22  ;;  %v3224_v42 = vadd.f32 %v3223_v55, %v2841_v53  ;;  %v3296_v6 = vmul.f32 %v2842_v7, %v2842_v7 }
 0x20f   :  { %v3357_v48 = vadd.f32 %v3356_v13, %v3294_v36 }
 0x210   :  { %v3886_v44 = vpack.c.bf16 %v2845_v29, %v2844_v46  ;;  %v2843_v11 = vadd.f32 %v2770_v9, %v2224_v56  ;;  %v3225_v23 = vadd.f32 %v3224_v42, %v2842_v7  ;;  %v3299_v41 = vmul.f32 %v2845_v29, %v2845_v29 }
 0x211   :  { %v3358_v5 = vadd.f32 %v3357_v48, %v3295_v8 }
 0x212   :  { %3933 = vst [vmem:[%s6199_s4 + $0xf8] sm:$0xff] %v3886_v44   ;;  %v3881_v30 = vpack.c.bf16 %v2843_v11, %v2842_v7  ;;  %v3297_v12 = vmul.f32 %v2843_v11, %v2843_v11  ;;  %v3226_v33 = vadd.f32 %v3225_v23, %v2843_v11 }
 0x213   :  { %v3359_v24 = vadd.f32 %v3358_v5, %v3296_v6 }
 0x214   :  { %3932 = vst [vmem:[%s6199_s4 + $0xf0] sm:$0xff] %v3881_v30   ;;  %v3227_v19 = vadd.f32 %v3226_v33, %v2844_v46 }
 0x215   :  { %v3360_v47 = vadd.f32 %v3359_v24, %v3297_v12 }
 0x216   :  { %v3228_v52 = vadd.f32 %v3227_v19, %v2845_v29 }
 0x217   :  { %v3361_v38 = vadd.f32 %v3360_v47, %v3298_v54 }
 0x218   :  { %v3229_v17 = vrot.slane %v3228_v52, 4 }
 0x219   :  { %v3362_v1 = vadd.f32 %v3361_v38, %v3299_v41 }
 0x21a   :  { %v3230_v35 = vadd.f32 %v3229_v17, %v3228_v52 }
 0x21b   :  { %v3363_v43 = vrot.slane %v3362_v1, 4 }
 0x21c   :  { %v3231_v20 = vrot.slane %v3230_v35, 2 }
 0x21d   :  { %v3364_v0 = vadd.f32 %v3363_v43, %v3362_v1 }
 0x21e   :  { %v3232_v2 = vadd.f32 %v3231_v20, %v3230_v35 }
 0x21f   :  { %v3365_v37 = vrot.slane %v3364_v0, 2 }
 0x220   :  { %v3233_v16 = vrot.slane %v3232_v2, 1 }
 0x221   :  { %v3366_v21 = vadd.f32 %v3365_v37, %v3364_v0 }
 0x222   :  { %v3234_v53 = vadd.f32 %v3233_v16, %v3232_v2 }
 0x223   :  { %v3367_v49 = vrot.slane %v3366_v21, 1 }
 0x224   :  { %3235 = vst [vmem:[%s6200_s5] sm:$0xff] %v3234_v53 }
 0x225   :  { %v3368_v32 = vadd.f32 %v3367_v49, %v3366_v21 }
 0x227   :  { %3369 = vst [vmem:[%s6201_s6] sm:$0xff] %v3368_v32 }

</bundles_post_ra>
